<compile_context>
chip_gen: v5e
topology: v5e:2x2
jax: 0.10.0
libtpu: 0.0.40
codegen_flags: <defaults>
</compile_context>

<pallas_src>
import functools

import jax
import jax.numpy as jnp
from jax import lax
from jax.experimental import pallas as pl
from jax.experimental.pallas import tpu as pltpu

EPS = 1e-5      # nn.BatchNorm2d default eps
LANE = 128      # TPU lane width: pad Cout up to this for lane-dense stores


def conv_block_kernel(xpad_ref, w_ref, b_ref, gamma_ref, beta_ref,
                      temb_ref, wt_ref, bt_ref, out_ref, *, ksize):
    """Fused conv3x3 + batchnorm (batch stats) + relu + time-projection add.

    xpad_ref : (N, H+2p, W+2p, Cin)   spatially pre-padded input, NHWC
    w_ref    : (KH*KW*Cin, Cp)        conv weight, taps flattened, Cout padded to Cp
    b_ref    : (1, Cp)                conv bias (padded)
    gamma/beta_ref : (1, Cp)          batchnorm affine params (padded)
    temb_ref : (N, E)                 time embedding
    wt_ref   : (E, Cp)                time projection weight (padded)
    bt_ref   : (1, Cp)                time projection bias (padded)
    out_ref  : (N, H*W, Cp)           lane-dense output (Cp = 128)
    """
    N, HW, Cp = out_ref.shape
    _, Hp, Wp, Cin = xpad_ref.shape
    KH = KW = ksize
    Ho = Hp - (KH - 1)
    Wo = Wp - (KW - 1)

    # ---- implicit im2col: concat the KH*KW shifted windows on the lane axis ----
    # (replaces 9 per-tap reshapes + 9 tiny K=Cin matmuls + 8 VALU accumulate-adds)
    cols = []
    for kh in range(KH):
        for kw in range(KW):
            cols.append(xpad_ref[:, kh:kh + Ho, kw:kw + Wo, :])     # (N, Ho, Wo, Cin)
    col = jnp.concatenate(cols, axis=-1)                            # (N, Ho, Wo, KH*KW*Cin)
    # leading-dim merge only (minor dim untouched, sublane groups 8-aligned) -> cheap
    col2d = col.reshape(N * Ho * Wo, KH * KW * Cin)

    # ---- single fused MXU matmul, lane-dense output columns (Cp = 128) ----------
    acc = jnp.dot(col2d, w_ref[...], preferred_element_type=jnp.float32)  # (N*Ho*Wo, Cp)
    acc = acc + b_ref[...]

    # ---- BatchNorm2d: training-mode batch statistics over (N, H, W) per channel --
    mean = jnp.mean(acc, axis=0, keepdims=True)                     # (1, Cp)
    var = jnp.mean((acc - mean) ** 2, axis=0, keepdims=True)        # biased variance
    y = (acc - mean) * lax.rsqrt(var + EPS)
    y = y * gamma_ref[...] + beta_ref[...]

    # ---- ReLU --------------------------------------------------------------------
    y = jnp.maximum(y, 0.0)

    # ---- time projection: Linear(E -> Cout), broadcast over (H, W) ----------------
    tproj = jnp.dot(temb_ref[...], wt_ref[...],
                    preferred_element_type=jnp.float32) + bt_ref[...]    # (N, Cp)
    y = y.reshape(N, Ho * Wo, Cp) + tproj[:, None, :]               # free split + bcast

    out_ref[...] = y.astype(out_ref.dtype)


def conv_block_forward(x_nchw, t_emb, params):
    """Pallas ConvBlock forward. x_nchw: (N, Cin, H, W) float32, t_emb: (N, E)."""
    conv_w = params["conv_w"]            # (KH, KW, Cin, Cout)
    conv_b = params["conv_b"]            # (1, Cout)
    gamma = params["gamma"]              # (1, Cout)
    beta = params["beta"]                # (1, Cout)
    wt = params["wt"]                    # (E, Cout)
    bt = params["bt"]                    # (1, Cout)

    KH, KW, Cin, Cout = conv_w.shape
    pad = KH // 2
    N, _, H, W = x_nchw.shape
    E = wt.shape[0]
    Cp = max(LANE, ((Cout + LANE - 1) // LANE) * LANE)   # lane-dense channel width

    # NCHW -> NHWC + halo padding.  In a model kept end-to-end in NHWC these two ops
    # (and the final transpose back) would drop out of the hot path entirely.
    x_nhwc = jnp.transpose(x_nchw, (0, 2, 3, 1)).astype(jnp.float32)
    x_pad = jnp.pad(x_nhwc, ((0, 0), (pad, pad), (pad, pad), (0, 0)))

    def pad_cout(a, value=0.0):
        return jnp.pad(a.astype(jnp.float32), ((0, 0), (0, Cp - Cout)),
                       constant_values=value)

    w2d = pad_cout(conv_w.reshape(KH * KW * Cin, Cout))   # (KH*KW*Cin, Cp)
    b2d = pad_cout(conv_b)
    gamma2d = pad_cout(gamma, 1.0)
    beta2d = pad_cout(beta)
    wt2d = pad_cout(wt)
    bt2d = pad_cout(bt)

    flops = 2 * N * H * W * KH * KW * Cin * Cp + 2 * N * E * Cp
    bytes_accessed = 4 * (x_pad.size + w2d.size + t_emb.size + N * H * W * Cp)
    cost = pl.CostEstimate(flops=flops, transcendentals=Cp,
                           bytes_accessed=bytes_accessed)

    def full_spec(shape):
        nd = len(shape)
        return pl.BlockSpec(shape, lambda i, _nd=nd: (0,) * _nd)

    kernel = functools.partial(conv_block_kernel, ksize=KH)

    out = pl.pallas_call(
        kernel,
        out_shape=jax.ShapeDtypeStruct((N, H * W, Cp), jnp.float32),
        grid=(1,),
        in_specs=[
            full_spec(x_pad.shape),
            full_spec(w2d.shape),
            full_spec(b2d.shape),
            full_spec(gamma2d.shape),
            full_spec(beta2d.shape),
            full_spec(t_emb.shape),
            full_spec(wt2d.shape),
            full_spec(bt2d.shape),
        ],
        out_specs=full_spec((N, H * W, Cp)),
        compiler_params=pltpu.CompilerParams(
            dimension_semantics=("arbitrary",)),
        cost_estimate=cost,
    )(x_pad, w2d, b2d, gamma2d, beta2d, t_emb.astype(jnp.float32), wt2d, bt2d)

    out = out[:, :, :Cout].reshape(N, H, W, Cout)
    return jnp.transpose(out, (0, 3, 1, 2))              # back to NCHW


def reference_forward(x_nchw, t_emb, params):
    """Pure-JAX reference mirroring the PyTorch module (training-mode BN)."""
    conv_w = params["conv_w"]                                  # (KH, KW, Cin, Cout)
    w_oihw = jnp.transpose(conv_w, (3, 2, 0, 1))               # (Cout, Cin, KH, KW)
    y = lax.conv_general_dilated(
        x_nchw, w_oihw, window_strides=(1, 1), padding="SAME",
        dimension_numbers=("NCHW", "OIHW", "NCHW"))
    y = y + params["conv_b"].reshape(1, -1, 1, 1)
    mean = jnp.mean(y, axis=(0, 2, 3), keepdims=True)
    var = jnp.mean((y - mean) ** 2, axis=(0, 2, 3), keepdims=True)
    y = (y - mean) * lax.rsqrt(var + EPS)
    y = y * params["gamma"].reshape(1, -1, 1, 1) + params["beta"].reshape(1, -1, 1, 1)
    y = jnp.maximum(y, 0.0)
    tproj = t_emb @ params["wt"] + params["bt"]                # (N, Cout)
    return y + tproj[:, :, None, None]


if __name__ == "__main__":
    # Shapes consistent with ConvBlock(in_channels=4, out_channels=8, kernel_size=3,
    # stride=1, embedding_dim=32, up_sample=False).
    N, Cin, Cout, H, W, E, K = 2, 4, 8, 16, 16, 32, 3

    key = jax.random.PRNGKey(0)
    kx, kt, kw, kb, kg, kbt, kwt, kbt2 = jax.random.split(key, 8)

    x = jax.random.normal(kx, (N, Cin, H, W), jnp.float32)
    t_emb = jax.random.normal(kt, (N, E), jnp.float32)

    params = {
        "conv_w": 0.1 * jax.random.normal(kw, (K, K, Cin, Cout), jnp.float32),
        "conv_b": 0.1 * jax.random.normal(kb, (1, Cout), jnp.float32),
        "gamma": 1.0 + 0.05 * jax.random.normal(kg, (1, Cout), jnp.float32),
        "beta": 0.05 * jax.random.normal(kbt, (1, Cout), jnp.float32),
        "wt": 0.1 * jax.random.normal(kwt, (E, Cout), jnp.float32),
        "bt": 0.1 * jax.random.normal(kbt2, (1, Cout), jnp.float32),
    }

    out = jax.block_until_ready(conv_block_forward(x, t_emb, params))
    ref = jax.block_until_ready(reference_forward(x, t_emb, params))

    assert out.shape == (N, Cout, H, W), out.shape
    assert jnp.allclose(out, ref, rtol=1e-4, atol=1e-4), \
        float(jnp.max(jnp.abs(out - ref)))

    print("KERNEL_OK")
</pallas_src>

<mosaic_0001>
module attributes {stable_mosaic.version = 11 : i64} {
  func.func @conv_block_kernel(%arg0: i32, %arg1: memref<2x18x18x4xf32, #tpu.memory_space<vmem>>, %arg2: memref<36x128xf32, #tpu.memory_space<vmem>>, %arg3: memref<1x128xf32, #tpu.memory_space<vmem>>, %arg4: memref<1x128xf32, #tpu.memory_space<vmem>>, %arg5: memref<1x128xf32, #tpu.memory_space<vmem>>, %arg6: memref<2x32xf32, #tpu.memory_space<vmem>>, %arg7: memref<32x128xf32, #tpu.memory_space<vmem>>, %arg8: memref<1x128xf32, #tpu.memory_space<vmem>>, %arg9: memref<2x256x128xf32, #tpu.memory_space<vmem>>) attributes {dimension_semantics = [#tpu.dimension_semantics<arbitrary>], iteration_bounds = array<i64: 1>, scalar_prefetch = 0 : i64, scratch_operands = 0 : i64, tpu.core_type = #tpu.core_type<tc>, window_params = [{pipeline_mode = #tpu.pipeline_mode<synchronous>, transform_indices = @transform_0, window_bounds = array<i64: 2, 18, 18, 4>}, {pipeline_mode = #tpu.pipeline_mode<synchronous>, transform_indices = @transform_1, window_bounds = array<i64: 36, 128>}, {pipeline_mode = #tpu.pipeline_mode<synchronous>, transform_indices = @transform_2, window_bounds = array<i64: 1, 128>}, {pipeline_mode = #tpu.pipeline_mode<synchronous>, transform_indices = @transform_3, window_bounds = array<i64: 1, 128>}, {pipeline_mode = #tpu.pipeline_mode<synchronous>, transform_indices = @transform_4, window_bounds = array<i64: 1, 128>}, {pipeline_mode = #tpu.pipeline_mode<synchronous>, transform_indices = @transform_5, window_bounds = array<i64: 2, 32>}, {pipeline_mode = #tpu.pipeline_mode<synchronous>, transform_indices = @transform_6, window_bounds = array<i64: 32, 128>}, {pipeline_mode = #tpu.pipeline_mode<synchronous>, transform_indices = @transform_7, window_bounds = array<i64: 1, 128>}, {pipeline_mode = #tpu.pipeline_mode<synchronous>, transform_indices = @transform_8, window_bounds = array<i64: 2, 256, 128>}]} {
    %c0 = arith.constant 0 : index
    %c0_0 = arith.constant 0 : index
    %c0_1 = arith.constant 0 : index
    %c0_2 = arith.constant 0 : index
    %0 = vector.load %arg1[%c0, %c0_0, %c0_1, %c0_2] : memref<2x18x18x4xf32, #tpu.memory_space<vmem>>, vector<2x16x16x4xf32>
    %c0_3 = arith.constant 0 : index
    %c0_4 = arith.constant 0 : index
    %c1 = arith.constant 1 : index
    %c0_5 = arith.constant 0 : index
    %1 = vector.load %arg1[%c0_3, %c0_4, %c1, %c0_5] : memref<2x18x18x4xf32, #tpu.memory_space<vmem>>, vector<2x16x16x4xf32>
    %c0_6 = arith.constant 0 : index
    %c0_7 = arith.constant 0 : index
    %c2 = arith.constant 2 : index
    %c0_8 = arith.constant 0 : index
    %2 = vector.load %arg1[%c0_6, %c0_7, %c2, %c0_8] : memref<2x18x18x4xf32, #tpu.memory_space<vmem>>, vector<2x16x16x4xf32>
    %c0_9 = arith.constant 0 : index
    %c1_10 = arith.constant 1 : index
    %c0_11 = arith.constant 0 : index
    %c0_12 = arith.constant 0 : index
    %3 = vector.load %arg1[%c0_9, %c1_10, %c0_11, %c0_12] : memref<2x18x18x4xf32, #tpu.memory_space<vmem>>, vector<2x16x16x4xf32>
    %c0_13 = arith.constant 0 : index
    %c1_14 = arith.constant 1 : index
    %c1_15 = arith.constant 1 : index
    %c0_16 = arith.constant 0 : index
    %4 = vector.load %arg1[%c0_13, %c1_14, %c1_15, %c0_16] : memref<2x18x18x4xf32, #tpu.memory_space<vmem>>, vector<2x16x16x4xf32>
    %c0_17 = arith.constant 0 : index
    %c1_18 = arith.constant 1 : index
    %c2_19 = arith.constant 2 : index
    %c0_20 = arith.constant 0 : index
    %5 = vector.load %arg1[%c0_17, %c1_18, %c2_19, %c0_20] : memref<2x18x18x4xf32, #tpu.memory_space<vmem>>, vector<2x16x16x4xf32>
    %c0_21 = arith.constant 0 : index
    %c2_22 = arith.constant 2 : index
    %c0_23 = arith.constant 0 : index
    %c0_24 = arith.constant 0 : index
    %6 = vector.load %arg1[%c0_21, %c2_22, %c0_23, %c0_24] : memref<2x18x18x4xf32, #tpu.memory_space<vmem>>, vector<2x16x16x4xf32>
    %c0_25 = arith.constant 0 : index
    %c2_26 = arith.constant 2 : index
    %c1_27 = arith.constant 1 : index
    %c0_28 = arith.constant 0 : index
    %7 = vector.load %arg1[%c0_25, %c2_26, %c1_27, %c0_28] : memref<2x18x18x4xf32, #tpu.memory_space<vmem>>, vector<2x16x16x4xf32>
    %c0_29 = arith.constant 0 : index
    %c2_30 = arith.constant 2 : index
    %c2_31 = arith.constant 2 : index
    %c0_32 = arith.constant 0 : index
    %8 = vector.load %arg1[%c0_29, %c2_30, %c2_31, %c0_32] : memref<2x18x18x4xf32, #tpu.memory_space<vmem>>, vector<2x16x16x4xf32>
    %9 = tpu.concatenate %0, %1, %2, %3, %4, %5, %6, %7, %8 in 3 : vector<2x16x16x4xf32>, vector<2x16x16x4xf32>, vector<2x16x16x4xf32>, vector<2x16x16x4xf32>, vector<2x16x16x4xf32>, vector<2x16x16x4xf32>, vector<2x16x16x4xf32>, vector<2x16x16x4xf32>, vector<2x16x16x4xf32> -> vector<2x16x16x36xf32>
    %10 = vector.shape_cast %9 : vector<2x16x16x36xf32> to vector<512x36xf32>
    %c0_33 = arith.constant 0 : index
    %c0_34 = arith.constant 0 : index
    %11 = vector.load %arg2[%c0_33, %c0_34] : memref<36x128xf32, #tpu.memory_space<vmem>>, vector<36x128xf32>
    %cst = arith.constant dense<0.000000e+00> : vector<512x128xf32>
    %12 = tpu.matmul %10, %11, %cst {dimension_numbers = #tpu.dot_dimension_numbers<[1], [0], [0], [1], [0, 0, 1, 1], [], []>} : vector<512x36xf32>, vector<36x128xf32>, vector<512x128xf32> -> vector<512x128xf32>
    %c0_35 = arith.constant 0 : index
    %c0_36 = arith.constant 0 : index
    %13 = vector.load %arg3[%c0_35, %c0_36] : memref<1x128xf32, #tpu.memory_space<vmem>>, vector<1x128xf32>
    %14 = vector.broadcast %13 : vector<1x128xf32> to vector<512x128xf32>
    %15 = arith.addf %12, %14 : vector<512x128xf32>
    %cst_37 = arith.constant dense<0.000000e+00> : vector<128xf32>
    %16 = vector.multi_reduction <add>, %15, %cst_37 [0] : vector<512x128xf32> to vector<128xf32>
    %17 = vector.shape_cast %16 : vector<128xf32> to vector<1x128xf32>
    %cst_38 = arith.constant 5.120000e+02 : f32
    %18 = vector.broadcast %cst_38 : f32 to vector<1x128xf32>
    %19 = arith.divf %17, %18 : vector<1x128xf32>
    %20 = vector.broadcast %19 : vector<1x128xf32> to vector<512x128xf32>
    %21 = arith.subf %15, %20 : vector<512x128xf32>
    %22 = arith.mulf %21, %21 : vector<512x128xf32>
    %cst_39 = arith.constant dense<0.000000e+00> : vector<128xf32>
    %23 = vector.multi_reduction <add>, %22, %cst_39 [0] : vector<512x128xf32> to vector<128xf32>
    %24 = vector.shape_cast %23 : vector<128xf32> to vector<1x128xf32>
    %cst_40 = arith.constant 5.120000e+02 : f32
    %25 = vector.broadcast %cst_40 : f32 to vector<1x128xf32>
    %26 = arith.divf %24, %25 : vector<1x128xf32>
    %27 = vector.broadcast %19 : vector<1x128xf32> to vector<512x128xf32>
    %28 = arith.subf %15, %27 : vector<512x128xf32>
    %cst_41 = arith.constant 9.99999974E-6 : f32
    %29 = vector.broadcast %cst_41 : f32 to vector<1x128xf32>
    %30 = arith.addf %26, %29 : vector<1x128xf32>
    %31 = math.rsqrt %30 : vector<1x128xf32>
    %32 = vector.broadcast %31 : vector<1x128xf32> to vector<512x128xf32>
    %33 = arith.mulf %28, %32 : vector<512x128xf32>
    %c0_42 = arith.constant 0 : index
    %c0_43 = arith.constant 0 : index
    %34 = vector.load %arg4[%c0_42, %c0_43] : memref<1x128xf32, #tpu.memory_space<vmem>>, vector<1x128xf32>
    %35 = vector.broadcast %34 : vector<1x128xf32> to vector<512x128xf32>
    %36 = arith.mulf %33, %35 : vector<512x128xf32>
    %c0_44 = arith.constant 0 : index
    %c0_45 = arith.constant 0 : index
    %37 = vector.load %arg5[%c0_44, %c0_45] : memref<1x128xf32, #tpu.memory_space<vmem>>, vector<1x128xf32>
    %38 = vector.broadcast %37 : vector<1x128xf32> to vector<512x128xf32>
    %39 = arith.addf %36, %38 : vector<512x128xf32>
    %cst_46 = arith.constant 0.000000e+00 : f32
    %40 = vector.broadcast %cst_46 : f32 to vector<512x128xf32>
    %41 = arith.maximumf %39, %40 : vector<512x128xf32>
    %c0_47 = arith.constant 0 : index
    %c0_48 = arith.constant 0 : index
    %42 = vector.load %arg6[%c0_47, %c0_48] : memref<2x32xf32, #tpu.memory_space<vmem>>, vector<2x32xf32>
    %c0_49 = arith.constant 0 : index
    %c0_50 = arith.constant 0 : index
    %43 = vector.load %arg7[%c0_49, %c0_50] : memref<32x128xf32, #tpu.memory_space<vmem>>, vector<32x128xf32>
    %cst_51 = arith.constant dense<0.000000e+00> : vector<2x128xf32>
    %44 = tpu.matmul %42, %43, %cst_51 {dimension_numbers = #tpu.dot_dimension_numbers<[1], [0], [0], [1], [0, 0, 1, 1], [], []>} : vector<2x32xf32>, vector<32x128xf32>, vector<2x128xf32> -> vector<2x128xf32>
    %c0_52 = arith.constant 0 : index
    %c0_53 = arith.constant 0 : index
    %45 = vector.load %arg8[%c0_52, %c0_53] : memref<1x128xf32, #tpu.memory_space<vmem>>, vector<1x128xf32>
    %46 = vector.broadcast %45 : vector<1x128xf32> to vector<2x128xf32>
    %47 = arith.addf %44, %46 : vector<2x128xf32>
    %48 = vector.shape_cast %41 : vector<512x128xf32> to vector<2x256x128xf32>
    %49 = vector.shape_cast %47 : vector<2x128xf32> to vector<2x1x128xf32>
    %50 = vector.broadcast %49 : vector<2x1x128xf32> to vector<2x256x128xf32>
    %51 = arith.addf %48, %50 : vector<2x256x128xf32>
    %c0_54 = arith.constant 0 : index
    %c0_55 = arith.constant 0 : index
    %c0_56 = arith.constant 0 : index
    %52 = vector.load %arg9[%c0_54, %c0_55, %c0_56] : memref<2x256x128xf32, #tpu.memory_space<vmem>>, vector<2x256x128xf32>
    tpu.vector_store %arg9[%c0_54, %c0_55, %c0_56], %51 {strides = array<i32>} : memref<2x256x128xf32, #tpu.memory_space<vmem>>, vector<2x256x128xf32>,
    return
  }
  func.func @transform_0(%arg0: i32) -> (i32, i32, i32, i32) {
    %c0_i32 = arith.constant 0 : i32
    %c0_i32_0 = arith.constant 0 : i32
    %c0_i32_1 = arith.constant 0 : i32
    %c0_i32_2 = arith.constant 0 : i32
    %c0_i32_3 = arith.constant 0 : i32
    return %c0_i32, %c0_i32_0, %c0_i32_1, %c0_i32_2 : i32, i32, i32, i32
  }
  func.func @transform_1(%arg0: i32) -> (i32, i32) {
    %c0_i32 = arith.constant 0 : i32
    %c0_i32_0 = arith.constant 0 : i32
    %c0_i32_1 = arith.constant 0 : i32
    return %c0_i32, %c0_i32_0 : i32, i32
  }
  func.func @transform_2(%arg0: i32) -> (i32, i32) {
    %c0_i32 = arith.constant 0 : i32
    %c0_i32_0 = arith.constant 0 : i32
    %c0_i32_1 = arith.constant 0 : i32
    return %c0_i32, %c0_i32_0 : i32, i32
  }
  func.func @transform_3(%arg0: i32) -> (i32, i32) {
    %c0_i32 = arith.constant 0 : i32
    %c0_i32_0 = arith.constant 0 : i32
    %c0_i32_1 = arith.constant 0 : i32
    return %c0_i32, %c0_i32_0 : i32, i32
  }
  func.func @transform_4(%arg0: i32) -> (i32, i32) {
    %c0_i32 = arith.constant 0 : i32
    %c0_i32_0 = arith.constant 0 : i32
    %c0_i32_1 = arith.constant 0 : i32
    return %c0_i32, %c0_i32_0 : i32, i32
  }
  func.func @transform_5(%arg0: i32) -> (i32, i32) {
    %c0_i32 = arith.constant 0 : i32
    %c0_i32_0 = arith.constant 0 : i32
    %c0_i32_1 = arith.constant 0 : i32
    return %c0_i32, %c0_i32_0 : i32, i32
  }
  func.func @transform_6(%arg0: i32) -> (i32, i32) {
    %c0_i32 = arith.constant 0 : i32
    %c0_i32_0 = arith.constant 0 : i32
    %c0_i32_1 = arith.constant 0 : i32
    return %c0_i32, %c0_i32_0 : i32, i32
  }
  func.func @transform_7(%arg0: i32) -> (i32, i32) {
    %c0_i32 = arith.constant 0 : i32
    %c0_i32_0 = arith.constant 0 : i32
    %c0_i32_1 = arith.constant 0 : i32
    return %c0_i32, %c0_i32_0 : i32, i32
  }
  func.func @transform_8(%arg0: i32) -> (i32, i32, i32) {
    %c0_i32 = arith.constant 0 : i32
    %c0_i32_0 = arith.constant 0 : i32
    %c0_i32_1 = arith.constant 0 : i32
    %c0_i32_2 = arith.constant 0 : i32
    return %c0_i32, %c0_i32_0, %c0_i32_1 : i32, i32, i32
  }
}

</mosaic_0001>

<bundles_post_ra>
// kernel: tpu_custom_call.1
= control target key start
LH: loop header
LB: loop body
LE: loop exit
PB: predicated region body
PF: predicated region fallthrough
CT: control target
= control target key end

     0   :  { %s4895_s11 = smov 4   ;;  %s10095_s0 = inlined_call_operand.vmem [shape: f32[2,18,18,4], index: 0, kind: input, shape index: {}]   ;;  %s10096_s1 = inlined_call_operand.vmem [shape: f32[36,128], index: 1, kind: input, shape index: {}]   ;;  %s10097_s2 = inlined_call_operand.vmem [shape: f32[1,128], index: 2, kind: input, shape index: {}]   ;;  %s10098_s3 = inlined_call_operand.vmem [shape: f32[1,128], index: 3, kind: input, shape index: {}]   ;;  %s10099_s4 = inlined_call_operand.vmem [shape: f32[1,128], index: 4, kind: input, shape index: {}]   ;;  %s10100_s5 = inlined_call_operand.vmem [shape: f32[2,32], index: 5, kind: input, shape index: {}]   ;;  %s10101_s6 = inlined_call_operand.vmem [shape: f32[32,128], index: 6, kind: input, shape index: {}]   ;;  %s10102_s7 = inlined_call_operand.vmem [shape: f32[1,128], index: 7, kind: input, shape index: {}]   ;;  %s10103_s8 = inlined_call_operand.hbm [shape: f32[2,256,128], index: 8, kind: output, shape index: {}]  }
   0x1   :  { %v98_v0 = vld [vmem:[%s10095_s0 + $0x31] sm:$0xff]  ;;  %v96_v1 = vld [vmem:[%s10095_s0 + $0x19] sm:$0xff]  ;;  %v94_v2 = vld [vmem:[%s10095_s0 + $0x1] sm:$0xff] }
   0x2   :  { %680 = vrot.lane.b32.xlu2 %v98_v0, %s4895_s11  ;;  %676 = vrot.lane.b32.xlu1 %v96_v1, %s4895_s11  ;;  %v99_v3 = vld [vmem:[%s10095_s0 + $0x39] sm:$0xff]  ;;  %v97_v4 = vld [vmem:[%s10095_s0 + $0x21] sm:$0xff] }
   0x3   :  { %672 = vrot.lane.b32.xlu0 %v94_v2, %s4895_s11  ;;  %v95_v5 = vld [vmem:[%s10095_s0 + $0x9] sm:$0xff] }
   0x4   :  { %13 = vsyncpa [#allocation3], 0  ;;  %v102_v6 = vld [vmem:[%s10095_s0 + $0x61] sm:$0xff]  ;;  %v101_v7 = vld [vmem:[%s10095_s0 + $0x51] sm:$0xff]  ;;  %s4896_s12 = smov 8   ;;  %s4897_s13 = smov 12  }
   0x5   :  { %v100_v8 = vld [vmem:[%s10095_s0 + $0x49] sm:$0xff]  ;;  %v105_v9 = vld [vmem:[%s10095_s0 + $0x81] sm:$0xff]  ;;  %v104_v10 = vld [vmem:[%s10095_s0 + $0x79] sm:$0xff]  ;;  %s4898_s25 = smov 16   ;;  %s4899_s9 = smov 20   ;;  %vm3378_vm0 = vcmask 1043456  }
   0x6   :  { %v103_v11 = vld [vmem:[%s10095_s0 + $0x69] sm:$0xff]  ;;  %v107_v13 = vld [vmem:[%s10095_s0 + $0x99] sm:$0xff]  ;;  %v106_v14 = vld [vmem:[%s10095_s0 + $0x91] sm:$0xff]  ;;  %s4901_s22 = smov 32   ;;  %vm2656_vm1 = vcmask 31744   ;;  %vm2786_vm2 = vcmask 97280  }
   0x7   :  { %v108_v12 = vld [vmem:[%s10095_s0 + $0xa9] sm:$0xff]  ;;  %v110_v16 = vld [vmem:[%s10095_s0 + $0xc1] sm:$0xff]  ;;  %v109_v17 = vld [vmem:[%s10095_s0 + $0xb1] sm:$0xff]  ;;  %vm2721_vm3 = vcmask 64512   ;;  %vm2851_vm4 = vcmask 130048   ;;  %vm2981_vm5 = vcmask 195584  }
   0x8   :  { %v111_v15 = vld [vmem:[%s10095_s0 + $0xc9] sm:$0xff]  ;;  %v114_v18 = vld [vmem:[%s10095_s0 + $0xf1] sm:$0xff]  ;;  %v113_v19 = vld [vmem:[%s10095_s0 + $0xe1] sm:$0xff]  ;;  %vm2916_vm6 = vcmask 162816   ;;  %vm3046_vm7 = vcmask 228352   ;;  %vm3111_vm8 = vcmask 261120  }
   0x9   :  { %v112_v20 = vld [vmem:[%s10095_s0 + $0xd9] sm:$0xff]  ;;  %v117_v21 = vld [vmem:[%s10095_s0 + $0x111] sm:$0xff]  ;;  %v116_v22 = vld [vmem:[%s10095_s0 + $0x109] sm:$0xff]  ;;  %vm3185_vm9 = vcmask 293888   ;;  %s4313_s24 = sshll.u32 %s10103_s8, 4  ;;  %s4314_s24 = int_to_ptr.hbm [resolvable:$true] %s4313_s24 }
   0xa   :  { %682 = vrot.lane.b32.xlu2 %v99_v3, %s4895_s11  ;;  %678 = vrot.lane.b32.xlu1 %v97_v4, %s4895_s11  ;;  %v115_v23 = vld [vmem:[%s10095_s0 + $0xf9] sm:$0xff]  ;;  %v119_v25 = vld [vmem:[%s10095_s0 + $0x129] sm:$0xff] }
   0xb   :  { %674 = vrot.lane.b32.xlu0 %v95_v5, %s4895_s11  ;;  %v120_v24 = vld [vmem:[%s10095_s0 + $0x139] sm:$0xff]  ;;  %v118_v26 = vld [vmem:[%s10095_s0 + $0x121] sm:$0xff]  ;;  %v122_v28 = vld [vmem:[%s10095_s0 + $0x151] sm:$0xff] }
   0xc   :  { %v123_v27 = vld [vmem:[%s10095_s0 + $0x159] sm:$0xff]  ;;  %v121_v29 = vld [vmem:[%s10095_s0 + $0x141] sm:$0xff]  ;;  %v126_v30 = vld [vmem:[%s10095_s0 + $0x1b1] sm:$0xff] }
   0xd   :  { %v125_v31 = vld [vmem:[%s10095_s0 + $0x171] sm:$0xff]  ;;  %v124_v32 = vld [vmem:[%s10095_s0 + $0x169] sm:$0xff]  ;;  %v127_v35 = vld [vmem:[%s10095_s0 + $0x1b9] sm:$0xff] }
   0xe   :  { %v129_v33 = vld [vmem:[%s10095_s0 + $0x1d1] sm:$0xff]  ;;  %v128_v34 = vld [vmem:[%s10095_s0 + $0x1c9] sm:$0xff]  ;;  %v132_v37 = vld [vmem:[%s10095_s0 + $0x1f9] sm:$0xff] }
   0xf   :  { %v131_v38 = vld [vmem:[%s10095_s0 + $0x1e9] sm:$0xff]  ;;  %v130_v39 = vld [vmem:[%s10095_s0 + $0x1e1] sm:$0xff]  ;;  %v135_v41 = vld [vmem:[%s10095_s0 + $0x219] sm:$0xff] }
  0x10   :  { %v134_v42 = vld [vmem:[%s10095_s0 + $0x211] sm:$0xff]  ;;  %v133_v43 = vld [vmem:[%s10095_s0 + $0x201] sm:$0xff]  ;;  %v136_v47 = vld [vmem:[%s10095_s0 + $0x229] sm:$0xff] }
  0x11   :  { %v138_v45 = vld [vmem:[%s10095_s0 + $0x241] sm:$0xff]  ;;  %v137_v46 = vld [vmem:[%s10095_s0 + $0x231] sm:$0xff]  ;;  %v140_v52 = vld [vmem:[%s10095_s0 + $0x259] sm:$0xff] }
  0x12   :  { %688 = vrot.lane.b32.xlu2 %v102_v6, %s4895_s11  ;;  %686 = vrot.lane.b32.xlu1 %v101_v7, %s4895_s11  ;;  %v141_v51 = vld [vmem:[%s10095_s0 + $0x261] sm:$0xff]  ;;  %v139_v53 = vld [vmem:[%s10095_s0 + $0x249] sm:$0xff] }
  0x13   :  { %684 = vrot.lane.b32.xlu0 %v100_v8, %s4895_s11  ;;  %v144_v57 = vld [vmem:[%s10095_s0 + $0x289] sm:$0xff]  ;;  %v143_v58 = vld [vmem:[%s10095_s0 + $0x279] sm:$0xff]  ;;  %v142_v59 = vld [vmem:[%s10095_s0 + $0x271] sm:$0xff] }
  0x14   :  { %v147_v63 = vld [vmem:[%s10095_s0 + $0x2a9] sm:$0xff]  ;;  %v146_v0 = vld [vmem:[%s10095_s0 + $0x2a1] sm:$0xff]  ;;  %v145_v1 = vld [vmem:[%s10095_s0 + $0x291] sm:$0xff] }
  0x15   :  { %v150_v5 = vld [vmem:[%s10095_s0 + $0x2d1] sm:$0xff]  ;;  %v149_v6 = vld [vmem:[%s10095_s0 + $0x2c1] sm:$0xff]  ;;  %v148_v7 = vld [vmem:[%s10095_s0 + $0x2b9] sm:$0xff] }
  0x1a   :  { %694 = vrot.lane.b32.xlu2 %v105_v9, %s4895_s11  ;;  %692 = vrot.lane.b32.xlu1 %v104_v10, %s4895_s11 }
  0x1b   :  { %690 = vrot.lane.b32.xlu0 %v103_v11, %s4895_s11  ;;  %v153_v11 = vld [vmem:[%s10095_s0 + $0x2f1] sm:$0xff] }
  0x22   :  { %700 = vrot.lane.b32.xlu2 %v108_v12, %s4895_s11  ;;  %698 = vrot.lane.b32.xlu1 %v107_v13, %s4895_s11  ;;  %v152_v12 = vld [vmem:[%s10095_s0 + $0x2e9] sm:$0xff]  ;;  %v151_v13 = vld [vmem:[%s10095_s0 + $0x2d9] sm:$0xff] }
  0x23   :  { %696 = vrot.lane.b32.xlu0 %v106_v14, %s4895_s11 }
  0x2a   :  { %706 = vrot.lane.b32.xlu2 %v111_v15, %s4895_s11  ;;  %704 = vrot.lane.b32.xlu1 %v110_v16, %s4895_s11 }
  0x2b   :  { %702 = vrot.lane.b32.xlu0 %v109_v17, %s4895_s11  ;;  %v156_v17 = vld [vmem:[%s10095_s0 + $0x319] sm:$0xff] }
  0x32   :  { %712 = vrot.lane.b32.xlu2 %v114_v18, %s4895_s11  ;;  %710 = vrot.lane.b32.xlu1 %v113_v19, %s4895_s11  ;;  %v155_v18 = vld [vmem:[%s10095_s0 + $0x309] sm:$0xff]  ;;  %v154_v19 = vld [vmem:[%s10095_s0 + $0x301] sm:$0xff] }
  0x33   :  { %708 = vrot.lane.b32.xlu0 %v112_v20, %s4895_s11 }
  0x3a   :  { %718 = vrot.lane.b32.xlu2 %v117_v21, %s4895_s11  ;;  %716 = vrot.lane.b32.xlu1 %v116_v22, %s4895_s11 }
  0x3b   :  { %714 = vrot.lane.b32.xlu0 %v115_v23, %s4895_s11  ;;  %v159_v23 = vld [vmem:[%s10095_s0 + $0xa] sm:$0xff] }
  0x42   :  { %724 = vrot.lane.b32.xlu2 %v120_v24, %s4895_s11  ;;  %722 = vrot.lane.b32.xlu1 %v119_v25, %s4895_s11  ;;  %v158_v24 = vld [vmem:[%s10095_s0 + $0x2] sm:$0xff] }
  0x43   :  { %720 = vrot.lane.b32.xlu0 %v118_v26, %s4895_s11  ;;  %v157_v25 = vld [vmem:[%s10095_s0 + $0x321] sm:$0xff] }
  0x4a   :  { %730 = vrot.lane.b32.xlu2 %v123_v27, %s4895_s11  ;;  %728 = vrot.lane.b32.xlu1 %v122_v28, %s4895_s11 }
  0x4b   :  { %726 = vrot.lane.b32.xlu0 %v121_v29, %s4895_s11  ;;  %v162_v29 = vld [vmem:[%s10095_s0 + $0x32] sm:$0xff] }
  0x52   :  { %736 = vrot.lane.b32.xlu2 %v126_v30, %s4895_s11  ;;  %734 = vrot.lane.b32.xlu1 %v125_v31, %s4895_s11  ;;  %v161_v30 = vld [vmem:[%s10095_s0 + $0x22] sm:$0xff]  ;;  %v160_v31 = vld [vmem:[%s10095_s0 + $0x1a] sm:$0xff] }
  0x53   :  { %732 = vrot.lane.b32.xlu0 %v124_v32, %s4895_s11 }
  0x5a   :  { %742 = vrot.lane.b32.xlu2 %v129_v33, %s4895_s11  ;;  %740 = vrot.lane.b32.xlu1 %v128_v34, %s4895_s11 }
  0x5b   :  { %738 = vrot.lane.b32.xlu0 %v127_v35, %s4895_s11  ;;  %v165_v35 = vld [vmem:[%s10095_s0 + $0x52] sm:$0xff] }
  0x5c   :  { %v5095_v36 = vpop.permute.xlu2 %680 }
  0x62   :  { %748 = vrot.lane.b32.xlu2 %v132_v37, %s4895_s11  ;;  %746 = vrot.lane.b32.xlu1 %v131_v38, %s4895_s11  ;;  %v164_v37 = vld [vmem:[%s10095_s0 + $0x4a] sm:$0xff]  ;;  %v163_v38 = vld [vmem:[%s10095_s0 + $0x3a] sm:$0xff] }
  0x63   :  { %744 = vrot.lane.b32.xlu0 %v130_v39, %s4895_s11 }
  0x64   :  { %v5109_v40 = vpop.permute.xlu2 %682 }
  0x6a   :  { %754 = vrot.lane.b32.xlu2 %v135_v41, %s4895_s11  ;;  %752 = vrot.lane.b32.xlu1 %v134_v42, %s4895_s11 }
  0x6b   :  { %750 = vrot.lane.b32.xlu0 %v133_v43, %s4895_s11  ;;  %v168_v43 = vld [vmem:[%s10095_s0 + $0x7a] sm:$0xff] }
  0x6c   :  { %v5123_v44 = vpop.permute.xlu2 %688 }
  0x6d   :  { %10147 = vst [vmem:[#allocation5_spill] sm:$0xff] %v5123_v44  ;;  %v6483_v44 = vld [vmem:[%s10095_s0 + $0x82] sm:$0xff] }
  0x72   :  { %760 = vrot.lane.b32.xlu2 %v138_v45, %s4895_s11  ;;  %758 = vrot.lane.b32.xlu1 %v137_v46, %s4895_s11  ;;  %v167_v45 = vld [vmem:[%s10095_s0 + $0x6a] sm:$0xff]  ;;  %v166_v46 = vld [vmem:[%s10095_s0 + $0x62] sm:$0xff] }
  0x73   :  { %756 = vrot.lane.b32.xlu0 %v136_v47, %s4895_s11 }
  0x74   :  { %v5137_v48 = vpop.permute.xlu2 %694  ;;  %v5139_v49 = vpop.permute.xlu1 %676 }
  0x75   :  { %10148 = vst [vmem:[#allocation6_spill] sm:$0xff] %v5137_v48  ;;  %v5141_v50 = vpop.permute.xlu0 %672  ;;  %v85_v48 = vld [vmem:[%s10095_s0 + $0x2c0] sm:$0xff] }
  0x7a   :  { %766 = vrot.lane.b32.xlu2 %v141_v51, %s4895_s11  ;;  %764 = vrot.lane.b32.xlu1 %v140_v52, %s4895_s11 }
  0x7b   :  { %762 = vrot.lane.b32.xlu0 %v139_v53, %s4895_s11  ;;  %v171_v53 = vld [vmem:[%s10095_s0 + $0x9a] sm:$0xff] }
  0x7c   :  { %v5155_v54 = vpop.permute.xlu2 %700  ;;  %v5157_v55 = vpop.permute.xlu1 %678 }
  0x7d   :  { %10149 = vst [vmem:[#allocation7_spill] sm:$0xff] %v5155_v54  ;;  %v5159_v56 = vpop.permute.xlu0 %674 }
  0x82   :  { %772 = vrot.lane.b32.xlu2 %v144_v57, %s4895_s11  ;;  %770 = vrot.lane.b32.xlu1 %v143_v58, %s4895_s11  ;;  %v170_v57 = vld [vmem:[%s10095_s0 + $0x92] sm:$0xff]  ;;  %v169_v58 = vld [vmem:[%s10095_s0 + $0x82] sm:$0xff] }
  0x83   :  { %768 = vrot.lane.b32.xlu0 %v142_v59, %s4895_s11 }
  0x84   :  { %v5173_v60 = vpop.permute.xlu2 %706  ;;  %v5175_v61 = vpop.permute.xlu1 %686 }
  0x85   :  { %10150 = vst [vmem:[#allocation8_spill] sm:$0xff] %v5173_v60  ;;  %v5177_v62 = vpop.permute.xlu0 %684 }
  0x86   :  { %10151 = vst [vmem:[#allocation9_spill] sm:$0xff] %v5175_v61  ;;  %v4477_v61 = vld [vmem:[%s10095_s0 + $0x13a] sm:$0xff] }
  0x87   :  { %10152 = vst [vmem:[#allocation10_spill] sm:$0xff] %v5177_v62 }
  0x8a   :  { %778 = vrot.lane.b32.xlu2 %v147_v63, %s4895_s11  ;;  %776 = vrot.lane.b32.xlu1 %v146_v0, %s4895_s11 }
  0x8b   :  { %774 = vrot.lane.b32.xlu0 %v145_v1, %s4895_s11  ;;  %v174_v1 = vld [vmem:[%s10095_s0 + $0xc2] sm:$0xff] }
  0x8c   :  { %v5191_v2 = vpop.permute.xlu2 %712  ;;  %v5193_v3 = vpop.permute.xlu1 %692 }
  0x8d   :  { %10153 = vst [vmem:[#allocation11_spill] sm:$0xff] %v5191_v2  ;;  %v5195_v4 = vpop.permute.xlu0 %690  ;;  %v4432_v2 = vld [vmem:[%s10095_s0 + $0x249] sm:$0xff] }
  0x8e   :  { %10154 = vst [vmem:[#allocation12_spill] sm:$0xff] %v5193_v3  ;;  %v4393_v3 = vld [vmem:[%s10095_s0 + $0x49] sm:$0xff] }
  0x8f   :  { %10155 = vst [vmem:[#allocation13_spill] sm:$0xff] %v5195_v4  ;;  %v4438_v4 = vld [vmem:[%s10095_s0 + $0x291] sm:$0xff] }
  0x92   :  { %784 = vrot.lane.b32.xlu2 %v150_v5, %s4895_s11  ;;  %782 = vrot.lane.b32.xlu1 %v149_v6, %s4895_s11  ;;  %v173_v5 = vld [vmem:[%s10095_s0 + $0xb2] sm:$0xff]  ;;  %v172_v6 = vld [vmem:[%s10095_s0 + $0xaa] sm:$0xff] }
  0x93   :  { %780 = vrot.lane.b32.xlu0 %v148_v7, %s4895_s11 }
  0x94   :  { %v5209_v8 = vpop.permute.xlu2 %718  ;;  %v5211_v9 = vpop.permute.xlu1 %698 }
  0x95   :  { %10156 = vst [vmem:[#allocation14_spill] sm:$0xff] %v5209_v8  ;;  %v5213_v10 = vpop.permute.xlu0 %696  ;;  %v53_v8 = vld [vmem:[%s10095_s0 + $0x110] sm:$0xff] }
  0x96   :  { %10157 = vst [vmem:[#allocation15_spill] sm:$0xff] %v5211_v9  ;;  %v43_v9 = vld [vmem:[%s10095_s0 + $0x98] sm:$0xff] }
  0x97   :  { %10158 = vst [vmem:[#allocation16_spill] sm:$0xff] %v5213_v10  ;;  %v65_v10 = vld [vmem:[%s10095_s0 + $0x1d0] sm:$0xff] }
  0x9a   :  { %790 = vrot.lane.b32.xlu2 %v153_v11, %s4895_s11  ;;  %788 = vrot.lane.b32.xlu1 %v152_v12, %s4895_s11 }
  0x9b   :  { %786 = vrot.lane.b32.xlu0 %v151_v13, %s4895_s11  ;;  %v177_v13 = vld [vmem:[%s10095_s0 + $0xe2] sm:$0xff] }
  0x9c   :  { %v5227_v14 = vpop.permute.xlu2 %724  ;;  %v5229_v15 = vpop.permute.xlu1 %704 }
  0x9d   :  { %10159 = vst [vmem:[#allocation17_spill] sm:$0xff] %v5227_v14  ;;  %v5231_v16 = vpop.permute.xlu0 %702  ;;  %v215_v14 = vld [vmem:[%s10095_s0 + $0x2da] sm:$0xff] }
  0x9e   :  { %10160 = vst [vmem:[#allocation18_spill] sm:$0xff] %v5231_v16  ;;  %v219_v16 = vld [vmem:[%s10095_s0 + $0x30a] sm:$0xff] }
  0xa2   :  { %796 = vrot.lane.b32.xlu2 %v156_v17, %s4895_s11  ;;  %794 = vrot.lane.b32.xlu1 %v155_v18, %s4895_s11  ;;  %v176_v17 = vld [vmem:[%s10095_s0 + $0xda] sm:$0xff]  ;;  %v175_v18 = vld [vmem:[%s10095_s0 + $0xca] sm:$0xff] }
  0xa3   :  { %792 = vrot.lane.b32.xlu0 %v154_v19, %s4895_s11 }
  0xa4   :  { %v5245_v20 = vpop.permute.xlu2 %730  ;;  %v5247_v21 = vpop.permute.xlu1 %710 }
  0xa5   :  { %10161 = vst [vmem:[#allocation19_spill] sm:$0xff] %v5245_v20  ;;  %v5249_v22 = vpop.permute.xlu0 %708  ;;  %v206_v20 = vld [vmem:[%s10095_s0 + $0x272] sm:$0xff] }
  0xa6   :  { %10162 = vst [vmem:[#allocation20_spill] sm:$0xff] %v5247_v21  ;;  %v4453_v21 = vld [vmem:[%s10095_s0 + $0x1a] sm:$0xff] }
  0xa7   :  { %10163 = vst [vmem:[#allocation21_spill] sm:$0xff] %v5249_v22  ;;  %v4469_v22 = vld [vmem:[%s10095_s0 + $0xda] sm:$0xff] }
  0xaa   :  { %930 = vrot.lane.b32.xlu2 %v159_v23, %s4896_s12  ;;  %928 = vrot.lane.b32.xlu1 %v158_v24, %s4896_s12 }
  0xab   :  { %798 = vrot.lane.b32.xlu0 %v157_v25, %s4895_s11  ;;  %v180_v25 = vld [vmem:[%s10095_s0 + $0x10a] sm:$0xff] }
  0xac   :  { %v5263_v26 = vpop.permute.xlu2 %736  ;;  %v5265_v27 = vpop.permute.xlu1 %716 }
  0xad   :  { %10164 = vst [vmem:[#allocation22_spill] sm:$0xff] %v5263_v26  ;;  %v5267_v28 = vpop.permute.xlu0 %714  ;;  %v6508_v26 = vld [vmem:[%s10095_s0 + $0xaa] sm:$0xff] }
  0xae   :  { %10165 = vst [vmem:[#allocation23_spill] sm:$0xff] %v5265_v27  ;;  %v79_v27 = vld [vmem:[%s10095_s0 + $0x278] sm:$0xff] }
  0xaf   :  { %10166 = vst [vmem:[#allocation24_spill] sm:$0xff] %v5267_v28  ;;  %v91_v28 = vld [vmem:[%s10095_s0 + $0x308] sm:$0xff] }
  0xb2   :  { %936 = vrot.lane.b32.xlu2 %v162_v29, %s4896_s12  ;;  %934 = vrot.lane.b32.xlu1 %v161_v30, %s4896_s12  ;;  %v179_v29 = vld [vmem:[%s10095_s0 + $0xfa] sm:$0xff]  ;;  %v178_v30 = vld [vmem:[%s10095_s0 + $0xf2] sm:$0xff] }
  0xb3   :  { %932 = vrot.lane.b32.xlu0 %v160_v31, %s4896_s12 }
  0xb4   :  { %v5281_v32 = vpop.permute.xlu2 %742  ;;  %v5283_v33 = vpop.permute.xlu1 %722 }
  0xb5   :  { %10167 = vst [vmem:[#allocation25_spill] sm:$0xff] %v5281_v32  ;;  %v5285_v34 = vpop.permute.xlu0 %720  ;;  %v89_v32 = vld [vmem:[%s10095_s0 + $0x2f0] sm:$0xff] }
  0xb6   :  { %10168 = vst [vmem:[#allocation26_spill] sm:$0xff] %v5283_v33  ;;  %v220_v33 = vld [vmem:[%s10095_s0 + $0x31a] sm:$0xff] }
  0xb7   :  { %10169 = vst [vmem:[#allocation27_spill] sm:$0xff] %v5285_v34  ;;  %v37_v34 = vld [vmem:[%s10095_s0 + $0x50] sm:$0xff] }
  0xba   :  { %942 = vrot.lane.b32.xlu2 %v165_v35, %s4896_s12  ;;  %940 = vrot.lane.b32.xlu1 %v164_v37, %s4896_s12 }
  0xbb   :  { %938 = vrot.lane.b32.xlu0 %v163_v38, %s4896_s12  ;;  %v183_v38 = vld [vmem:[%s10095_s0 + $0x12a] sm:$0xff] }
  0xbc   :  { %v5299_v39 = vpop.permute.xlu2 %748  ;;  %v5301_v41 = vpop.permute.xlu1 %728 }
  0xbd   :  { %10170 = vst [vmem:[#allocation28_spill] sm:$0xff] %v5299_v39  ;;  %v5303_v42 = vpop.permute.xlu0 %726  ;;  %v38_v39 = vld [vmem:[%s10095_s0 + $0x60] sm:$0xff] }
  0xbe   :  { %10171 = vst [vmem:[#allocation29_spill] sm:$0xff] %v5301_v41  ;;  %v209_v41 = vld [vmem:[%s10095_s0 + $0x292] sm:$0xff] }
  0xbf   :  { %10172 = vst [vmem:[#allocation30_spill] sm:$0xff] %v5303_v42  ;;  %v212_v42 = vld [vmem:[%s10095_s0 + $0x2ba] sm:$0xff] }
  0xc2   :  { %948 = vrot.lane.b32.xlu2 %v168_v43, %s4896_s12  ;;  %946 = vrot.lane.b32.xlu1 %v167_v45, %s4896_s12  ;;  %v182_v43 = vld [vmem:[%s10095_s0 + $0x122] sm:$0xff]  ;;  %v181_v45 = vld [vmem:[%s10095_s0 + $0x112] sm:$0xff] }
  0xc3   :  { %944 = vrot.lane.b32.xlu0 %v166_v46, %s4896_s12 }
  0xc4   :  { %v5317_v47 = vpop.permute.xlu2 %754  ;;  %v5319_v51 = vpop.permute.xlu1 %734 }
  0xc5   :  { %10173 = vst [vmem:[#allocation31_spill] sm:$0xff] %v5317_v47  ;;  %v5321_v52 = vpop.permute.xlu0 %732  ;;  %v213_v47 = vld [vmem:[%s10095_s0 + $0x2c2] sm:$0xff] }
  0xc6   :  { %10174 = vst [vmem:[#allocation32_spill] sm:$0xff] %v5319_v51  ;;  %v4480_v51 = vld [vmem:[%s10095_s0 + $0x15a] sm:$0xff] }
  0xca   :  { %954 = vrot.lane.b32.xlu2 %v171_v53, %s4896_s12  ;;  %952 = vrot.lane.b32.xlu1 %v170_v57, %s4896_s12 }
  0xcb   :  { %950 = vrot.lane.b32.xlu0 %v169_v58, %s4896_s12  ;;  %v186_v58 = vld [vmem:[%s10095_s0 + $0x152] sm:$0xff] }
  0xcc   :  { %v5335_v59 = vpop.permute.xlu2 %760  ;;  %v5337_v63 = vpop.permute.xlu1 %740 }
  0xcd   :  { %10175 = vst [vmem:[#allocation33_spill] sm:$0xff] %v5335_v59  ;;  %v5339_v0 = vpop.permute.xlu0 %738  ;;  %v200_v59 = vld [vmem:[%s10095_s0 + $0x22a] sm:$0xff] }
  0xce   :  { %10176 = vst [vmem:[#allocation34_spill] sm:$0xff] %v5337_v63  ;;  %v4406_v63 = vld [vmem:[%s10095_s0 + $0xe1] sm:$0xff] }
  0xcf   :  { %10177 = vst [vmem:[#allocation35_spill] sm:$0xff] %v5339_v0 }
  0xd2   :  { %960 = vrot.lane.b32.xlu2 %v174_v1, %s4896_s12  ;;  %958 = vrot.lane.b32.xlu1 %v173_v5, %s4896_s12  ;;  %v185_v1 = vld [vmem:[%s10095_s0 + $0x142] sm:$0xff]  ;;  %v184_v5 = vld [vmem:[%s10095_s0 + $0x13a] sm:$0xff] }
  0xd3   :  { %956 = vrot.lane.b32.xlu0 %v172_v6, %s4896_s12 }
  0xd4   :  { %v5353_v7 = vpop.permute.xlu2 %766  ;;  %v5355_v11 = vpop.permute.xlu1 %746 }
  0xd5   :  { %10178 = vst [vmem:[#allocation36_spill] sm:$0xff] %v5353_v7  ;;  %v5357_v12 = vpop.permute.xlu0 %744  ;;  %v4390_v7 = vld [vmem:[%s10095_s0 + $0x21] sm:$0xff] }
  0xd6   :  { %10179 = vst [vmem:[#allocation37_spill] sm:$0xff] %v5355_v11  ;;  %v50_v11 = vld [vmem:[%s10095_s0 + $0xf0] sm:$0xff] }
  0xd7   :  { %10180 = vst [vmem:[#allocation38_spill] sm:$0xff] %v5357_v12  ;;  %v73_v12 = vld [vmem:[%s10095_s0 + $0x230] sm:$0xff] }
  0xda   :  { %966 = vrot.lane.b32.xlu2 %v177_v13, %s4896_s12  ;;  %964 = vrot.lane.b32.xlu1 %v176_v17, %s4896_s12 }
  0xdb   :  { %962 = vrot.lane.b32.xlu0 %v175_v18, %s4896_s12  ;;  %v189_v18 = vld [vmem:[%s10095_s0 + $0x172] sm:$0xff] }
  0xdc   :  { %v5371_v19 = vpop.permute.xlu2 %772  ;;  %v5373_v23 = vpop.permute.xlu1 %752 }
  0xdd   :  { %10181 = vst [vmem:[#allocation39_spill] sm:$0xff] %v5371_v19  ;;  %v5375_v24 = vpop.permute.xlu0 %750  ;;  %v41_v19 = vld [vmem:[%s10095_s0 + $0x80] sm:$0xff] }
  0xde   :  { %10182 = vst [vmem:[#allocation40_spill] sm:$0xff] %v5373_v23  ;;  %v216_v23 = vld [vmem:[%s10095_s0 + $0x2ea] sm:$0xff] }
  0xdf   :  { %10183 = vst [vmem:[#allocation41_spill] sm:$0xff] %v5375_v24  ;;  %v218_v24 = vld [vmem:[%s10095_s0 + $0x302] sm:$0xff] }
  0xe2   :  { %972 = vrot.lane.b32.xlu2 %v180_v25, %s4896_s12  ;;  %970 = vrot.lane.b32.xlu1 %v179_v29, %s4896_s12  ;;  %v188_v25 = vld [vmem:[%s10095_s0 + $0x16a] sm:$0xff]  ;;  %v187_v29 = vld [vmem:[%s10095_s0 + $0x15a] sm:$0xff] }
  0xe3   :  { %968 = vrot.lane.b32.xlu0 %v178_v30, %s4896_s12 }
  0xe4   :  { %v5389_v31 = vpop.permute.xlu2 %778  ;;  %v5391_v35 = vpop.permute.xlu1 %758 }
  0xe5   :  { %10184 = vst [vmem:[#allocation42_spill] sm:$0xff] %v5389_v31  ;;  %v5393_v37 = vpop.permute.xlu0 %756 }
  0xe6   :  { %10185 = vst [vmem:[#allocation43_spill] sm:$0xff] %v5391_v35  ;;  %v207_v35 = vld [vmem:[%s10095_s0 + $0x27a] sm:$0xff] }
  0xe7   :  { %10186 = vst [vmem:[#allocation44_spill] sm:$0xff] %v5393_v37  ;;  %v210_v37 = vld [vmem:[%s10095_s0 + $0x2a2] sm:$0xff] }
  0xea   :  { %978 = vrot.lane.b32.xlu2 %v183_v38, %s4896_s12  ;;  %976 = vrot.lane.b32.xlu1 %v182_v43, %s4896_s12 }
  0xeb   :  { %974 = vrot.lane.b32.xlu0 %v181_v45, %s4896_s12  ;;  %v192_v45 = vld [vmem:[%s10095_s0 + $0x1ca] sm:$0xff] }
  0xec   :  { %v5407_v46 = vpop.permute.xlu2 %784  ;;  %v5409_v53 = vpop.permute.xlu1 %764 }
  0xed   :  { %10187 = vst [vmem:[#allocation45_spill] sm:$0xff] %v5407_v46  ;;  %v5411_v57 = vpop.permute.xlu0 %762  ;;  %v203_v46 = vld [vmem:[%s10095_s0 + $0x24a] sm:$0xff] }
  0xee   :  { %10188 = vst [vmem:[#allocation46_spill] sm:$0xff] %v5409_v53  ;;  %v198_v53 = vld [vmem:[%s10095_s0 + $0x212] sm:$0xff] }
  0xef   :  { %10189 = vst [vmem:[#allocation47_spill] sm:$0xff] %v5411_v57  ;;  %v197_v57 = vld [vmem:[%s10095_s0 + $0x202] sm:$0xff] }
  0xf2   :  { %984 = vrot.lane.b32.xlu2 %v186_v58, %s4896_s12  ;;  %982 = vrot.lane.b32.xlu1 %v185_v1, %s4896_s12  ;;  %v191_v58 = vld [vmem:[%s10095_s0 + $0x1ba] sm:$0xff]  ;;  %v190_v1 = vld [vmem:[%s10095_s0 + $0x1b2] sm:$0xff] }
  0xf3   :  { %980 = vrot.lane.b32.xlu0 %v184_v5, %s4896_s12 }
  0xf4   :  { %v5425_v6 = vpop.permute.xlu2 %790  ;;  %v5427_v13 = vpop.permute.xlu1 %770 }
  0xf5   :  { %10190 = vst [vmem:[#allocation48_spill] sm:$0xff] %v5425_v6  ;;  %v5429_v17 = vpop.permute.xlu0 %768 }
  0xf6   :  { %10191 = vst [vmem:[#allocation49_spill] sm:$0xff] %v5427_v13  ;;  %v52_v13 = vld [vmem:[%s10095_s0 + $0x108] sm:$0xff] }
  0xf7   :  { %10192 = vst [vmem:[#allocation50_spill] sm:$0xff] %v5429_v17  ;;  %v82_v17 = vld [vmem:[%s10095_s0 + $0x2a0] sm:$0xff] }
  0xfa   :  { %990 = vrot.lane.b32.xlu2 %v189_v18, %s4896_s12  ;;  %988 = vrot.lane.b32.xlu1 %v188_v25, %s4896_s12 }
  0xfb   :  { %986 = vrot.lane.b32.xlu0 %v187_v29, %s4896_s12  ;;  %v195_v29 = vld [vmem:[%s10095_s0 + $0x1ea] sm:$0xff] }
  0xfc   :  { %v5443_v30 = vpop.permute.xlu2 %796  ;;  %v5445_v38 = vpop.permute.xlu1 %776 }
  0xfd   :  { %10193 = vst [vmem:[#allocation51_spill] sm:$0xff] %v5443_v30  ;;  %v5447_v43 = vpop.permute.xlu0 %774  ;;  %v194_v30 = vld [vmem:[%s10095_s0 + $0x1e2] sm:$0xff] }
  0xfe   :  { %10194 = vst [vmem:[#allocation52_spill] sm:$0xff] %v5445_v38 }
  0xff   :  { %10195 = vst [vmem:[#allocation53_spill] sm:$0xff] %v5447_v43  ;;  %v34_v43 = vld [vmem:[%s10095_s0 + $0x30] sm:$0xff] }
 0x102   :  { %996 = vrot.lane.b32.xlu2 %v192_v45, %s4896_s12  ;;  %994 = vrot.lane.b32.xlu1 %v191_v58, %s4896_s12  ;;  %v193_v45 = vld [vmem:[%s10095_s0 + $0x1d2] sm:$0xff] }
 0x103   :  { %992 = vrot.lane.b32.xlu0 %v190_v1, %s4896_s12 }
 0x104   :  { %v5461_v5 = vpop.permute.xlu2 %930  ;;  %v5463_v18 = vpop.permute.xlu1 %782 }
 0x105   :  { %10196 = vst [vmem:[#allocation54_spill] sm:$0xff] %v5463_v18  ;;  %v5465_v25 = vpop.permute.xlu0 %780 }
 0x106   :  { %10197 = vst [vmem:[#allocation55_spill] sm:$0xff] %v5465_v25 }
 0x10a   :  { %1002 = vrot.lane.b32.xlu2 %v195_v29, %s4896_s12  ;;  %1000 = vrot.lane.b32.xlu1 %v194_v30, %s4896_s12  ;;  %v196_v30 = vld [vmem:[%s10095_s0 + $0x1fa] sm:$0xff] }
 0x10b   :  { %998 = vrot.lane.b32.xlu0 %v193_v45, %s4896_s12 }
 0x10c   :  { %v5479_v58 = vpop.permute.xlu2 %936  ;;  %v5481_v1 = vpop.permute.xlu1 %788 }
 0x10d   :  { %10198 = vst [vmem:[#allocation56_spill] sm:$0xff] %v5481_v1  ;;  %v5483_v6 = vpop.permute.xlu0 %786 }
 0x10e   :  { %10199 = vst [vmem:[#allocation57_spill] sm:$0xff] %v5483_v6  ;;  %v201_v6 = vld [vmem:[%s10095_s0 + $0x232] sm:$0xff] }
 0x112   :  { %1008 = vrot.lane.b32.xlu2 %v198_v53, %s4896_s12  ;;  %1006 = vrot.lane.b32.xlu1 %v197_v57, %s4896_s12  ;;  %v199_v53 = vld [vmem:[%s10095_s0 + $0x21a] sm:$0xff] }
 0x113   :  { %1004 = vrot.lane.b32.xlu0 %v196_v30, %s4896_s12 }
 0x114   :  { %v5497_v29 = vpop.permute.xlu2 %942  ;;  %v5499_v45 = vpop.permute.xlu1 %794 }
 0x115   :  { %10200 = vst [vmem:[#allocation58_spill] sm:$0xff] %v5497_v29  ;;  %v5501_v1 = vpop.permute.xlu0 %792  ;;  %v6552_v29 = vld [vmem:[%s10095_s0 + $0xf2] sm:$0xff] }
 0x116   :  { %10201 = vst [vmem:[#allocation59_spill] sm:$0xff] %v5499_v45 }
 0x117   :  { %10202 = vst [vmem:[#allocation60_spill] sm:$0xff] %v5501_v1  ;;  %v204_v1 = vld [vmem:[%s10095_s0 + $0x25a] sm:$0xff] }
 0x11a   :  { %1014 = vrot.lane.b32.xlu2 %v201_v6, %s4896_s12  ;;  %1012 = vrot.lane.b32.xlu1 %v200_v59, %s4896_s12  ;;  %v202_v59 = vld [vmem:[%s10095_s0 + $0x242] sm:$0xff] }
 0x11b   :  { %1010 = vrot.lane.b32.xlu0 %v199_v53, %s4896_s12 }
 0x11c   :  { %v5515_v57 = vpop.permute.xlu2 %948  ;;  %v5517_v30 = vpop.permute.xlu1 %928 }
 0x11d   :  { %10203 = vst [vmem:[#allocation61_spill] sm:$0xff] %v5515_v57  ;;  %v5519_v45 = vpop.permute.xlu0 %798  ;;  %v4394_v57 = vld [vmem:[%s10095_s0 + $0x51] sm:$0xff] }
 0x11e   :  { %10204 = vst [vmem:[#allocation62_spill] sm:$0xff] %v5519_v45 }
 0x122   :  { %1020 = vrot.lane.b32.xlu2 %v204_v1, %s4896_s12  ;;  %1018 = vrot.lane.b32.xlu1 %v203_v46, %s4896_s12  ;;  %v205_v46 = vld [vmem:[%s10095_s0 + $0x262] sm:$0xff] }
 0x123   :  { %1016 = vrot.lane.b32.xlu0 %v202_v59, %s4896_s12 }
 0x124   :  { %v5533_v6 = vpop.permute.xlu2 %954  ;;  %v5535_v53 = vpop.permute.xlu1 %934 }
 0x125   :  { %10205 = vst [vmem:[#allocation63_spill] sm:$0xff] %v5533_v6  ;;  %v5537_v45 = vpop.permute.xlu0 %932  ;;  %v40_v6 = vld [vmem:[%s10095_s0 + $0x78] sm:$0xff] }
 0x12a   :  { %1026 = vrot.lane.b32.xlu2 %v207_v35, %s4896_s12  ;;  %1024 = vrot.lane.b32.xlu1 %v206_v20, %s4896_s12  ;;  %v208_v20 = vld [vmem:[%s10095_s0 + $0x28a] sm:$0xff] }
 0x12b   :  { %1022 = vrot.lane.b32.xlu0 %v205_v46, %s4896_s12 }
 0x12c   :  { %v5551_v1 = vpop.permute.xlu2 %960  ;;  %v5553_v59 = vpop.permute.xlu1 %940 }
 0x12d   :  { %10206 = vst [vmem:[#allocation64_spill] sm:$0xff] %v5553_v59  ;;  %v5555_v18 = vpop.permute.xlu0 %938  ;;  %v4505_v59 = vld [vmem:[%s10095_s0 + $0x2ba] sm:$0xff] }
 0x132   :  { %1032 = vrot.lane.b32.xlu2 %v210_v37, %s4896_s12  ;;  %1030 = vrot.lane.b32.xlu1 %v209_v41, %s4896_s12  ;;  %v211_v41 = vld [vmem:[%s10095_s0 + $0x2aa] sm:$0xff] }
 0x133   :  { %1028 = vrot.lane.b32.xlu0 %v208_v20, %s4896_s12 }
 0x134   :  { %v5569_v35 = vpop.permute.xlu2 %966  ;;  %v5571_v46 = vpop.permute.xlu1 %946 }
 0x135   :  { %10207 = vst [vmem:[#allocation65_spill] sm:$0xff] %v5569_v35  ;;  %v5573_v25 = vpop.permute.xlu0 %944  ;;  %v4444_v35 = vld [vmem:[%s10095_s0 + $0x2d9] sm:$0xff] }
 0x136   :  { %10208 = vst [vmem:[#allocation66_spill] sm:$0xff] %v5571_v46  ;;  %v4439_v46 = vld [vmem:[%s10095_s0 + $0x2a1] sm:$0xff] }
 0x137   :  { %10209 = vst [vmem:[#allocation67_spill] sm:$0xff] %v5573_v25  ;;  %v6461_v25 = vld [vmem:[%s10095_s0 + $0x52] sm:$0xff] }
 0x13a   :  { %1038 = vrot.lane.b32.xlu2 %v213_v47, %s4896_s12  ;;  %1036 = vrot.lane.b32.xlu1 %v212_v42, %s4896_s12  ;;  %v214_v42 = vld [vmem:[%s10095_s0 + $0x2d2] sm:$0xff] }
 0x13b   :  { %1034 = vrot.lane.b32.xlu0 %v211_v41, %s4896_s12 }
 0x13c   :  { %v5587_v37 = vpop.permute.xlu2 %972  ;;  %v5589_v20 = vpop.permute.xlu1 %952 }
 0x13d   :  { %10210 = vst [vmem:[#allocation68_spill] sm:$0xff] %v5587_v37  ;;  %v5591_v31 = vpop.permute.xlu0 %950  ;;  %v76_v37 = vld [vmem:[%s10095_s0 + $0x258] sm:$0xff] }
 0x13e   :  { %10211 = vst [vmem:[#allocation69_spill] sm:$0xff] %v5589_v20  ;;  %v4356_v20 = vld [vmem:[%s10095_s0 + $0x188] sm:$0xff] }
 0x13f   :  { %10212 = vst [vmem:[#allocation70_spill] sm:$0xff] %v5591_v31  ;;  %v86_v31 = vld [vmem:[%s10095_s0 + $0x2d0] sm:$0xff] }
 0x142   :  { %1044 = vrot.lane.b32.xlu2 %v216_v23, %s4896_s12  ;;  %1042 = vrot.lane.b32.xlu1 %v215_v14, %s4896_s12  ;;  %v217_v14 = vld [vmem:[%s10095_s0 + $0x2f2] sm:$0xff] }
 0x143   :  { %1040 = vrot.lane.b32.xlu0 %v214_v42, %s4896_s12 }
 0x144   :  { %v5605_v47 = vpop.permute.xlu2 %978  ;;  %v5607_v41 = vpop.permute.xlu1 %958 }
 0x145   :  { %10213 = vst [vmem:[#allocation71_spill] sm:$0xff] %v5605_v47  ;;  %v5609_v38 = vpop.permute.xlu0 %956  ;;  %v221_v47 = vld [vmem:[%s10095_s0 + $0x322] sm:$0xff] }
 0x146   :  { %10214 = vst [vmem:[#allocation72_spill] sm:$0xff] %v5607_v41 }
 0x147   :  { %10215 = vst [vmem:[#allocation73_spill] sm:$0xff] %v5609_v38  ;;  %v35_v38 = vld [vmem:[%s10095_s0 + $0x38] sm:$0xff] }
 0x14a   :  { %1050 = vrot.lane.b32.xlu2 %v219_v16, %s4896_s12  ;;  %1048 = vrot.lane.b32.xlu1 %v218_v24, %s4896_s12  ;;  %v32_v16 = vld [vmem:[%s10095_s0 + $0x18] sm:$0xff] }
 0x14b   :  { %1046 = vrot.lane.b32.xlu0 %v217_v14, %s4896_s12 }
 0x14c   :  { %v5623_v23 = vpop.permute.xlu2 %984  ;;  %v5625_v42 = vpop.permute.xlu1 %964 }
 0x14d   :  { %10216 = vst [vmem:[#allocation74_spill] sm:$0xff] %v5623_v23  ;;  %v5627_v41 = vpop.permute.xlu0 %962 }
 0x14e   :  { %10217 = vst [vmem:[#allocation75_spill] sm:$0xff] %v5625_v42 }
 0x14f   :  { %10218 = vst [vmem:[#allocation76_spill] sm:$0xff] %v5627_v41  ;;  %v6709_v41 = vld [vmem:[%s10095_s0 + $0x212] sm:$0xff] }
 0x150   :  { %10373 = vst [vmem:[#allocation231_spill] sm:$0xff] %v6709_v41 }
 0x152   :  { %1184 = vrot.lane.b32.xlu2 %v32_v16, %s4897_s13  ;;  %1054 = vrot.lane.b32.xlu1 %v221_v47, %s4896_s12  ;;  %v33_v47 = vld [vmem:[%s10095_s0 + $0x20] sm:$0xff] }
 0x153   :  { %1052 = vrot.lane.b32.xlu0 %v220_v33, %s4896_s12 }
 0x154   :  { %v5641_v24 = vpop.permute.xlu2 %990  ;;  %v5643_v14 = vpop.permute.xlu1 %970 }
 0x155   :  { %10219 = vst [vmem:[#allocation77_spill] sm:$0xff] %v5641_v24  ;;  %v5645_v23 = vpop.permute.xlu0 %968  ;;  %v4481_v24 = vld [vmem:[%s10095_s0 + $0x16a] sm:$0xff] }
 0x156   :  { %10220 = vst [vmem:[#allocation78_spill] sm:$0xff] %v5643_v14  ;;  %v88_v14 = vld [vmem:[%s10095_s0 + $0x2e8] sm:$0xff] }
 0x157   :  { %10221 = vst [vmem:[#allocation79_spill] sm:$0xff] %v5645_v23  ;;  %v4429_v23 = vld [vmem:[%s10095_s0 + $0x229] sm:$0xff] }
 0x15a   :  { %1190 = vrot.lane.b32.xlu2 %v35_v38, %s4897_s13  ;;  %1188 = vrot.lane.b32.xlu1 %v34_v43, %s4897_s13  ;;  %v36_v38 = vld [vmem:[%s10095_s0 + $0x48] sm:$0xff] }
 0x15b   :  { %1186 = vrot.lane.b32.xlu0 %v33_v47, %s4897_s13 }
 0x15c   :  { %v5659_v33 = vpop.permute.xlu2 %996  ;;  %v5661_v16 = vpop.permute.xlu1 %976 }
 0x15d   :  { %10222 = vst [vmem:[#allocation80_spill] sm:$0xff] %v5659_v33  ;;  %v5663_v54 = vpop.permute.xlu0 %974  ;;  %v4396_v33 = vld [vmem:[%s10095_s0 + $0x69] sm:$0xff] }
 0x15e   :  { %10223 = vst [vmem:[#allocation81_spill] sm:$0xff] %v5661_v16 }
 0x15f   :  { %10224 = vst [vmem:[#allocation82_spill] sm:$0xff] %v5663_v54  ;;  %v49_v54 = vld [vmem:[%s10095_s0 + $0xe0] sm:$0xff] }
 0x162   :  { %1196 = vrot.lane.b32.xlu2 %v38_v39, %s4897_s13  ;;  %1194 = vrot.lane.b32.xlu1 %v37_v34, %s4897_s13  ;;  %v39_v34 = vld [vmem:[%s10095_s0 + $0x68] sm:$0xff] }
 0x163   :  { %1192 = vrot.lane.b32.xlu0 %v36_v38, %s4897_s13 }
 0x164   :  { %v5677_v43 = vpop.permute.xlu2 %1002  ;;  %v5679_v47 = vpop.permute.xlu1 %982 }
 0x165   :  { %10225 = vst [vmem:[#allocation83_spill] sm:$0xff] %v5677_v43  ;;  %v5681_v16 = vpop.permute.xlu0 %980  ;;  %v46_v43 = vld [vmem:[%s10095_s0 + $0xc0] sm:$0xff] }
 0x166   :  { %10226 = vst [vmem:[#allocation84_spill] sm:$0xff] %v5679_v47 }
 0x167   :  { %10227 = vst [vmem:[#allocation85_spill] sm:$0xff] %v5681_v16  ;;  %v44_v16 = vld [vmem:[%s10095_s0 + $0xa8] sm:$0xff] }
 0x16a   :  { %1202 = vrot.lane.b32.xlu2 %v41_v19, %s4897_s13  ;;  %1200 = vrot.lane.b32.xlu1 %v40_v6, %s4897_s13  ;;  %v42_v19 = vld [vmem:[%s10095_s0 + $0x90] sm:$0xff] }
 0x16b   :  { %1198 = vrot.lane.b32.xlu0 %v39_v34, %s4897_s13 }
 0x16c   :  { %v5695_v39 = vpop.permute.xlu2 %1008  ;;  %v5697_v38 = vpop.permute.xlu1 %988 }
 0x16d   :  { %10228 = vst [vmem:[#allocation86_spill] sm:$0xff] %v5695_v39  ;;  %v5699_v47 = vpop.permute.xlu0 %986  ;;  %v47_v39 = vld [vmem:[%s10095_s0 + $0xc8] sm:$0xff] }
 0x16e   :  { %10229 = vst [vmem:[#allocation87_spill] sm:$0xff] %v5697_v38  ;;  %v4510_v38 = vld [vmem:[%s10095_s0 + $0x2f2] sm:$0xff] }
 0x16f   :  { %10230 = vst [vmem:[#allocation88_spill] sm:$0xff] %v5699_v47 }
 0x172   :  { %1208 = vrot.lane.b32.xlu2 %v44_v16, %s4897_s13  ;;  %1206 = vrot.lane.b32.xlu1 %v43_v9, %s4897_s13  ;;  %v45_v9 = vld [vmem:[%s10095_s0 + $0xb0] sm:$0xff] }
 0x173   :  { %1204 = vrot.lane.b32.xlu0 %v42_v19, %s4897_s13 }
 0x174   :  { %v5713_v6 = vpop.permute.xlu2 %1014  ;;  %v5715_v34 = vpop.permute.xlu1 %994 }
 0x175   :  { %10231 = vst [vmem:[#allocation89_spill] sm:$0xff] %v5713_v6  ;;  %v5717_v47 = vpop.permute.xlu0 %992 }
 0x176   :  { %10232 = vst [vmem:[#allocation90_spill] sm:$0xff] %v5715_v34  ;;  %v4441_v34 = vld [vmem:[%s10095_s0 + $0x2b9] sm:$0xff] }
 0x177   :  { %10233 = vst [vmem:[#allocation91_spill] sm:$0xff] %v5717_v47  ;;  %v4466_v47 = vld [vmem:[%s10095_s0 + $0xb2] sm:$0xff] }
 0x17a   :  { %1214 = vrot.lane.b32.xlu2 %v47_v39, %s4897_s13  ;;  %1212 = vrot.lane.b32.xlu1 %v46_v43, %s4897_s13  ;;  %v48_v43 = vld [vmem:[%s10095_s0 + $0xd8] sm:$0xff] }
 0x17b   :  { %1210 = vrot.lane.b32.xlu0 %v45_v9, %s4897_s13 }
 0x17c   :  { %v5731_v16 = vpop.permute.xlu2 %1020  ;;  %v5733_v19 = vpop.permute.xlu1 %1000 }
 0x17d   :  { %10234 = vst [vmem:[#allocation92_spill] sm:$0xff] %v5731_v16  ;;  %v5735_v6 = vpop.permute.xlu0 %998 }
 0x17e   :  { %10235 = vst [vmem:[#allocation93_spill] sm:$0xff] %v5733_v19  ;;  %v70_v19 = vld [vmem:[%s10095_s0 + $0x210] sm:$0xff] }
 0x17f   :  { %10236 = vst [vmem:[#allocation94_spill] sm:$0xff] %v5735_v6 }
 0x182   :  { %1220 = vrot.lane.b32.xlu2 %v50_v11, %s4897_s13  ;;  %1218 = vrot.lane.b32.xlu1 %v49_v54, %s4897_s13  ;;  %v51_v54 = vld [vmem:[%s10095_s0 + $0xf8] sm:$0xff] }
 0x183   :  { %1216 = vrot.lane.b32.xlu0 %v48_v43, %s4897_s13 }
 0x184   :  { %v5749_v39 = vpop.permute.xlu2 %1026  ;;  %v5751_v9 = vpop.permute.xlu1 %1006 }
 0x185   :  { %10237 = vst [vmem:[#allocation95_spill] sm:$0xff] %v5749_v39  ;;  %v5753_v16 = vpop.permute.xlu0 %1004  ;;  %v55_v39 = vld [vmem:[%s10095_s0 + $0x128] sm:$0xff] }
 0x186   :  { %10238 = vst [vmem:[#allocation96_spill] sm:$0xff] %v5751_v9 }
 0x187   :  { %10239 = vst [vmem:[#allocation97_spill] sm:$0xff] %v5753_v16  ;;  %v56_v16 = vld [vmem:[%s10095_s0 + $0x138] sm:$0xff] }
 0x18a   :  { %1226 = vrot.lane.b32.xlu2 %v53_v8, %s4897_s13  ;;  %1224 = vrot.lane.b32.xlu1 %v52_v13, %s4897_s13  ;;  %v54_v8 = vld [vmem:[%s10095_s0 + $0x120] sm:$0xff] }
 0x18b   :  { %1222 = vrot.lane.b32.xlu0 %v51_v54, %s4897_s13 }
 0x18c   :  { %v5767_v11 = vpop.permute.xlu2 %1032  ;;  %v5769_v43 = vpop.permute.xlu1 %1012 }
 0x18d   :  { %10240 = vst [vmem:[#allocation98_spill] sm:$0xff] %v5767_v11  ;;  %v5771_v9 = vpop.permute.xlu0 %1010  ;;  %v58_v11 = vld [vmem:[%s10095_s0 + $0x150] sm:$0xff] }
 0x18e   :  { %10241 = vst [vmem:[#allocation99_spill] sm:$0xff] %v5769_v43 }
 0x18f   :  { %10242 = vst [vmem:[#allocation100_spill] sm:$0xff] %v5771_v9  ;;  %v59_v9 = vld [vmem:[%s10095_s0 + $0x158] sm:$0xff] }
 0x192   :  { %1232 = vrot.lane.b32.xlu2 %v56_v16, %s4897_s13  ;;  %1230 = vrot.lane.b32.xlu1 %v55_v39, %s4897_s13  ;;  %v57_v16 = vld [vmem:[%s10095_s0 + $0x140] sm:$0xff] }
 0x193   :  { %1228 = vrot.lane.b32.xlu0 %v54_v8, %s4897_s13 }
 0x194   :  { %v5785_v13 = vpop.permute.xlu2 %1038  ;;  %v5787_v54 = vpop.permute.xlu1 %1018 }
 0x195   :  { %10243 = vst [vmem:[#allocation101_spill] sm:$0xff] %v5785_v13  ;;  %v5789_v43 = vpop.permute.xlu0 %1016  ;;  %v61_v13 = vld [vmem:[%s10095_s0 + $0x170] sm:$0xff] }
 0x196   :  { %10244 = vst [vmem:[#allocation102_spill] sm:$0xff] %v5787_v54 }
 0x197   :  { %10245 = vst [vmem:[#allocation103_spill] sm:$0xff] %v5789_v43  ;;  %v4355_v43 = vld [vmem:[%s10095_s0 + $0x180] sm:$0xff] }
 0x19a   :  { %1238 = vrot.lane.b32.xlu2 %v59_v9, %s4897_s13  ;;  %1236 = vrot.lane.b32.xlu1 %v58_v11, %s4897_s13  ;;  %v60_v9 = vld [vmem:[%s10095_s0 + $0x168] sm:$0xff] }
 0x19b   :  { %1234 = vrot.lane.b32.xlu0 %v57_v16, %s4897_s13 }
 0x19c   :  { %v5803_v39 = vpop.permute.xlu2 %1044  ;;  %v5805_v8 = vpop.permute.xlu1 %1024 }
 0x19d   :  { %10246 = vst [vmem:[#allocation104_spill] sm:$0xff] %v5803_v39  ;;  %v5807_v54 = vpop.permute.xlu0 %1022 }
 0x19e   :  { %10247 = vst [vmem:[#allocation105_spill] sm:$0xff] %v5805_v8  ;;  %v83_v8 = vld [vmem:[%s10095_s0 + $0x2a8] sm:$0xff] }
 0x19f   :  { %10248 = vst [vmem:[#allocation106_spill] sm:$0xff] %v5807_v54  ;;  %v4391_v54 = vld [vmem:[%s10095_s0 + $0x31] sm:$0xff] }
 0x1a2   :  { %1244 = vrot.lane.b32.xlu2 %v4355_v43, %s4897_s13  ;;  %1242 = vrot.lane.b32.xlu1 %v61_v13, %s4897_s13  ;;  %v64_v43 = vld [vmem:[%s10095_s0 + $0x1c8] sm:$0xff] }
 0x1a3   :  { %1240 = vrot.lane.b32.xlu0 %v60_v9, %s4897_s13 }
 0x1a4   :  { %v5821_v11 = vpop.permute.xlu2 %1050  ;;  %v5823_v16 = vpop.permute.xlu1 %1030 }
 0x1a5   :  { %10249 = vst [vmem:[#allocation107_spill] sm:$0xff] %v5821_v11  ;;  %v5825_v39 = vpop.permute.xlu0 %1028 }
 0x1a6   :  { %10250 = vst [vmem:[#allocation108_spill] sm:$0xff] %v5823_v16  ;;  %v68_v16 = vld [vmem:[%s10095_s0 + $0x1f8] sm:$0xff] }
 0x1a7   :  { %10251 = vst [vmem:[#allocation109_spill] sm:$0xff] %v5825_v39  ;;  %v67_v39 = vld [vmem:[%s10095_s0 + $0x1e8] sm:$0xff] }
 0x1aa   :  { %1250 = vrot.lane.b32.xlu2 %v65_v10, %s4897_s13  ;;  %1248 = vrot.lane.b32.xlu1 %v64_v43, %s4897_s13  ;;  %v66_v10 = vld [vmem:[%s10095_s0 + $0x1e0] sm:$0xff] }
 0x1ab   :  { %1246 = vrot.lane.b32.xlu0 %v4356_v20, %s4897_s13 }
 0x1ac   :  { %v5839_v13 = vpop.permute.xlu2 %1184  ;;  %v5841_v9 = vpop.permute.xlu1 %1036 }
 0x1ad   :  { %10252 = vst [vmem:[#allocation110_spill] sm:$0xff] %v5841_v9  ;;  %v5843_v11 = vpop.permute.xlu0 %1034 }
 0x1ae   :  { %10253 = vst [vmem:[#allocation111_spill] sm:$0xff] %v5843_v11  ;;  %v71_v11 = vld [vmem:[%s10095_s0 + $0x218] sm:$0xff] }
 0x1b2   :  { %1256 = vrot.lane.b32.xlu2 %v68_v16, %s4897_s13  ;;  %1254 = vrot.lane.b32.xlu1 %v67_v39, %s4897_s13  ;;  %v69_v39 = vld [vmem:[%s10095_s0 + $0x200] sm:$0xff] }
 0x1b3   :  { %1252 = vrot.lane.b32.xlu0 %v66_v10, %s4897_s13 }
 0x1b4   :  { %v5857_v20 = vpop.permute.xlu2 %1190  ;;  %v5859_v43 = vpop.permute.xlu1 %1042 }
 0x1b5   :  { %10254 = vst [vmem:[#allocation112_spill] sm:$0xff] %v5859_v43  ;;  %v5861_v9 = vpop.permute.xlu0 %1040 }
 0x1b6   :  { %10255 = vst [vmem:[#allocation113_spill] sm:$0xff] %v5861_v9  ;;  %v74_v9 = vld [vmem:[%s10095_s0 + $0x240] sm:$0xff] }
 0x1ba   :  { %1262 = vrot.lane.b32.xlu2 %v71_v11, %s4897_s13  ;;  %1260 = vrot.lane.b32.xlu1 %v70_v19, %s4897_s13  ;;  %v72_v19 = vld [vmem:[%s10095_s0 + $0x228] sm:$0xff] }
 0x1bb   :  { %1258 = vrot.lane.b32.xlu0 %v69_v39, %s4897_s13 }
 0x1bc   :  { %v5875_v16 = vpop.permute.xlu2 %1196  ;;  %v5877_v10 = vpop.permute.xlu1 %1048 }
 0x1bd   :  { %10256 = vst [vmem:[#allocation114_spill] sm:$0xff] %v5875_v16  ;;  %v5879_v43 = vpop.permute.xlu0 %1046  ;;  %v4501_v16 = vld [vmem:[%s10095_s0 + $0x28a] sm:$0xff] }
 0x1be   :  { %10257 = vst [vmem:[#allocation115_spill] sm:$0xff] %v5877_v10 }
 0x1bf   :  { %10258 = vst [vmem:[#allocation116_spill] sm:$0xff] %v5879_v43  ;;  %v77_v43 = vld [vmem:[%s10095_s0 + $0x260] sm:$0xff] }
 0x1c2   :  { %1268 = vrot.lane.b32.xlu2 %v74_v9, %s4897_s13  ;;  %1266 = vrot.lane.b32.xlu1 %v73_v12, %s4897_s13  ;;  %v75_v12 = vld [vmem:[%s10095_s0 + $0x248] sm:$0xff] }
 0x1c3   :  { %1264 = vrot.lane.b32.xlu0 %v72_v19, %s4897_s13 }
 0x1c4   :  { %v5893_v11 = vpop.permute.xlu2 %1202  ;;  %v5895_v39 = vpop.permute.xlu1 %1054 }
 0x1c5   :  { %10259 = vst [vmem:[#allocation117_spill] sm:$0xff] %v5893_v11  ;;  %v5897_v10 = vpop.permute.xlu0 %1052  ;;  %v4435_v11 = vld [vmem:[%s10095_s0 + $0x271] sm:$0xff] }
 0x1c6   :  { %10260 = vst [vmem:[#allocation118_spill] sm:$0xff] %v5895_v39 }
 0x1c7   :  { %10261 = vst [vmem:[#allocation119_spill] sm:$0xff] %v5897_v10  ;;  %v80_v10 = vld [vmem:[%s10095_s0 + $0x288] sm:$0xff] }
 0x1ca   :  { %1274 = vrot.lane.b32.xlu2 %v77_v43, %s4897_s13  ;;  %1272 = vrot.lane.b32.xlu1 %v76_v37, %s4897_s13  ;;  %v78_v37 = vld [vmem:[%s10095_s0 + $0x270] sm:$0xff] }
 0x1cb   :  { %1270 = vrot.lane.b32.xlu0 %v75_v12, %s4897_s13 }
 0x1cc   :  { %v5911_v9 = vpop.permute.xlu2 %1208  ;;  %v5913_v19 = vpop.permute.xlu1 %1188 }
 0x1cd   :  { %10262 = vst [vmem:[#allocation120_spill] sm:$0xff] %v5911_v9  ;;  %v5915_v39 = vpop.permute.xlu0 %1186 }
 0x1d2   :  { %1280 = vrot.lane.b32.xlu2 %v80_v10, %s4897_s13  ;;  %1278 = vrot.lane.b32.xlu1 %v79_v27, %s4897_s13  ;;  %v81_v27 = vld [vmem:[%s10095_s0 + $0x290] sm:$0xff] }
 0x1d3   :  { %1276 = vrot.lane.b32.xlu0 %v78_v37, %s4897_s13 }
 0x1d4   :  { %v5929_v43 = vpop.permute.xlu2 %1214  ;;  %v5931_v12 = vpop.permute.xlu1 %1194 }
 0x1d5   :  { %10263 = vst [vmem:[#allocation121_spill] sm:$0xff] %v5929_v43  ;;  %v5933_v9 = vpop.permute.xlu0 %1192 }
 0x1da   :  { %1286 = vrot.lane.b32.xlu2 %v83_v8, %s4897_s13  ;;  %1284 = vrot.lane.b32.xlu1 %v82_v17, %s4897_s13  ;;  %v84_v17 = vld [vmem:[%s10095_s0 + $0x2b8] sm:$0xff] }
 0x1db   :  { %1282 = vrot.lane.b32.xlu0 %v81_v27, %s4897_s13 }
 0x1dc   :  { %v5947_v10 = vpop.permute.xlu2 %1220  ;;  %v5949_v37 = vpop.permute.xlu1 %1200 }
 0x1dd   :  { %10264 = vst [vmem:[#allocation122_spill] sm:$0xff] %v5947_v10  ;;  %v5951_v43 = vpop.permute.xlu0 %1198 }
 0x1de   :  { %10265 = vst [vmem:[#allocation123_spill] sm:$0xff] %v5949_v37  ;;  %v6456_v37 = vld [vmem:[%s10095_s0 + $0x62] sm:$0xff] }
 0x1df   :  { %10266 = vst [vmem:[#allocation124_spill] sm:$0xff] %v5951_v43  ;;  %v6547_v43 = vld [vmem:[%s10095_s0 + $0xfa] sm:$0xff] }
 0x1e2   :  { %1292 = vrot.lane.b32.xlu2 %v86_v31, %s4897_s13  ;;  %1290 = vrot.lane.b32.xlu1 %v85_v48, %s4897_s13  ;;  %v87_v48 = vld [vmem:[%s10095_s0 + $0x2d8] sm:$0xff] }
 0x1e3   :  { %1288 = vrot.lane.b32.xlu0 %v84_v17, %s4897_s13 }
 0x1e4   :  { %v5965_v8 = vpop.permute.xlu2 %1226  ;;  %v5967_v27 = vpop.permute.xlu1 %1206 }
 0x1e5   :  { %10267 = vst [vmem:[#allocation125_spill] sm:$0xff] %v5965_v8  ;;  %v5969_v6 = vpop.permute.xlu0 %1204  ;;  %v92_v8 = vld [vmem:[%s10095_s0 + $0x318] sm:$0xff] }
 0x1e6   :  { %10268 = vst [vmem:[#allocation126_spill] sm:$0xff] %v5967_v27 }
 0x1e7   :  { %10269 = vst [vmem:[#allocation127_spill] sm:$0xff] %v5969_v6 }
 0x1ea   :  { %1298 = vrot.lane.b32.xlu2 %v89_v32, %s4897_s13  ;;  %1296 = vrot.lane.b32.xlu1 %v88_v14, %s4897_s13  ;;  %v90_v32 = vld [vmem:[%s10095_s0 + $0x300] sm:$0xff] }
 0x1eb   :  { %1294 = vrot.lane.b32.xlu0 %v87_v48, %s4897_s13 }
 0x1ec   :  { %v5983_v31 = vpop.permute.xlu2 %1232  ;;  %v5985_v17 = vpop.permute.xlu1 %1212 }
 0x1ed   :  { %10270 = vst [vmem:[#allocation128_spill] sm:$0xff] %v5983_v31  ;;  %v5987_v27 = vpop.permute.xlu0 %1210  ;;  %v4388_v31 = vld [vmem:[%s10095_s0 + $0x338] sm:$0xff] }
 0x1ee   :  { %10271 = vst [vmem:[#allocation129_spill] sm:$0xff] %v5985_v17 }
 0x1ef   :  { %10272 = vst [vmem:[#allocation130_spill] sm:$0xff] %v5987_v27  ;;  %v4387_v27 = vld [vmem:[%s10095_s0 + $0x330] sm:$0xff] }
 0x1f2   :  { %1304 = vrot.lane.b32.xlu2 %v92_v8, %s4897_s13  ;;  %1302 = vrot.lane.b32.xlu1 %v91_v28, %s4897_s13  ;;  %v93_v28 = vld [vmem:[%s10095_s0 + $0x320] sm:$0xff] }
 0x1f3   :  { %1300 = vrot.lane.b32.xlu0 %v90_v32, %s4897_s13 }
 0x1f4   :  { %v6001_v14 = vpop.permute.xlu2 %1238  ;;  %v6003_v48 = vpop.permute.xlu1 %1218 }
 0x1f5   :  { %10273 = vst [vmem:[#allocation131_spill] sm:$0xff] %v6001_v14  ;;  %v6005_v17 = vpop.permute.xlu0 %1216 }
 0x1f6   :  { %10274 = vst [vmem:[#allocation132_spill] sm:$0xff] %v6003_v48  ;;  %v4493_v48 = vld [vmem:[%s10095_s0 + $0x22a] sm:$0xff] }
 0x1fa   :  { %1310 = vrot.lane.b32.xlu2 %v4388_v31, %s4897_s13  ;;  %1308 = vrot.lane.b32.xlu1 %v4387_v27, %s4897_s13  ;;  %v4389_v27 = vld [vmem:[%s10095_s0 + $0x19] sm:$0xff] }
 0x1fb   :  { %1306 = vrot.lane.b32.xlu0 %v93_v28, %s4897_s13  ;;  %s4905_s13 = smov 128  }
 0x1fc   :  { %v6019_v8 = vpop.permute.xlu2 %1244  ;;  %v6021_v32 = vpop.permute.xlu1 %1224 }
 0x1fd   :  { %10275 = vst [vmem:[#allocation133_spill] sm:$0xff] %v6019_v8  ;;  %v6023_v14 = vpop.permute.xlu0 %1222  ;;  %v4508_v8 = vld [vmem:[%s10095_s0 + $0x2da] sm:$0xff] }
 0x1fe   :  { %10276 = vst [vmem:[#allocation134_spill] sm:$0xff] %v6021_v32  ;;  %v4405_v32 = vld [vmem:[%s10095_s0 + $0xd9] sm:$0xff] }
 0x1ff   :  { %10277 = vst [vmem:[#allocation135_spill] sm:$0xff] %v6023_v14  ;;  %v4445_v14 = vld [vmem:[%s10095_s0 + $0x2e9] sm:$0xff] }
 0x202   :  { %1444 = vrot.lane.b32.xlu2 %v4391_v54, %s4898_s25  ;;  %1442 = vrot.lane.b32.xlu1 %v4390_v7, %s4898_s25  ;;  %v4392_v7 = vld [vmem:[%s10095_s0 + $0x39] sm:$0xff] }
 0x203   :  { %1440 = vrot.lane.b32.xlu0 %v4389_v27, %s4898_s25 }
 0x204   :  { %v6037_v31 = vpop.permute.xlu2 %1250  ;;  %v6039_v28 = vpop.permute.xlu1 %1230 }
 0x205   :  { %10278 = vst [vmem:[#allocation136_spill] sm:$0xff] %v6037_v31  ;;  %v6041_v6 = vpop.permute.xlu0 %1228  ;;  %v4442_v31 = vld [vmem:[%s10095_s0 + $0x2c1] sm:$0xff] }
 0x206   :  { %10279 = vst [vmem:[#allocation137_spill] sm:$0xff] %v6039_v28 }
 0x207   :  { %10280 = vst [vmem:[#allocation138_spill] sm:$0xff] %v6041_v6  ;;  %v4397_v6 = vld [vmem:[%s10095_s0 + $0x79] sm:$0xff] }
 0x20a   :  { %1450 = vrot.lane.b32.xlu2 %v4394_v57, %s4898_s25  ;;  %1448 = vrot.lane.b32.xlu1 %v4393_v3, %s4898_s25  ;;  %v4395_v3 = vld [vmem:[%s10095_s0 + $0x61] sm:$0xff] }
 0x20b   :  { %1446 = vrot.lane.b32.xlu0 %v4392_v7, %s4898_s25 }
 0x20c   :  { %v6055_v54 = vpop.permute.xlu2 %1256  ;;  %v6057_v27 = vpop.permute.xlu1 %1236 }
 0x20d   :  { %10281 = vst [vmem:[#allocation139_spill] sm:$0xff] %v6055_v54  ;;  %v6059_v28 = vpop.permute.xlu0 %1234  ;;  %v4399_v54 = vld [vmem:[%s10095_s0 + $0x91] sm:$0xff] }
 0x20e   :  { %10282 = vst [vmem:[#allocation140_spill] sm:$0xff] %v6057_v27 }
 0x20f   :  { %10283 = vst [vmem:[#allocation141_spill] sm:$0xff] %v6059_v28  ;;  %v4400_v28 = vld [vmem:[%s10095_s0 + $0x99] sm:$0xff] }
 0x212   :  { %1456 = vrot.lane.b32.xlu2 %v4397_v6, %s4898_s25  ;;  %1454 = vrot.lane.b32.xlu1 %v4396_v33, %s4898_s25  ;;  %v4398_v33 = vld [vmem:[%s10095_s0 + $0x81] sm:$0xff] }
 0x213   :  { %1452 = vrot.lane.b32.xlu0 %v4395_v3, %s4898_s25 }
 0x214   :  { %v6073_v57 = vpop.permute.xlu2 %1262  ;;  %v6075_v7 = vpop.permute.xlu1 %1242 }
 0x215   :  { %10284 = vst [vmem:[#allocation142_spill] sm:$0xff] %v6073_v57  ;;  %v6077_v27 = vpop.permute.xlu0 %1240  ;;  %v4402_v57 = vld [vmem:[%s10095_s0 + $0xb1] sm:$0xff] }
 0x216   :  { %10285 = vst [vmem:[#allocation143_spill] sm:$0xff] %v6075_v7 }
 0x217   :  { %10286 = vst [vmem:[#allocation144_spill] sm:$0xff] %v6077_v27  ;;  %v4403_v27 = vld [vmem:[%s10095_s0 + $0xc1] sm:$0xff] }
 0x21a   :  { %1462 = vrot.lane.b32.xlu2 %v4400_v28, %s4898_s25  ;;  %1460 = vrot.lane.b32.xlu1 %v4399_v54, %s4898_s25  ;;  %v4401_v28 = vld [vmem:[%s10095_s0 + $0xa9] sm:$0xff] }
 0x21b   :  { %1458 = vrot.lane.b32.xlu0 %v4398_v33, %s4898_s25 }
 0x21c   :  { %v6091_v6 = vpop.permute.xlu2 %1268  ;;  %v6093_v3 = vpop.permute.xlu1 %1248 }
 0x21d   :  { %10287 = vst [vmem:[#allocation145_spill] sm:$0xff] %v6091_v6  ;;  %v6095_v7 = vpop.permute.xlu0 %1246 }
 0x21e   :  { %10288 = vst [vmem:[#allocation146_spill] sm:$0xff] %v6093_v3  ;;  %v6488_v3 = vld [vmem:[%s10095_s0 + $0x7a] sm:$0xff] }
 0x21f   :  { %10289 = vst [vmem:[#allocation147_spill] sm:$0xff] %v6095_v7  ;;  %v6604_v7 = vld [vmem:[%s10095_s0 + $0x12a] sm:$0xff] }
 0x220   :  { %10358 = vst [vmem:[#allocation216_spill] sm:$0xff] %v6604_v7 }
 0x222   :  { %1468 = vrot.lane.b32.xlu2 %v4403_v27, %s4898_s25  ;;  %1466 = vrot.lane.b32.xlu1 %v4402_v57, %s4898_s25  ;;  %v4404_v27 = vld [vmem:[%s10095_s0 + $0xc9] sm:$0xff] }
 0x223   :  { %1464 = vrot.lane.b32.xlu0 %v4401_v28, %s4898_s25 }
 0x224   :  { %v6109_v54 = vpop.permute.xlu2 %1274  ;;  %v6111_v33 = vpop.permute.xlu1 %1254 }
 0x225   :  { %10290 = vst [vmem:[#allocation148_spill] sm:$0xff] %v6109_v54  ;;  %v6113_v6 = vpop.permute.xlu0 %1252 }
 0x226   :  { %10291 = vst [vmem:[#allocation149_spill] sm:$0xff] %v6111_v33  ;;  %v4409_v33 = vld [vmem:[%s10095_s0 + $0x109] sm:$0xff] }
 0x227   :  { %10292 = vst [vmem:[#allocation150_spill] sm:$0xff] %v6113_v6  ;;  %v4408_v6 = vld [vmem:[%s10095_s0 + $0xf9] sm:$0xff] }
 0x22a   :  { %1474 = vrot.lane.b32.xlu2 %v4406_v63, %s4898_s25  ;;  %1472 = vrot.lane.b32.xlu1 %v4405_v32, %s4898_s25  ;;  %v4407_v63 = vld [vmem:[%s10095_s0 + $0xf1] sm:$0xff] }
 0x22b   :  { %1470 = vrot.lane.b32.xlu0 %v4404_v27, %s4898_s25 }
 0x22c   :  { %v6127_v57 = vpop.permute.xlu2 %1280  ;;  %v6129_v28 = vpop.permute.xlu1 %1260 }
 0x22d   :  { %10293 = vst [vmem:[#allocation151_spill] sm:$0xff] %v6127_v57  ;;  %v6131_v54 = vpop.permute.xlu0 %1258  ;;  %v4411_v57 = vld [vmem:[%s10095_s0 + $0x121] sm:$0xff] }
 0x22e   :  { %10294 = vst [vmem:[#allocation152_spill] sm:$0xff] %v6129_v28 }
 0x22f   :  { %10295 = vst [vmem:[#allocation153_spill] sm:$0xff] %v6131_v54  ;;  %v4412_v54 = vld [vmem:[%s10095_s0 + $0x129] sm:$0xff] }
 0x232   :  { %1480 = vrot.lane.b32.xlu2 %v4409_v33, %s4898_s25  ;;  %1478 = vrot.lane.b32.xlu1 %v4408_v6, %s4898_s25  ;;  %v4410_v6 = vld [vmem:[%s10095_s0 + $0x111] sm:$0xff] }
 0x233   :  { %1476 = vrot.lane.b32.xlu0 %v4407_v63, %s4898_s25 }
 0x234   :  { %v6145_v32 = vpop.permute.xlu2 %1286  ;;  %v6147_v27 = vpop.permute.xlu1 %1266 }
 0x235   :  { %10296 = vst [vmem:[#allocation154_spill] sm:$0xff] %v6145_v32  ;;  %v6149_v28 = vpop.permute.xlu0 %1264  ;;  %v4414_v32 = vld [vmem:[%s10095_s0 + $0x141] sm:$0xff] }
 0x236   :  { %10297 = vst [vmem:[#allocation155_spill] sm:$0xff] %v6147_v27 }
 0x237   :  { %10298 = vst [vmem:[#allocation156_spill] sm:$0xff] %v6149_v28  ;;  %v4415_v28 = vld [vmem:[%s10095_s0 + $0x151] sm:$0xff] }
 0x23a   :  { %1486 = vrot.lane.b32.xlu2 %v4412_v54, %s4898_s25  ;;  %1484 = vrot.lane.b32.xlu1 %v4411_v57, %s4898_s25  ;;  %v4413_v54 = vld [vmem:[%s10095_s0 + $0x139] sm:$0xff] }
 0x23b   :  { %1482 = vrot.lane.b32.xlu0 %v4410_v6, %s4898_s25 }
 0x23c   :  { %v6163_v33 = vpop.permute.xlu2 %1292  ;;  %v6165_v63 = vpop.permute.xlu1 %1272 }
 0x23d   :  { %10299 = vst [vmem:[#allocation157_spill] sm:$0xff] %v6163_v33  ;;  %v6167_v27 = vpop.permute.xlu0 %1270  ;;  %v4417_v33 = vld [vmem:[%s10095_s0 + $0x169] sm:$0xff] }
 0x23e   :  { %10300 = vst [vmem:[#allocation158_spill] sm:$0xff] %v6165_v63 }
 0x23f   :  { %10301 = vst [vmem:[#allocation159_spill] sm:$0xff] %v6167_v27  ;;  %v4418_v27 = vld [vmem:[%s10095_s0 + $0x171] sm:$0xff] }
 0x242   :  { %1492 = vrot.lane.b32.xlu2 %v4415_v28, %s4898_s25  ;;  %1490 = vrot.lane.b32.xlu1 %v4414_v32, %s4898_s25  ;;  %v4416_v28 = vld [vmem:[%s10095_s0 + $0x159] sm:$0xff] }
 0x243   :  { %1488 = vrot.lane.b32.xlu0 %v4413_v54, %s4898_s25 }
 0x244   :  { %v6181_v57 = vpop.permute.xlu2 %1298  ;;  %v6183_v6 = vpop.permute.xlu1 %1278 }
 0x245   :  { %10302 = vst [vmem:[#allocation160_spill] sm:$0xff] %v6181_v57  ;;  %v6185_v63 = vpop.permute.xlu0 %1276  ;;  %v4421_v57 = vld [vmem:[%s10095_s0 + $0x1c9] sm:$0xff] }
 0x246   :  { %10303 = vst [vmem:[#allocation161_spill] sm:$0xff] %v6183_v6  ;;  %v4420_v6 = vld [vmem:[%s10095_s0 + $0x189] sm:$0xff] }
 0x247   :  { %10304 = vst [vmem:[#allocation162_spill] sm:$0xff] %v6185_v63 }
 0x24a   :  { %1498 = vrot.lane.b32.xlu2 %v4418_v27, %s4898_s25  ;;  %1496 = vrot.lane.b32.xlu1 %v4417_v33, %s4898_s25  ;;  %v4419_v27 = vld [vmem:[%s10095_s0 + $0x181] sm:$0xff] }
 0x24b   :  { %1494 = vrot.lane.b32.xlu0 %v4416_v28, %s4898_s25 }
 0x24c   :  { %v6199_v32 = vpop.permute.xlu2 %1304  ;;  %v6201_v54 = vpop.permute.xlu1 %1284 }
 0x24d   :  { %10305 = vst [vmem:[#allocation163_spill] sm:$0xff] %v6199_v32  ;;  %v6203_v63 = vpop.permute.xlu0 %1282 }
 0x24e   :  { %10306 = vst [vmem:[#allocation164_spill] sm:$0xff] %v6201_v54  ;;  %v4424_v54 = vld [vmem:[%s10095_s0 + $0x1e9] sm:$0xff] }
 0x24f   :  { %10307 = vst [vmem:[#allocation165_spill] sm:$0xff] %v6203_v63  ;;  %v4423_v63 = vld [vmem:[%s10095_s0 + $0x1e1] sm:$0xff] }
 0x252   :  { %1504 = vrot.lane.b32.xlu2 %v4421_v57, %s4898_s25  ;;  %1502 = vrot.lane.b32.xlu1 %v4420_v6, %s4898_s25  ;;  %v4422_v57 = vld [vmem:[%s10095_s0 + $0x1d1] sm:$0xff] }
 0x253   :  { %1500 = vrot.lane.b32.xlu0 %v4419_v27, %s4898_s25 }
 0x254   :  { %v6217_v33 = vpop.permute.xlu2 %1310  ;;  %v6219_v28 = vpop.permute.xlu1 %1290 }
 0x255   :  { %10308 = vst [vmem:[#allocation166_spill] sm:$0xff] %v6217_v33  ;;  %v6221_v32 = vpop.permute.xlu0 %1288 }
 0x256   :  { %10309 = vst [vmem:[#allocation167_spill] sm:$0xff] %v6219_v28  ;;  %v4427_v28 = vld [vmem:[%s10095_s0 + $0x211] sm:$0xff] }
 0x257   :  { %10310 = vst [vmem:[#allocation168_spill] sm:$0xff] %v6221_v32  ;;  %v4426_v32 = vld [vmem:[%s10095_s0 + $0x201] sm:$0xff] }
 0x25a   :  { %1510 = vrot.lane.b32.xlu2 %v4424_v54, %s4898_s25  ;;  %1508 = vrot.lane.b32.xlu1 %v4423_v63, %s4898_s25  ;;  %v4425_v63 = vld [vmem:[%s10095_s0 + $0x1f9] sm:$0xff] }
 0x25b   :  { %1506 = vrot.lane.b32.xlu0 %v4422_v57, %s4898_s25 }
 0x25c   :  { %v6235_v6 = vpop.permute.xlu2 %1444  ;;  %v6237_v27 = vpop.permute.xlu1 %1296 }
 0x25d   :  { %10311 = vst [vmem:[#allocation169_spill] sm:$0xff] %v6237_v27  ;;  %v6239_v33 = vpop.permute.xlu0 %1294 }
 0x25e   :  { %10312 = vst [vmem:[#allocation170_spill] sm:$0xff] %v6239_v33  ;;  %v4430_v33 = vld [vmem:[%s10095_s0 + $0x231] sm:$0xff] }
 0x262   :  { %1516 = vrot.lane.b32.xlu2 %v4427_v28, %s4898_s25  ;;  %1514 = vrot.lane.b32.xlu1 %v4426_v32, %s4898_s25  ;;  %v4428_v32 = vld [vmem:[%s10095_s0 + $0x219] sm:$0xff] }
 0x263   :  { %1512 = vrot.lane.b32.xlu0 %v4425_v63, %s4898_s25 }
 0x264   :  { %v6253_v54 = vpop.permute.xlu2 %1450  ;;  %v6255_v57 = vpop.permute.xlu1 %1302 }
 0x265   :  { %10313 = vst [vmem:[#allocation171_spill] sm:$0xff] %v6255_v57  ;;  %v6257_v27 = vpop.permute.xlu0 %1300 }
 0x266   :  { %10314 = vst [vmem:[#allocation172_spill] sm:$0xff] %v6257_v27  ;;  %v4433_v27 = vld [vmem:[%s10095_s0 + $0x259] sm:$0xff] }
 0x26a   :  { %1522 = vrot.lane.b32.xlu2 %v4430_v33, %s4898_s25  ;;  %1520 = vrot.lane.b32.xlu1 %v4429_v23, %s4898_s25  ;;  %v4431_v23 = vld [vmem:[%s10095_s0 + $0x241] sm:$0xff] }
 0x26b   :  { %1518 = vrot.lane.b32.xlu0 %v4428_v32, %s4898_s25 }
 0x26c   :  { %v6271_v28 = vpop.permute.xlu2 %1456  ;;  %v6273_v63 = vpop.permute.xlu1 %1308 }
 0x26d   :  { %10315 = vst [vmem:[#allocation173_spill] sm:$0xff] %v6271_v28  ;;  %v6275_v57 = vpop.permute.xlu0 %1306  ;;  %v6429_v28 = vld [vmem:[%s10095_s0 + $0x3a] sm:$0xff] }
 0x26e   :  { %10316 = vst [vmem:[#allocation174_spill] sm:$0xff] %v6273_v63 }
 0x26f   :  { %10317 = vst [vmem:[#allocation175_spill] sm:$0xff] %v6275_v57  ;;  %v4436_v57 = vld [vmem:[%s10095_s0 + $0x279] sm:$0xff] }
 0x272   :  { %1528 = vrot.lane.b32.xlu2 %v4433_v27, %s4898_s25  ;;  %1526 = vrot.lane.b32.xlu1 %v4432_v2, %s4898_s25  ;;  %v4434_v2 = vld [vmem:[%s10095_s0 + $0x261] sm:$0xff] }
 0x273   :  { %1524 = vrot.lane.b32.xlu0 %v4431_v23, %s4898_s25 }
 0x274   :  { %v6289_v33 = vpop.permute.xlu2 %1462  ;;  %v6291_v32 = vpop.permute.xlu1 %1442 }
 0x275   :  { %10318 = vst [vmem:[#allocation176_spill] sm:$0xff] %v6289_v33  ;;  %v6293_v63 = vpop.permute.xlu0 %1440 }
 0x27a   :  { %1534 = vrot.lane.b32.xlu2 %v4436_v57, %s4898_s25  ;;  %1532 = vrot.lane.b32.xlu1 %v4435_v11, %s4898_s25  ;;  %v4437_v11 = vld [vmem:[%s10095_s0 + $0x289] sm:$0xff] }
 0x27b   :  { %1530 = vrot.lane.b32.xlu0 %v4434_v2, %s4898_s25 }
 0x27c   :  { %v6307_v27 = vpop.permute.xlu2 %1468  ;;  %v6309_v23 = vpop.permute.xlu1 %1448 }
 0x27d   :  { %10319 = vst [vmem:[#allocation177_spill] sm:$0xff] %v6307_v27  ;;  %v6311_v33 = vpop.permute.xlu0 %1446 }
 0x282   :  { %1540 = vrot.lane.b32.xlu2 %v4439_v46, %s4898_s25  ;;  %1538 = vrot.lane.b32.xlu1 %v4438_v4, %s4898_s25  ;;  %v4440_v4 = vld [vmem:[%s10095_s0 + $0x2a9] sm:$0xff] }
 0x283   :  { %1536 = vrot.lane.b32.xlu0 %v4437_v11, %s4898_s25 }
 0x284   :  { %v6325_v57 = vpop.permute.xlu2 %1474  ;;  %v6327_v2 = vpop.permute.xlu1 %1454 }
 0x285   :  { %10320 = vst [vmem:[#allocation178_spill] sm:$0xff] %v6325_v57  ;;  %v6329_v27 = vpop.permute.xlu0 %1452  ;;  %v4483_v57 = vld [vmem:[%s10095_s0 + $0x182] sm:$0xff] }
 0x286   :  { %10321 = vst [vmem:[#allocation179_spill] sm:$0xff] %v6327_v2  ;;  %v4467_v2 = vld [vmem:[%s10095_s0 + $0xc2] sm:$0xff] }
 0x287   :  { %10322 = vst [vmem:[#allocation180_spill] sm:$0xff] %v6329_v27  ;;  %v4495_v27 = vld [vmem:[%s10095_s0 + $0x242] sm:$0xff] }
 0x28a   :  { %1546 = vrot.lane.b32.xlu2 %v4442_v31, %s4898_s25  ;;  %1544 = vrot.lane.b32.xlu1 %v4441_v34, %s4898_s25  ;;  %v4443_v34 = vld [vmem:[%s10095_s0 + $0x2d1] sm:$0xff] }
 0x28b   :  { %1542 = vrot.lane.b32.xlu0 %v4440_v4, %s4898_s25 }
 0x28c   :  { %v6343_v46 = vpop.permute.xlu2 %1480  ;;  %v6345_v11 = vpop.permute.xlu1 %1460 }
 0x28d   :  { %10323 = vst [vmem:[#allocation181_spill] sm:$0xff] %v6343_v46  ;;  %v6347_v0 = vpop.permute.xlu0 %1458  ;;  %v4448_v46 = vld [vmem:[%s10095_s0 + $0x309] sm:$0xff] }
 0x28e   :  { %10324 = vst [vmem:[#allocation182_spill] sm:$0xff] %v6345_v11 }
 0x28f   :  { %10325 = vst [vmem:[#allocation183_spill] sm:$0xff] %v6347_v0  ;;  %v4447_v0 = vld [vmem:[%s10095_s0 + $0x301] sm:$0xff] }
 0x292   :  { %1552 = vrot.lane.b32.xlu2 %v4445_v14, %s4898_s25  ;;  %1550 = vrot.lane.b32.xlu1 %v4444_v35, %s4898_s25  ;;  %v4446_v35 = vld [vmem:[%s10095_s0 + $0x2f1] sm:$0xff] }
 0x293   :  { %1548 = vrot.lane.b32.xlu0 %v4443_v34, %s4898_s25 }
 0x294   :  { %v6361_v31 = vpop.permute.xlu2 %1486  ;;  %v6363_v4 = vpop.permute.xlu1 %1466 }
 0x295   :  { %10326 = vst [vmem:[#allocation184_spill] sm:$0xff] %v6361_v31  ;;  %v6365_v11 = vpop.permute.xlu0 %1464  ;;  %v4451_v31 = vld [vmem:[%s10095_s0 + $0x331] sm:$0xff] }
 0x296   :  { %10327 = vst [vmem:[#allocation185_spill] sm:$0xff] %v6363_v4 }
 0x297   :  { %10328 = vst [vmem:[#allocation186_spill] sm:$0xff] %v6365_v11  ;;  %v4450_v11 = vld [vmem:[%s10095_s0 + $0x321] sm:$0xff] }
 0x29a   :  { %1558 = vrot.lane.b32.xlu2 %v4448_v46, %s4898_s25  ;;  %1556 = vrot.lane.b32.xlu1 %v4447_v0, %s4898_s25  ;;  %v4449_v0 = vld [vmem:[%s10095_s0 + $0x319] sm:$0xff] }
 0x29b   :  { %1554 = vrot.lane.b32.xlu0 %v4446_v35, %s4898_s25 }
 0x29c   :  { %v6379_v14 = vpop.permute.xlu2 %1492  ;;  %v6381_v34 = vpop.permute.xlu1 %1472 }
 0x29d   :  { %10329 = vst [vmem:[#allocation187_spill] sm:$0xff] %v6379_v14  ;;  %v6383_v4 = vpop.permute.xlu0 %1470 }
 0x29e   :  { %10330 = vst [vmem:[#allocation188_spill] sm:$0xff] %v6383_v4  ;;  %v4454_v4 = vld [vmem:[%s10095_s0 + $0x22] sm:$0xff] }
 0x2a2   :  { %1564 = vrot.lane.b32.xlu2 %v4451_v31, %s4898_s25  ;;  %1562 = vrot.lane.b32.xlu1 %v4450_v11, %s4898_s25  ;;  %v4452_v11 = vld [vmem:[%s10095_s0 + $0x339] sm:$0xff] }
 0x2a3   :  { %1560 = vrot.lane.b32.xlu0 %v4449_v0, %s4898_s25 }
 0x2a4   :  { %v6397_v46 = vpop.permute.xlu2 %1498  ;;  %v6399_v35 = vpop.permute.xlu1 %1478 }
 0x2a5   :  { %10331 = vst [vmem:[#allocation189_spill] sm:$0xff] %v6397_v46  ;;  %v6401_v14 = vpop.permute.xlu0 %1476 }
 0x2a6   :  { %10332 = vst [vmem:[#allocation190_spill] sm:$0xff] %v6399_v35  ;;  %v6424_v35 = vld [vmem:[%s10095_s0 + $0x4a] sm:$0xff] }
 0x2a7   :  { %10333 = vst [vmem:[#allocation191_spill] sm:$0xff] %v6401_v14  ;;  %v6513_v14 = vld [vmem:[%s10095_s0 + $0x9a] sm:$0xff] }
 0x2aa   :  { %1698 = vrot.lane.b32.xlu2 %v4454_v4, %s4899_s9  ;;  %1696 = vrot.lane.b32.xlu1 %v4453_v21, %s4899_s9  ;;  %v6434_v21 = vld [vmem:[%s10095_s0 + $0x32] sm:$0xff] }
 0x2ab   :  { %1566 = vrot.lane.b32.xlu0 %v4452_v11, %s4898_s25  ;;  %s4900_s25 = smov 24  }
 0x2ac   :  { %v6415_v31 = vpop.permute.xlu2 %1504  ;;  %v6417_v0 = vpop.permute.xlu1 %1484 }
 0x2ad   :  { %10334 = vst [vmem:[#allocation192_spill] sm:$0xff] %v6415_v31  ;;  %v6419_v46 = vpop.permute.xlu0 %1482  ;;  %v6478_v31 = vld [vmem:[%s10095_s0 + $0x92] sm:$0xff] }
 0x2ae   :  { %10335 = vst [vmem:[#allocation193_spill] sm:$0xff] %v6417_v0 }
 0x2af   :  { %10336 = vst [vmem:[#allocation194_spill] sm:$0xff] %v6419_v46  ;;  %v6451_v46 = vld [vmem:[%s10095_s0 + $0x6a] sm:$0xff] }
 0x2b2   :  { %1704 = vrot.lane.b32.xlu2 %v6424_v35, %s4899_s9  ;;  %1702 = vrot.lane.b32.xlu1 %v6429_v28, %s4899_s9 }
 0x2b3   :  { %1700 = vrot.lane.b32.xlu0 %v6434_v21, %s4899_s9 }
 0x2b4   :  { %v6442_v4 = vpop.permute.xlu2 %1510  ;;  %v6444_v11 = vpop.permute.xlu1 %1490 }
 0x2b5   :  { %10337 = vst [vmem:[#allocation195_spill] sm:$0xff] %v6442_v4  ;;  %v6446_v0 = vpop.permute.xlu0 %1488 }
 0x2b6   :  { %10338 = vst [vmem:[#allocation196_spill] sm:$0xff] %v6444_v11 }
 0x2b7   :  { %10339 = vst [vmem:[#allocation197_spill] sm:$0xff] %v6446_v0 }
 0x2ba   :  { %1710 = vrot.lane.b32.xlu2 %v6451_v46, %s4899_s9  ;;  %1708 = vrot.lane.b32.xlu1 %v6456_v37, %s4899_s9 }
 0x2bb   :  { %1706 = vrot.lane.b32.xlu0 %v6461_v25, %s4899_s9 }
 0x2bc   :  { %v6469_v11 = vpop.permute.xlu2 %1516  ;;  %v6471_v0 = vpop.permute.xlu1 %1496 }
 0x2bd   :  { %10340 = vst [vmem:[#allocation198_spill] sm:$0xff] %v6469_v11  ;;  %v6473_v4 = vpop.permute.xlu0 %1494 }
 0x2be   :  { %10341 = vst [vmem:[#allocation199_spill] sm:$0xff] %v6471_v0 }
 0x2bf   :  { %10342 = vst [vmem:[#allocation200_spill] sm:$0xff] %v6473_v4 }
 0x2c2   :  { %1716 = vrot.lane.b32.xlu2 %v6478_v31, %s4899_s9  ;;  %1714 = vrot.lane.b32.xlu1 %v6483_v44, %s4899_s9 }
 0x2c3   :  { %1712 = vrot.lane.b32.xlu0 %v6488_v3, %s4899_s9 }
 0x2c4   :  { %v6496_v0 = vpop.permute.xlu2 %1522  ;;  %v6498_v4 = vpop.permute.xlu1 %1502 }
 0x2c5   :  { %10343 = vst [vmem:[#allocation201_spill] sm:$0xff] %v6496_v0  ;;  %v6500_v11 = vpop.permute.xlu0 %1500 }
 0x2c6   :  { %10344 = vst [vmem:[#allocation202_spill] sm:$0xff] %v6498_v4  ;;  %v4478_v4 = vld [vmem:[%s10095_s0 + $0x142] sm:$0xff] }
 0x2c7   :  { %10345 = vst [vmem:[#allocation203_spill] sm:$0xff] %v6500_v11  ;;  %v6784_v11 = vld [vmem:[%s10095_s0 + $0x2aa] sm:$0xff] }
 0x2c8   :  { %10381 = vst [vmem:[#allocation239_spill] sm:$0xff] %v6784_v11 }
 0x2ca   :  { %1722 = vrot.lane.b32.xlu2 %v4466_v47, %s4899_s9  ;;  %1720 = vrot.lane.b32.xlu1 %v6508_v26, %s4899_s9  ;;  %v4468_v47 = vld [vmem:[%s10095_s0 + $0xca] sm:$0xff] }
 0x2cb   :  { %1718 = vrot.lane.b32.xlu0 %v6513_v14, %s4899_s9 }
 0x2cc   :  { %v6520_v0 = vpop.permute.xlu2 %1528  ;;  %v6522_v10 = vpop.permute.xlu1 %1508 }
 0x2cd   :  { %10346 = vst [vmem:[#allocation204_spill] sm:$0xff] %v6520_v0  ;;  %v6524_v42 = vpop.permute.xlu0 %1506 }
 0x2ce   :  { %10347 = vst [vmem:[#allocation205_spill] sm:$0xff] %v6522_v10 }
 0x2cf   :  { %10348 = vst [vmem:[#allocation206_spill] sm:$0xff] %v6524_v42 }
 0x2d2   :  { %1728 = vrot.lane.b32.xlu2 %v4469_v22, %s4899_s9  ;;  %1726 = vrot.lane.b32.xlu1 %v4468_v47, %s4899_s9  ;;  %v4470_v22 = vld [vmem:[%s10095_s0 + $0xe2] sm:$0xff] }
 0x2d3   :  { %1724 = vrot.lane.b32.xlu0 %v4467_v2, %s4899_s9 }
 0x2d4   :  { %v6538_v0 = vpop.permute.xlu2 %1534  ;;  %v6540_v10 = vpop.permute.xlu1 %1514 }
 0x2d5   :  { %10349 = vst [vmem:[#allocation207_spill] sm:$0xff] %v6538_v0  ;;  %v6542_v42 = vpop.permute.xlu0 %1512  ;;  %v6576_v0 = vld [vmem:[%s10095_s0 + $0x112] sm:$0xff] }
 0x2d6   :  { %10350 = vst [vmem:[#allocation208_spill] sm:$0xff] %v6540_v10 }
 0x2d7   :  { %10351 = vst [vmem:[#allocation209_spill] sm:$0xff] %v6542_v42  ;;  %v6571_v42 = vld [vmem:[%s10095_s0 + $0x122] sm:$0xff] }
 0x2da   :  { %1734 = vrot.lane.b32.xlu2 %v6547_v43, %s4899_s9  ;;  %1732 = vrot.lane.b32.xlu1 %v6552_v29, %s4899_s9 }
 0x2db   :  { %1730 = vrot.lane.b32.xlu0 %v4470_v22, %s4899_s9  ;;  %v6581_v22 = vld [vmem:[%s10095_s0 + $0x10a] sm:$0xff] }
 0x2dc   :  { %v6562_v2 = vpop.permute.xlu2 %1540  ;;  %v6564_v47 = vpop.permute.xlu1 %1520 }
 0x2dd   :  { %10352 = vst [vmem:[#allocation210_spill] sm:$0xff] %v6562_v2  ;;  %v6566_v10 = vpop.permute.xlu0 %1518 }
 0x2de   :  { %10353 = vst [vmem:[#allocation211_spill] sm:$0xff] %v6564_v47 }
 0x2df   :  { %10354 = vst [vmem:[#allocation212_spill] sm:$0xff] %v6566_v10 }
 0x2e2   :  { %1740 = vrot.lane.b32.xlu2 %v6571_v42, %s4899_s9  ;;  %1738 = vrot.lane.b32.xlu1 %v6576_v0, %s4899_s9 }
 0x2e3   :  { %1736 = vrot.lane.b32.xlu0 %v6581_v22, %s4899_s9 }
 0x2e4   :  { %v6589_v47 = vpop.permute.xlu2 %1546  ;;  %v6591_v10 = vpop.permute.xlu1 %1526 }
 0x2e5   :  { %10355 = vst [vmem:[#allocation213_spill] sm:$0xff] %v6589_v47  ;;  %v6593_v2 = vpop.permute.xlu0 %1524 }
 0x2e6   :  { %10356 = vst [vmem:[#allocation214_spill] sm:$0xff] %v6591_v10 }
 0x2e7   :  { %10357 = vst [vmem:[#allocation215_spill] sm:$0xff] %v6593_v2 }
 0x2ea   :  { %1746 = vrot.lane.b32.xlu2 %v4478_v4, %s4899_s9  ;;  %1744 = vrot.lane.b32.xlu1 %v4477_v61, %s4899_s9  ;;  %v4479_v61 = vld [vmem:[%s10095_s0 + $0x152] sm:$0xff] }
 0x2eb   :  { %1742 = vrot.lane.b32.xlu0 %v6604_v7, %s4899_s9  ;;  %v4496_v7 = vld [vmem:[%s10095_s0 + $0x24a] sm:$0xff] }
 0x2ec   :  { %v6610_v10 = vpop.permute.xlu2 %1552  ;;  %v6612_v2 = vpop.permute.xlu1 %1532 }
 0x2ed   :  { %10359 = vst [vmem:[#allocation217_spill] sm:$0xff] %v6610_v10  ;;  %v6614_v47 = vpop.permute.xlu0 %1530  ;;  %v4484_v10 = vld [vmem:[%s10095_s0 + $0x18a] sm:$0xff] }
 0x2ee   :  { %10360 = vst [vmem:[#allocation218_spill] sm:$0xff] %v6612_v2 }
 0x2ef   :  { %10361 = vst [vmem:[#allocation219_spill] sm:$0xff] %v6614_v47 }
 0x2f2   :  { %1752 = vrot.lane.b32.xlu2 %v4481_v24, %s4899_s9  ;;  %1750 = vrot.lane.b32.xlu1 %v4480_v51, %s4899_s9  ;;  %v4482_v51 = vld [vmem:[%s10095_s0 + $0x172] sm:$0xff] }
 0x2f3   :  { %1748 = vrot.lane.b32.xlu0 %v4479_v61, %s4899_s9 }
 0x2f4   :  { %v6628_v4 = vpop.permute.xlu2 %1558  ;;  %v6630_v2 = vpop.permute.xlu1 %1538 }
 0x2f5   :  { %10362 = vst [vmem:[#allocation220_spill] sm:$0xff] %v6628_v4  ;;  %v6632_v47 = vpop.permute.xlu0 %1536 }
 0x2f6   :  { %10363 = vst [vmem:[#allocation221_spill] sm:$0xff] %v6630_v2  ;;  %v6655_v2 = vld [vmem:[%s10095_s0 + $0x1e2] sm:$0xff] }
 0x2f7   :  { %10364 = vst [vmem:[#allocation222_spill] sm:$0xff] %v6632_v47  ;;  %v4486_v47 = vld [vmem:[%s10095_s0 + $0x1d2] sm:$0xff] }
 0x2fa   :  { %1758 = vrot.lane.b32.xlu2 %v4484_v10, %s4899_s9  ;;  %1756 = vrot.lane.b32.xlu1 %v4483_v57, %s4899_s9  ;;  %v4485_v10 = vld [vmem:[%s10095_s0 + $0x1ca] sm:$0xff] }
 0x2fb   :  { %1754 = vrot.lane.b32.xlu0 %v4482_v51, %s4899_s9 }
 0x2fc   :  { %v6646_v24 = vpop.permute.xlu2 %1564  ;;  %v6648_v61 = vpop.permute.xlu1 %1544 }
 0x2fd   :  { %10365 = vst [vmem:[#allocation223_spill] sm:$0xff] %v6646_v24  ;;  %v6650_v4 = vpop.permute.xlu0 %1542 }
 0x2fe   :  { %10366 = vst [vmem:[#allocation224_spill] sm:$0xff] %v6648_v61  ;;  %v6676_v61 = vld [vmem:[%s10095_s0 + $0x202] sm:$0xff] }
 0x2ff   :  { %10367 = vst [vmem:[#allocation225_spill] sm:$0xff] %v6650_v4  ;;  %v6681_v4 = vld [vmem:[%s10095_s0 + $0x1fa] sm:$0xff] }
 0x300   :  { %10370 = vst [vmem:[#allocation228_spill] sm:$0xff] %v6676_v61 }
 0x302   :  { %1764 = vrot.lane.b32.xlu2 %v6655_v2, %s4899_s9  ;;  %1762 = vrot.lane.b32.xlu1 %v4486_v47, %s4899_s9  ;;  %v6686_v47 = vld [vmem:[%s10095_s0 + $0x1ea] sm:$0xff] }
 0x303   :  { %1760 = vrot.lane.b32.xlu0 %v4485_v10, %s4899_s9 }
 0x304   :  { %v6667_v57 = vpop.permute.xlu2 %1698  ;;  %v6669_v51 = vpop.permute.xlu1 %1550 }
 0x305   :  { %10368 = vst [vmem:[#allocation226_spill] sm:$0xff] %v6669_v51  ;;  %v6671_v24 = vpop.permute.xlu0 %1548 }
 0x306   :  { %10369 = vst [vmem:[#allocation227_spill] sm:$0xff] %v6671_v24 }
 0x30a   :  { %1770 = vrot.lane.b32.xlu2 %v6676_v61, %s4899_s9  ;;  %1768 = vrot.lane.b32.xlu1 %v6681_v4, %s4899_s9  ;;  %v4492_v61 = vld [vmem:[%s10095_s0 + $0x21a] sm:$0xff] }
 0x30b   :  { %1766 = vrot.lane.b32.xlu0 %v6686_v47, %s4899_s9 }
 0x30c   :  { %v6694_v10 = vpop.permute.xlu2 %1704  ;;  %v6696_v51 = vpop.permute.xlu1 %1556 }
 0x30d   :  { %10371 = vst [vmem:[#allocation229_spill] sm:$0xff] %v6696_v51  ;;  %v6698_v24 = vpop.permute.xlu0 %1554 }
 0x30e   :  { %10372 = vst [vmem:[#allocation230_spill] sm:$0xff] %v6698_v24 }
 0x312   :  { %1776 = vrot.lane.b32.xlu2 %v4493_v48, %s4899_s9  ;;  %1774 = vrot.lane.b32.xlu1 %v4492_v61, %s4899_s9  ;;  %v4494_v48 = vld [vmem:[%s10095_s0 + $0x232] sm:$0xff] }
 0x313   :  { %1772 = vrot.lane.b32.xlu0 %v6709_v41, %s4899_s9  ;;  %v4499_v41 = vld [vmem:[%s10095_s0 + $0x272] sm:$0xff] }
 0x314   :  { %v6715_v51 = vpop.permute.xlu2 %1710  ;;  %v6717_v24 = vpop.permute.xlu1 %1562 }
 0x315   :  { %10374 = vst [vmem:[#allocation232_spill] sm:$0xff] %v6715_v51  ;;  %v6719_v60 = vpop.permute.xlu0 %1560  ;;  %v4498_v51 = vld [vmem:[%s10095_s0 + $0x262] sm:$0xff] }
 0x316   :  { %10375 = vst [vmem:[#allocation233_spill] sm:$0xff] %v6717_v24 }
 0x317   :  { %10376 = vst [vmem:[#allocation234_spill] sm:$0xff] %v6719_v60 }
 0x31a   :  { %1782 = vrot.lane.b32.xlu2 %v4496_v7, %s4899_s9  ;;  %1780 = vrot.lane.b32.xlu1 %v4495_v27, %s4899_s9  ;;  %v4497_v7 = vld [vmem:[%s10095_s0 + $0x25a] sm:$0xff] }
 0x31b   :  { %1778 = vrot.lane.b32.xlu0 %v4494_v48, %s4899_s9 }
 0x31c   :  { %v6733_v61 = vpop.permute.xlu2 %1716  ;;  %v6735_v24 = vpop.permute.xlu1 %1696 }
 0x31d   :  { %10377 = vst [vmem:[#allocation235_spill] sm:$0xff] %v6733_v61  ;;  %v6737_v60 = vpop.permute.xlu0 %1566  ;;  %v6760_v61 = vld [vmem:[%s10095_s0 + $0x292] sm:$0xff] }
 0x31e   :  { %10378 = vst [vmem:[#allocation236_spill] sm:$0xff] %v6737_v60 }
 0x322   :  { %1788 = vrot.lane.b32.xlu2 %v4499_v41, %s4899_s9  ;;  %1786 = vrot.lane.b32.xlu1 %v4498_v51, %s4899_s9  ;;  %v4500_v41 = vld [vmem:[%s10095_s0 + $0x27a] sm:$0xff] }
 0x323   :  { %1784 = vrot.lane.b32.xlu0 %v4497_v7, %s4899_s9 }
 0x324   :  { %v6751_v27 = vpop.permute.xlu2 %1722  ;;  %v6753_v48 = vpop.permute.xlu1 %1702 }
 0x325   :  { %10379 = vst [vmem:[#allocation237_spill] sm:$0xff] %v6751_v27  ;;  %v6755_v60 = vpop.permute.xlu0 %1700 }
 0x32a   :  { %1794 = vrot.lane.b32.xlu2 %v6760_v61, %s4899_s9  ;;  %1792 = vrot.lane.b32.xlu1 %v4501_v16, %s4899_s9  ;;  %v6789_v16 = vld [vmem:[%s10095_s0 + $0x2a2] sm:$0xff] }
 0x32b   :  { %1790 = vrot.lane.b32.xlu0 %v4500_v41, %s4899_s9  ;;  %10382 = vst [vmem:[#allocation240_spill] sm:$0xff] %v6789_v16 }
 0x32c   :  { %v6772_v51 = vpop.permute.xlu2 %1728  ;;  %v6774_v7 = vpop.permute.xlu1 %1708 }
 0x32d   :  { %10380 = vst [vmem:[#allocation238_spill] sm:$0xff] %v6774_v7  ;;  %v6776_v27 = vpop.permute.xlu0 %1706 }
 0x332   :  { %1800 = vrot.lane.b32.xlu2 %v4505_v59, %s4899_s9  ;;  %1798 = vrot.lane.b32.xlu1 %v6784_v11, %s4899_s9  ;;  %v4507_v59 = vld [vmem:[%s10095_s0 + $0x2d2] sm:$0xff]  ;;  %v4506_v11 = vld [vmem:[%s10095_s0 + $0x2c2] sm:$0xff] }
 0x333   :  { %1796 = vrot.lane.b32.xlu0 %v6789_v16, %s4899_s9  ;;  %v4511_v16 = vld [vmem:[%s10095_s0 + $0x302] sm:$0xff] }
 0x334   :  { %v6796_v41 = vpop.permute.xlu2 %1734  ;;  %v6798_v7 = vpop.permute.xlu1 %1714 }
 0x335   :  { %10383 = vst [vmem:[#allocation241_spill] sm:$0xff] %v6796_v41  ;;  %v6800_v62 = vpop.permute.xlu0 %1712 }
 0x336   :  { %10384 = vst [vmem:[#allocation242_spill] sm:$0xff] %v6798_v7 }
 0x337   :  { %10385 = vst [vmem:[#allocation243_spill] sm:$0xff] %v6800_v62 }
 0x33a   :  { %1806 = vrot.lane.b32.xlu2 %v4508_v8, %s4899_s9  ;;  %1804 = vrot.lane.b32.xlu1 %v4507_v59, %s4899_s9  ;;  %v4509_v8 = vld [vmem:[%s10095_s0 + $0x2ea] sm:$0xff] }
 0x33b   :  { %1802 = vrot.lane.b32.xlu0 %v4506_v11, %s4899_s9 }
 0x33c   :  { %v6814_v7 = vpop.permute.xlu2 %1740  ;;  %v6816_v41 = vpop.permute.xlu1 %1720 }
 0x33d   :  { %10386 = vst [vmem:[#allocation244_spill] sm:$0xff] %v6814_v7  ;;  %v6818_v62 = vpop.permute.xlu0 %1718  ;;  %v4514_v7 = vld [vmem:[%s10095_s0 + $0x322] sm:$0xff] }
 0x33e   :  { %10387 = vst [vmem:[#allocation245_spill] sm:$0xff] %v6816_v41 }
 0x33f   :  { %10388 = vst [vmem:[#allocation246_spill] sm:$0xff] %v6818_v62  ;;  %v4513_v62 = vld [vmem:[%s10095_s0 + $0x31a] sm:$0xff] }
 0x342   :  { %1812 = vrot.lane.b32.xlu2 %v4511_v16, %s4899_s9  ;;  %1810 = vrot.lane.b32.xlu1 %v4510_v38, %s4899_s9  ;;  %v4512_v38 = vld [vmem:[%s10095_s0 + $0x30a] sm:$0xff] }
 0x343   :  { %1808 = vrot.lane.b32.xlu0 %v4509_v8, %s4899_s9 }
 0x344   :  { %v6832_v11 = vpop.permute.xlu2 %1746  ;;  %v6834_v59 = vpop.permute.xlu1 %1726 }
 0x345   :  { %10389 = vst [vmem:[#allocation247_spill] sm:$0xff] %v6832_v11  ;;  %v6836_v41 = vpop.permute.xlu0 %1724  ;;  %v4517_v11 = vld [vmem:[%s10095_s0 + $0x30] sm:$0xff] }
 0x346   :  { %10390 = vst [vmem:[#allocation248_spill] sm:$0xff] %v6834_v59 }
 0x347   :  { %10391 = vst [vmem:[#allocation249_spill] sm:$0xff] %v6836_v41  ;;  %v4516_v41 = vld [vmem:[%s10095_s0 + $0x33a] sm:$0xff] }
 0x34a   :  { %1818 = vrot.lane.b32.xlu2 %v4514_v7, %s4899_s9  ;;  %1816 = vrot.lane.b32.xlu1 %v4513_v62, %s4899_s9  ;;  %v4515_v62 = vld [vmem:[%s10095_s0 + $0x332] sm:$0xff] }
 0x34b   :  { %1814 = vrot.lane.b32.xlu0 %v4512_v38, %s4899_s9 }
 0x34c   :  { %v6850_v16 = vpop.permute.xlu2 %1752  ;;  %v6852_v8 = vpop.permute.xlu1 %1732 }
 0x34d   :  { %10392 = vst [vmem:[#allocation250_spill] sm:$0xff] %v6850_v16  ;;  %v6854_v59 = vpop.permute.xlu0 %1730 }
 0x34e   :  { %10393 = vst [vmem:[#allocation251_spill] sm:$0xff] %v6852_v8  ;;  %v4518_v8 = vld [vmem:[%s10095_s0 + $0x38] sm:$0xff] }
 0x34f   :  { %10394 = vst [vmem:[#allocation252_spill] sm:$0xff] %v6854_v59  ;;  %v4581_v59 = vld [vmem:[%s10095_s0 + $0x31] sm:$0xff] }
 0x352   :  { %1952 = vrot.lane.b32.xlu2 %v4517_v11, %s4900_s25  ;;  %1822 = vrot.lane.b32.xlu1 %v4516_v41, %s4899_s9 }
 0x353   :  { %1820 = vrot.lane.b32.xlu0 %v4515_v62, %s4899_s9  ;;  %s4902_s9 = smov 28  }
 0x354   :  { %v6868_v7 = vpop.permute.xlu2 %1758  ;;  %v6870_v38 = vpop.permute.xlu1 %1738 }
 0x355   :  { %10395 = vst [vmem:[#allocation253_spill] sm:$0xff] %v6870_v38  ;;  %v6872_v16 = vpop.permute.xlu0 %1736  ;;  %v4519_v38 = vld [vmem:[%s10095_s0 + $0x48] sm:$0xff] }
 0x35a   :  { %1954 = vrot.lane.b32.xlu2 %v4518_v8, %s4900_s25  ;;  %2464 = vrot.lane.b32.xlu1 %v6434_v21, %s4901_s22  ;;  %v4582_v8 = vld [vmem:[%s10095_s0 + $0x39] sm:$0xff] }
 0x35b   :  { %2208 = vrot.lane.b32.xlu0 %v4581_v59, %s4902_s9 }
 0x35c   :  { %v6884_v41 = vpop.permute.xlu2 %1764  ;;  %v6886_v11 = vpop.permute.xlu1 %1744 }
 0x35d   :  { %10396 = vst [vmem:[#allocation254_spill] sm:$0xff] %v6884_v41  ;;  %v6888_v62 = vpop.permute.xlu0 %1742  ;;  %v4583_v41 = vld [vmem:[%s10095_s0 + $0x49] sm:$0xff] }
 0x35e   :  { %10397 = vst [vmem:[#allocation255_spill] sm:$0xff] %v6886_v11 }
 0x35f   :  { %10398 = vst [vmem:[#allocation256_spill] sm:$0xff] %v6888_v62  ;;  %v4520_v62 = vld [vmem:[%s10095_s0 + $0x50] sm:$0xff] }
 0x362   :  { %1956 = vrot.lane.b32.xlu2 %v4519_v38, %s4900_s25  ;;  %2466 = vrot.lane.b32.xlu1 %v6429_v28, %s4901_s22 }
 0x363   :  { %2210 = vrot.lane.b32.xlu0 %v4582_v8, %s4902_s9 }
 0x364   :  { %v6900_v21 = vpop.permute.xlu2 %1770  ;;  %v6902_v59 = vpop.permute.xlu1 %1750 }
 0x365   :  { %10399 = vst [vmem:[#allocation257_spill] sm:$0xff] %v6900_v21  ;;  %v6904_v11 = vpop.permute.xlu0 %1748  ;;  %v4586_v21 = vld [vmem:[%s10095_s0 + $0x69] sm:$0xff] }
 0x366   :  { %10400 = vst [vmem:[#allocation258_spill] sm:$0xff] %v6902_v59  ;;  %v4521_v59 = vld [vmem:[%s10095_s0 + $0x60] sm:$0xff] }
 0x367   :  { %10401 = vst [vmem:[#allocation259_spill] sm:$0xff] %v6904_v11  ;;  %v4584_v11 = vld [vmem:[%s10095_s0 + $0x51] sm:$0xff] }
 0x36a   :  { %1958 = vrot.lane.b32.xlu2 %v4520_v62, %s4900_s25  ;;  %2468 = vrot.lane.b32.xlu1 %v6424_v35, %s4901_s22 }
 0x36b   :  { %2212 = vrot.lane.b32.xlu0 %v4583_v41, %s4902_s9 }
 0x36c   :  { %v6916_v28 = vpop.permute.xlu2 %1776  ;;  %v6918_v38 = vpop.permute.xlu1 %1756 }
 0x36d   :  { %10402 = vst [vmem:[#allocation260_spill] sm:$0xff] %v6916_v28  ;;  %v6920_v8 = vpop.permute.xlu0 %1754  ;;  %v4585_v28 = vld [vmem:[%s10095_s0 + $0x61] sm:$0xff] }
 0x36e   :  { %10403 = vst [vmem:[#allocation261_spill] sm:$0xff] %v6920_v8  ;;  %v4522_v8 = vld [vmem:[%s10095_s0 + $0x68] sm:$0xff] }
 0x372   :  { %1960 = vrot.lane.b32.xlu2 %v4521_v59, %s4900_s25  ;;  %2470 = vrot.lane.b32.xlu1 %v6461_v25, %s4901_s22 }
 0x373   :  { %2214 = vrot.lane.b32.xlu0 %v4584_v11, %s4902_s9 }
 0x374   :  { %v6932_v35 = vpop.permute.xlu2 %1782  ;;  %v6934_v41 = vpop.permute.xlu1 %1762 }
 0x375   :  { %10404 = vst [vmem:[#allocation262_spill] sm:$0xff] %v6932_v35  ;;  %v6936_v62 = vpop.permute.xlu0 %1760  ;;  %v4533_v35 = vld [vmem:[%s10095_s0 + $0xf0] sm:$0xff] }
 0x37a   :  { %1962 = vrot.lane.b32.xlu2 %v4522_v8, %s4900_s25  ;;  %2472 = vrot.lane.b32.xlu1 %v6456_v37, %s4901_s22 }
 0x37b   :  { %2216 = vrot.lane.b32.xlu0 %v4585_v28, %s4902_s9 }
 0x37c   :  { %v6948_v25 = vpop.permute.xlu2 %1788  ;;  %v6950_v11 = vpop.permute.xlu1 %1768 }
 0x37d   :  { %10405 = vst [vmem:[#allocation263_spill] sm:$0xff] %v6948_v25  ;;  %v6952_v59 = vpop.permute.xlu0 %1766  ;;  %v4523_v25 = vld [vmem:[%s10095_s0 + $0x78] sm:$0xff] }
 0x37e   :  { %10406 = vst [vmem:[#allocation264_spill] sm:$0xff] %v6950_v11  ;;  %v4597_v11 = vld [vmem:[%s10095_s0 + $0xf1] sm:$0xff] }
 0x382   :  { %1984 = vrot.lane.b32.xlu2 %v4533_v35, %s4900_s25  ;;  %2474 = vrot.lane.b32.xlu1 %v6451_v46, %s4901_s22 }
 0x383   :  { %2218 = vrot.lane.b32.xlu0 %v4586_v21, %s4902_s9 }
 0x384   :  { %v6964_v37 = vpop.permute.xlu2 %1794  ;;  %v6966_v28 = vpop.permute.xlu1 %1774 }
 0x385   :  { %10407 = vst [vmem:[#allocation265_spill] sm:$0xff] %v6964_v37  ;;  %v6968_v8 = vpop.permute.xlu0 %1772 }
 0x386   :  { %10408 = vst [vmem:[#allocation266_spill] sm:$0xff] %v6966_v28  ;;  %v4611_v28 = vld [vmem:[%s10095_s0 + $0x199] sm:$0xff] }
 0x387   :  { %10409 = vst [vmem:[#allocation267_spill] sm:$0xff] %v6968_v8  ;;  %v4587_v8 = vld [vmem:[%s10095_s0 + $0x79] sm:$0xff] }
 0x38a   :  { %1964 = vrot.lane.b32.xlu2 %v4523_v25, %s4900_s25  ;;  %2496 = vrot.lane.b32.xlu1 %v6552_v29, %s4901_s22  ;;  %v4547_v29 = vld [vmem:[%s10095_s0 + $0x198] sm:$0xff] }
 0x38b   :  { %2240 = vrot.lane.b32.xlu0 %v4597_v11, %s4902_s9 }
 0x38c   :  { %v6980_v46 = vpop.permute.xlu2 %1800  ;;  %v6982_v21 = vpop.permute.xlu1 %1780 }
 0x38d   :  { %10410 = vst [vmem:[#allocation268_spill] sm:$0xff] %v6980_v46  ;;  %v6984_v35 = vpop.permute.xlu0 %1778  ;;  %v4675_v46 = vld [vmem:[%s10095_s0 + $0x19a] sm:$0xff] }
 0x38e   :  { %10411 = vst [vmem:[#allocation269_spill] sm:$0xff] %v6982_v21 }
 0x38f   :  { %10412 = vst [vmem:[#allocation270_spill] sm:$0xff] %v6984_v35  ;;  %v4534_v35 = vld [vmem:[%s10095_s0 + $0xf8] sm:$0xff] }
 0x392   :  { %2268 = vrot.lane.b32.xlu2 %v4611_v28, %s4902_s9  ;;  %2220 = vrot.lane.b32.xlu1 %v4587_v8, %s4902_s9 }
 0x393   :  { %2012 = vrot.lane.b32.xlu0 %v4547_v29, %s4900_s25 }
 0x394   :  { %v6998_v25 = vpop.permute.xlu2 %1806  ;;  %v7000_v11 = vpop.permute.xlu1 %1786 }
 0x395   :  { %10413 = vst [vmem:[#allocation271_spill] sm:$0xff] %v6998_v25  ;;  %v7002_v21 = vpop.permute.xlu0 %1784  ;;  %v3178_v25 = vld [vmem:[%s10096_s1 + $0x10] sm:$0xff] }
 0x396   :  { %10414 = vst [vmem:[#allocation272_spill] sm:$0xff] %v7000_v11  ;;  %v4524_v11 = vld [vmem:[%s10095_s0 + $0x80] sm:$0xff] }
 0x397   :  { %10415 = vst [vmem:[#allocation273_spill] sm:$0xff] %v7002_v21  ;;  %v4598_v21 = vld [vmem:[%s10095_s0 + $0xf9] sm:$0xff] }
 0x39a   :  { %1986 = vrot.lane.b32.xlu2 %v4534_v35, %s4900_s25  ;;  %2524 = vrot.lane.b32.xlu1 %v4675_v46, %s4901_s22 }
 0x39b   :  { %2476 = vrot.lane.b32.xlu0 %v6488_v3, %s4901_s22 }
 0x39c   :  { %v7014_v28 = vpop.permute.xlu2 %1812  ;;  %v7016_v8 = vpop.permute.xlu1 %1792 }
 0x39d   :  { %10416 = vst [vmem:[#allocation274_spill] sm:$0xff] %v7014_v28  ;;  %v7018_v29 = vpop.permute.xlu0 %1790  ;;  %v3180_v28 = vld [vmem:[%s10096_s1 + $0x20] sm:$0xf] }
 0x39e   :  { %4709 = vmatpush.msk.msra.mxu0 %vm3378_vm0, %v3180_v28  ;;  %4775 = vmatpush.msk.msra.mxu1 %vm3378_vm0, %v3180_v28 }
 0x39f   :  { %4776 = vmatpush.msk.msra.mxu2 %vm3378_vm0, %v3180_v28  ;;  %4777 = vmatpush.msk.msra.mxu3 %vm3378_vm0, %v3180_v28 }
 0x3a2   :  { %1966 = vrot.lane.b32.xlu2 %v4524_v11, %s4900_s25  ;;  %2498 = vrot.lane.b32.xlu1 %v6547_v43, %s4901_s22  ;;  %v3179_v11 = vld [vmem:[%s10096_s1 + $0x18] sm:$0xff]  ;;  %v4612_v43 = vld [vmem:[%s10095_s0 + $0x1a1] sm:$0xff] }
 0x3a3   :  { %2242 = vrot.lane.b32.xlu0 %v4598_v21, %s4902_s9  ;;  %v4588_v21 = vld [vmem:[%s10095_s0 + $0x81] sm:$0xff]  ;;  %3394 = vmatpush.msra.mxu0 %v3179_v11 }
 0x3a4   :  { %v7030_v3 = vpop.permute.xlu2 %1818  ;;  %v7032_v46 = vpop.permute.xlu1 %1798  ;;  %4778 = vmatpush.msra.mxu1 %v3179_v11  ;;  %4779 = vmatpush.msra.mxu2 %v3179_v11 }
 0x3a5   :  { %10417 = vst [vmem:[#allocation275_spill] sm:$0xff] %v7030_v3  ;;  %v7034_v35 = vpop.permute.xlu0 %1796  ;;  %v4548_v3 = vld [vmem:[%s10095_s0 + $0x1a0] sm:$0xff]  ;;  %3395 = vmatpush.msra.mxu0 %v3178_v25  ;;  %4780 = vmatpush.msra.mxu3 %v3179_v11 }
 0x3a6   :  { %10418 = vst [vmem:[#allocation276_spill] sm:$0xff] %v7032_v46  ;;  %v3177_v46 = vld [vmem:[%s10096_s1 + $0x8] sm:$0xff]  ;;  %4781 = vmatpush.msra.mxu1 %v3178_v25  ;;  %4782 = vmatpush.msra.mxu2 %v3178_v25 }
 0x3a7   :  { %10419 = vst [vmem:[#allocation277_spill] sm:$0xff] %v7034_v35  ;;  %3396 = vmatpush.msra.mxu0 %v3177_v46  ;;  %4783 = vmatpush.msra.mxu3 %v3178_v25  ;;  %v4525_v25 = vld [vmem:[%s10095_s0 + $0x90] sm:$0xff] }
 0x3a8   :  { %4784 = vmatpush.msra.mxu1 %v3177_v46  ;;  %4785 = vmatpush.msra.mxu2 %v3177_v46 }
 0x3a9   :  { %4786 = vmatpush.msra.mxu3 %v3177_v46  ;;  %v4599_v46 = vld [vmem:[%s10095_s0 + $0x109] sm:$0xff] }
 0x3aa   :  { %2270 = vrot.lane.b32.xlu2 %v4612_v43, %s4902_s9  ;;  %2222 = vrot.lane.b32.xlu1 %v4588_v21, %s4902_s9  ;;  %v3176_v43 = vld [vmem:[%s10096_s1] sm:$0xff] }
 0x3ab   :  { %2014 = vrot.lane.b32.xlu0 %v4548_v3, %s4900_s25  ;;  %v4535_v3 = vld [vmem:[%s10095_s0 + $0x108] sm:$0xff]  ;;  %3397 = vmatpush.msra.mxu0 %v3176_v43 }
 0x3ac   :  { %v7060_v35 = vpop.permute.xlu2 %1952  ;;  %v7062_v37 = vpop.permute.xlu1 %1804  ;;  %v4676_v21 = vld [vmem:[%s10095_s0 + $0x1a2] sm:$0xff]  ;;  %4787 = vmatpush.msra.mxu1 %v3176_v43  ;;  %4788 = vmatpush.msra.mxu2 %v3176_v43 }
 0x3ad   :  { %10420 = vst [vmem:[#allocation278_spill] sm:$0xff] %v7062_v37  ;;  %v7064_v28 = vpop.permute.xlu0 %1802  ;;  %4789 = vmatpush.msra.mxu3 %v3176_v43 }
 0x3ae   :  { %10421 = vst [vmem:[#allocation279_spill] sm:$0xff] %v7064_v28 }
 0x3b2   :  { %1988 = vrot.lane.b32.xlu2 %v4535_v3, %s4900_s25  ;;  %2526 = vrot.lane.b32.xlu1 %v4676_v21, %s4901_s22  ;;  %v4613_v21 = vld [vmem:[%s10095_s0 + $0x1e1] sm:$0xff] }
 0x3b3   :  { %2478 = vrot.lane.b32.xlu0 %v6483_v44, %s4901_s22 }
 0x3b4   :  { %v1955_v11 = vpop.permute.xlu2 %1954  ;;  %v7079_v37 = vpop.permute.xlu1 %1810 }
 0x3b5   :  { %10422 = vst [vmem:[#allocation280_spill] sm:$0xff] %v7079_v37  ;;  %v7081_v28 = vpop.permute.xlu0 %1808  ;;  %v4589_v37 = vld [vmem:[%s10095_s0 + $0x91] sm:$0xff] }
 0x3ba   :  { %1968 = vrot.lane.b32.xlu2 %v4525_v25, %s4900_s25  ;;  %2500 = vrot.lane.b32.xlu1 %v6581_v22, %s4901_s22  ;;  %v4549_v22 = vld [vmem:[%s10095_s0 + $0x1e0] sm:$0xff] }
 0x3bb   :  { %2244 = vrot.lane.b32.xlu0 %v4599_v46, %s4902_s9 }
 0x3bc   :  { %v7093_v44 = vpop.permute.xlu2 %1956  ;;  %v7095_v43 = vpop.permute.xlu1 %1816 }
 0x3bd   :  { %10423 = vst [vmem:[#allocation281_spill] sm:$0xff] %v7095_v43  ;;  %v7097_v3 = vpop.permute.xlu0 %1814  ;;  %v30_v43 = vld [vmem:[%s10095_s0] sm:$0xff] }
 0x3be   :  { %10424 = vst [vmem:[#allocation282_spill] sm:$0xff] %v7097_v3 }
 0x3c2   :  { %2272 = vrot.lane.b32.xlu2 %v4613_v21, %s4902_s9  ;;  %2224 = vrot.lane.b32.xlu1 %v4589_v37, %s4902_s9  ;;  %v4536_v21 = vld [vmem:[%s10095_s0 + $0x110] sm:$0xff]  ;;  %v2657_v37 = vsel %vm2656_vm1, %v30_v43, %v5141_v50  ;;  %v31_v43 = vld [vmem:[%s10095_s0 + $0x8] sm:$0xff] }
 0x3c3   :  { %2016 = vrot.lane.b32.xlu0 %v4549_v22, %s4900_s25  ;;  %v2722_v22 = vsel %vm2721_vm3, %v2657_v37, %v5517_v30 }
 0x3c4   :  { %v7111_v25 = vpop.permute.xlu2 %1958  ;;  %v7113_v46 = vpop.permute.xlu1 %1822 }
 0x3c5   :  { %10425 = vst [vmem:[#allocation283_spill] sm:$0xff] %v7113_v46  ;;  %v7118_v3 = vpop.permute.xlu0 %1820  ;;  %v2787_v46 = vsel %vm2786_vm2, %v2722_v22, %v5839_v13 }
 0x3c6   :  { %10426 = vst [vmem:[#allocation284_spill] sm:$0xff] %v7118_v3  ;;  %v2852_v3 = vsel %vm2851_vm4, %v2787_v46, %v6293_v63 }
 0x3c7   :  { %v2917_v50 = vsel %vm2916_vm6, %v2852_v3, %v6735_v24  ;;  %v4526_v24 = vld [vmem:[%s10095_s0 + $0x98] sm:$0xff]  ;;  %v2658_v3 = vsel %vm2656_vm1, %v31_v43, %v5159_v56 }
 0x3ca   :  { %1990 = vrot.lane.b32.xlu2 %v4536_v21, %s4900_s25  ;;  %2528 = vrot.lane.b32.xlu1 %v6655_v2, %s4901_s22  ;;  %v2982_v2 = vsel %vm2981_vm5, %v2917_v50, %v7060_v35  ;;  %v4600_v21 = vld [vmem:[%s10095_s0 + $0x111] sm:$0xff]  ;;  %v2723_v35 = vsel %vm2721_vm3, %v2658_v3, %v5461_v5 }
 0x3cb   :  { %2480 = vrot.lane.b32.xlu0 %v6478_v31, %s4901_s22  ;;  %v2788_v37 = vsel %vm2786_vm2, %v2723_v35, %v5915_v39 }
 0x3cc   :  { %v7138_v30 = vpop.permute.xlu2 %1960  ;;  %v2465_v13 = vpop.permute.xlu1 %2464  ;;  %v2853_v56 = vsel %vm2851_vm4, %v2788_v37, %v6291_v32  ;;  %v4590_v32 = vld [vmem:[%s10095_s0 + $0x99] sm:$0xff] }
 0x3cd   :  { %v2209_v63 = vpop.permute.xlu0 %2208  ;;  %v2918_v22 = vsel %vm2916_vm6, %v2853_v56, %v6667_v57  ;;  %v4809_v57 = vld [vmem:[%s10095_s0 + $0x18] sm:$0xff]  ;;  %v4810_v56 = vld [vmem:[%s10095_s0 + $0x20] sm:$0xff] }
 0x3ce   :  { %v3047_v46 = vsel %vm3046_vm7, %v2982_v2, %v2209_v63  ;;  %v2983_v5 = vsel %vm2981_vm5, %v2918_v22, %v1955_v11  ;;  %v2659_v11 = vsel %vm2656_vm1, %v4809_v57, %v5139_v49  ;;  %v4550_v63 = vld [vmem:[%s10095_s0 + $0x1e8] sm:$0xff] }
 0x3cf   :  { %v3112_v31 = vsel %vm3111_vm8, %v3047_v46, %v2465_v13  ;;  %v2724_v46 = vsel %vm2721_vm3, %v2659_v11, %v5537_v45 }
 0x3d0   :  { %4710 = vmatmul.msk.f32.vlgmr.msra.gmra.mxu0 %vm3185_vm9, %v3112_v31  ;;  %v2789_v31 = vsel %vm2786_vm2, %v2724_v46, %v5913_v19 }
 0x3d2   :  { %1970 = vrot.lane.b32.xlu2 %v4526_v24, %s4900_s25  ;;  %2502 = vrot.lane.b32.xlu1 %v6576_v0, %s4901_s22  ;;  %v4614_v0 = vld [vmem:[%s10095_s0 + $0x1e9] sm:$0xff]  ;;  %v2854_v24 = vsel %vm2851_vm4, %v2789_v31, %v6235_v6  ;;  %v4537_v6 = vld [vmem:[%s10095_s0 + $0x120] sm:$0xff] }
 0x3d3   :  { %2246 = vrot.lane.b32.xlu0 %v4600_v21, %s4902_s9  ;;  %v2919_v49 = vsel %vm2916_vm6, %v2854_v24, %v6755_v60  ;;  %v2660_v60 = vsel %vm2656_vm1, %v4810_v56, %v5157_v55  ;;  %v4551_v31 = vld [vmem:[%s10095_s0 + $0x1f8] sm:$0xff] }
 0x3d4   :  { %v7168_v50 = vpop.permute.xlu2 %1962  ;;  %v2467_v13 = vpop.permute.xlu1 %2466  ;;  %v2984_v45 = vsel %vm2981_vm5, %v2919_v49, %v7093_v44  ;;  %v2725_v44 = vsel %vm2721_vm3, %v2660_v60, %v5535_v53 }
 0x3d5   :  { %v2211_v43 = vpop.permute.xlu0 %2210  ;;  %v2790_v22 = vsel %vm2786_vm2, %v2725_v44, %v5857_v20 }
 0x3d6   :  { %v3048_v39 = vsel %vm3046_vm7, %v2983_v5, %v2211_v43 }
 0x3d7   :  { %v3113_v2 = vsel %vm3111_vm8, %v3048_v39, %v2467_v13  ;;  %v2855_v13 = vsel %vm2851_vm4, %v2790_v22, %v6311_v33  ;;  %v4527_v33 = vld [vmem:[%s10095_s0 + $0xa8] sm:$0xff] }
 0x3d8   :  { %4711 = vmatmul.msk.f32.gmra.mxu0 %vm3185_vm9, %v3113_v2  ;;  %v2920_v55 = vsel %vm2916_vm6, %v2855_v13, %v6753_v48 }
 0x3d9   :  { %v2985_v20 = vsel %vm2981_vm5, %v2920_v55, %v7111_v25  ;;  %v4601_v25 = vld [vmem:[%s10095_s0 + $0x121] sm:$0xff] }
 0x3da   :  { %2274 = vrot.lane.b32.xlu2 %v4614_v0, %s4902_s9  ;;  %2226 = vrot.lane.b32.xlu1 %v4590_v32, %s4902_s9 }
 0x3db   :  { %2018 = vrot.lane.b32.xlu0 %v4550_v63, %s4900_s25 }
 0x3dc   :  { %v7199_v3 = vpop.permute.xlu2 %1984  ;;  %v2469_v21 = vpop.permute.xlu1 %2468 }
 0x3dd   :  { %v2213_v35 = vpop.permute.xlu0 %2212 }
 0x3de   :  { %v3049_v19 = vsel %vm3046_vm7, %v2984_v45, %v2213_v35 }
 0x3df   :  { %v3114_v37 = vsel %vm3111_vm8, %v3049_v19, %v2469_v21 }
 0x3e0   :  { %4712 = vmatmul.msk.f32.gmra.mxu0 %vm3185_vm9, %v3114_v37 }
 0x3e2   :  { %1992 = vrot.lane.b32.xlu2 %v4537_v6, %s4900_s25  ;;  %2530 = vrot.lane.b32.xlu1 %v6686_v47, %s4901_s22 }
 0x3e3   :  { %2482 = vrot.lane.b32.xlu0 %v6513_v14, %s4901_s22  ;;  %v4811_v14 = vld [vmem:[%s10095_s0 + $0x30] sm:$0xff] }
 0x3e4   :  { %v7227_v5 = vpop.permute.xlu2 %1964  ;;  %v2471_v53 = vpop.permute.xlu1 %2470  ;;  %v2661_v48 = vsel %vm2656_vm1, %v4811_v14, %v5095_v36  ;;  %v10429_v14 = vld [vmem:[#allocation10_spill] sm:$0xff] }
 0x3e5   :  { %v2215_v43 = vpop.permute.xlu0 %2214  ;;  %v2726_v2 = vsel %vm2721_vm3, %v2661_v48, %v5479_v58 }
 0x3e6   :  { %v3050_v39 = vsel %vm3046_vm7, %v2985_v20, %v2215_v43  ;;  %v2791_v0 = vsel %vm2786_vm2, %v2726_v2, %v5933_v9  ;;  %v10427_v20 = vld [vmem:[#allocation87_spill] sm:$0xff] }
 0x3e7   :  { %v3115_v47 = vsel %vm3111_vm8, %v3050_v39, %v2471_v53  ;;  %v2856_v36 = vsel %vm2851_vm4, %v2791_v0, %v6309_v23  ;;  %v4591_v23 = vld [vmem:[%s10095_s0 + $0xa9] sm:$0xff]  ;;  %v10431_v0 = vld [vmem:[#allocation64_spill] sm:$0xff] }
 0x3e8   :  { %4713 = vmatmul.msk.f32.gmra.mxu0 %vm3185_vm9, %v3115_v47  ;;  %v2921_v32 = vsel %vm2916_vm6, %v2856_v36, %v6694_v10  ;;  %v4812_v10 = vld [vmem:[%s10095_s0 + $0x38] sm:$0xff]  ;;  %v10428_v47 = vld [vmem:[#allocation133_spill] sm:$0xff]  ;;  %v4528_v2 = vld [vmem:[%s10095_s0 + $0xb0] sm:$0xff] }
 0x3e9   :  { %v2986_v58 = vsel %vm2981_vm5, %v2921_v32, %v7138_v30  ;;  %v2662_v30 = vsel %vm2656_vm1, %v4812_v10, %v5109_v40  ;;  %v10435_v10 = vld [vmem:[#allocation238_spill] sm:$0xff] }
 0x3ea   :  { %1972 = vrot.lane.b32.xlu2 %v4527_v33, %s4900_s25  ;;  %2504 = vrot.lane.b32.xlu1 %v6571_v42, %s4901_s22  ;;  %v4615_v42 = vld [vmem:[%s10095_s0 + $0x1f9] sm:$0xff]  ;;  %v2727_v24 = vsel %vm2721_vm3, %v2662_v30, %v5555_v18  ;;  %v4815_v33 = vld [vmem:[%s10095_s0 + $0x48] sm:$0xff] }
 0x3eb   :  { %2248 = vrot.lane.b32.xlu0 %v4601_v25, %s4902_s9  ;;  %v2792_v49 = vsel %vm2786_vm2, %v2727_v24, %v5931_v12  ;;  %v2663_v48 = vsel %vm2656_vm1, %v4815_v33, %v10429_v14  ;;  %v10430_v25 = vld [vmem:[#allocation203_spill] sm:$0xff]  ;;  %v10443_v33 = vld [vmem:[#allocation77_spill] sm:$0xff] }
 0x3ec   :  { %v7257_v57 = vpop.permute.xlu2 %2268  ;;  %v2473_v11 = vpop.permute.xlu1 %2472  ;;  %v2857_v21 = vsel %vm2851_vm4, %v2792_v49, %v6253_v54  ;;  %v4813_v54 = vld [vmem:[%s10095_s0 + $0xc0] sm:$0xff]  ;;  %v2728_v36 = vsel %vm2721_vm3, %v2663_v48, %v10431_v0 }
 0x3ed   :  { %v2217_v9 = vpop.permute.xlu0 %2216  ;;  %v2922_v40 = vsel %vm2916_vm6, %v2857_v21, %v6776_v27  ;;  %v2673_v6 = vsel %vm2656_vm1, %v4813_v54, %v5229_v15  ;;  %v4564_v27 = vld [vmem:[%s10095_s0 + $0x290] sm:$0xff]  ;;  %v4552_v54 = vld [vmem:[%s10095_s0 + $0x200] sm:$0xff] }
 0x3ee   :  { %v3051_v63 = vsel %vm3046_vm7, %v2986_v58, %v2217_v9  ;;  %v2987_v18 = vsel %vm2981_vm5, %v2922_v40, %v7168_v50  ;;  %v2738_v50 = vsel %vm2721_vm3, %v2673_v6, %v5551_v1  ;;  %v10432_v58 = vld [vmem:[#allocation114_spill] sm:$0xff]  ;;  %v10437_v6 = vld [vmem:[#allocation76_spill] sm:$0xff]  ;;  %v10445_v0 = vld [vmem:[#allocation9_spill] sm:$0xff] }
 0x3ef   :  { %v3116_v46 = vsel %vm3111_vm8, %v3051_v63, %v2473_v11  ;;  %v2803_v56 = vsel %vm2786_vm2, %v2738_v50, %v6005_v17  ;;  %v4602_v11 = vld [vmem:[%s10095_s0 + $0x129] sm:$0xff]  ;;  %v2793_v9 = vsel %vm2786_vm2, %v2728_v36, %v10432_v58  ;;  %v10438_v50 = vld [vmem:[#allocation132_spill] sm:$0xff] }
 0x3f0   :  { %4714 = vmatmul.msk.f32.gmra.mxu0 %vm3185_vm9, %v3116_v46  ;;  %v2868_v15 = vsel %vm2851_vm4, %v2803_v56, %v6381_v34  ;;  %v4628_v34 = vld [vmem:[%s10095_s0 + $0x291] sm:$0xff] }
 0x3f1   :  { %v2933_v60 = vsel %vm2916_vm6, %v2868_v15, %v6772_v51  ;;  %v4814_v51 = vld [vmem:[%s10095_s0 + $0x168] sm:$0xff]  ;;  %v10433_v46 = vld [vmem:[#allocation180_spill] sm:$0xff] }
 0x3f2   :  { %2276 = vrot.lane.b32.xlu2 %v4615_v42, %s4902_s9  ;;  %2228 = vrot.lane.b32.xlu1 %v4591_v23, %s4902_s9  ;;  %v2998_v17 = vsel %vm2981_vm5, %v2933_v60, %v7199_v3  ;;  %v2687_v3 = vsel %vm2656_vm1, %v4814_v51, %v5321_v52  ;;  %v2858_v42 = vsel %vm2851_vm4, %v2793_v9, %v10433_v46  ;;  %v10434_v23 = vld [vmem:[#allocation216_spill] sm:$0xff]  ;;  %v10439_v15 = vld [vmem:[#allocation178_spill] sm:$0xff] }
 0x3f3   :  { %2020 = vrot.lane.b32.xlu0 %v4551_v31, %s4900_s25  ;;  %v2752_v43 = vsel %vm2721_vm3, %v2687_v3, %v10427_v20  ;;  %v4656_v3 = vld [vmem:[%s10095_s0 + $0xb2] sm:$0xff]  ;;  %v10447_v9 = vld [vmem:[#allocation58_spill] sm:$0xff] }
 0x3f4   :  { %v7289_v45 = vpop.permute.xlu2 %1986  ;;  %v2475_v35 = vpop.permute.xlu1 %2474  ;;  %v10441_v20 = vld [vmem:[#allocation228_spill] sm:$0xff] }
 0x3f5   :  { %v2219_v19 = vpop.permute.xlu0 %2218  ;;  %v4539_v58 = vld [vmem:[%s10095_s0 + $0x138] sm:$0xff] }
 0x3f6   :  { %v3052_v12 = vsel %vm3046_vm7, %v2987_v18, %v2219_v19  ;;  %v4592_v19 = vld [vmem:[%s10095_s0 + $0xb1] sm:$0xff] }
 0x3f7   :  { %v3117_v37 = vsel %vm3111_vm8, %v3052_v12, %v2475_v35  ;;  %v10436_v12 = vld [vmem:[#allocation8_spill] sm:$0xff] }
 0x3f8   :  { %4715 = vmatmul.msk.f32.gmra.mxu0 %vm3185_vm9, %v3117_v37 }
 0x3fa   :  { %2532 = vrot.lane.b32.xlu2 %v6681_v4, %s4901_s22  ;;  %2484 = vrot.lane.b32.xlu1 %v6508_v26, %s4901_s22  ;;  %v4538_v26 = vld [vmem:[%s10095_s0 + $0x128] sm:$0xff] }
 0x3fb   :  { %2046 = vrot.lane.b32.xlu0 %v4564_v27, %s4900_s25 }
 0x3fc   :  { %v7317_v44 = vpop.permute.xlu2 %1966  ;;  %v2497_v1 = vpop.permute.xlu1 %2496 }
 0x3fd   :  { %v2241_v22 = vpop.permute.xlu0 %2240 }
 0x3fe   :  { %v3063_v4 = vsel %vm3046_vm7, %v2998_v17, %v2241_v22 }
 0x3ff   :  { %v3128_v13 = vsel %vm3111_vm8, %v3063_v4, %v2497_v1  ;;  %v10440_v1 = vld [vmem:[#allocation252_spill] sm:$0xff] }
 0x400   :  { %4726 = vmatmul.msk.f32.vlgmr.msra.gmra.mxu1 %vm3185_vm9, %v3128_v13 }
 0x402   :  { %2558 = vrot.lane.b32.xlu2 %v6760_v61, %s4901_s22  ;;  %1994 = vrot.lane.b32.xlu1 %v4538_v26, %s4900_s25  ;;  %v2817_v61 = vsel %vm2786_vm2, %v2752_v43, %v10428_v47  ;;  %v10442_v43 = vld [vmem:[#allocation32_spill] sm:$0xff] }
 0x403   :  { %2302 = vrot.lane.b32.xlu0 %v4628_v34, %s4902_s9  ;;  %v2882_v52 = vsel %vm2851_vm4, %v2817_v61, %v10430_v25  ;;  %v10444_v25 = vld [vmem:[#allocation147_spill] sm:$0xff] }
 0x404   :  { %v7339_v55 = vpop.permute.xlu2 %2270  ;;  %v2221_v53 = vpop.permute.xlu1 %2220  ;;  %v2947_v32 = vsel %vm2916_vm6, %v2882_v52, %v6918_v38  ;;  %v2923_v38 = vsel %vm2916_vm6, %v2858_v42, %v10435_v10  ;;  %v4629_v42 = vld [vmem:[%s10095_s0 + $0x2a1] sm:$0xff] }
 0x405   :  { %v2013_v39 = vpop.permute.xlu0 %2012  ;;  %v2988_v30 = vsel %vm2981_vm5, %v2923_v38, %v7227_v5  ;;  %v4616_v5 = vld [vmem:[%s10095_s0 + $0x201] sm:$0xff] }
 0x406   :  { %v3012_v63 = vsel %vm2981_vm5, %v2947_v32, %v2013_v39  ;;  %v3053_v21 = vsel %vm3046_vm7, %v2988_v30, %v2221_v53  ;;  %v4565_v53 = vld [vmem:[%s10095_s0 + $0x2a0] sm:$0xff]  ;;  %v10446_v32 = vld [vmem:[#allocation202_spill] sm:$0xff]  ;;  %v10449_v30 = vld [vmem:[#allocation179_spill] sm:$0xff] }
 0x407   :  { %v3077_v49 = vsel %vm3046_vm7, %v3012_v63, %v7257_v57  ;;  %v4816_v57 = vld [vmem:[%s10095_s0 + $0xc8] sm:$0xff] }
 0x408   :  { %v2674_v37 = vsel %vm2656_vm1, %v4816_v57, %v10436_v12 }
 0x409   :  { %v2739_v27 = vsel %vm2721_vm3, %v2674_v37, %v10437_v6  ;;  %v10452_v6 = vld [vmem:[#allocation21_spill] sm:$0xff] }
 0x40a   :  { %1974 = vrot.lane.b32.xlu2 %v4528_v2, %s4900_s25  ;;  %2506 = vrot.lane.b32.xlu1 %v10434_v23, %s4901_s22  ;;  %v2804_v56 = vsel %vm2786_vm2, %v2739_v27, %v10438_v50  ;;  %v4818_v2 = vld [vmem:[%s10095_s0 + $0x50] sm:$0xff]  ;;  %v10448_v23 = vld [vmem:[#allocation124_spill] sm:$0xff] }
 0x40b   :  { %2250 = vrot.lane.b32.xlu0 %v4602_v11, %s4902_s9  ;;  %v2869_v60 = vsel %vm2851_vm4, %v2804_v56, %v10439_v15  ;;  %v2664_v36 = vsel %vm2656_vm1, %v4818_v2, %v10445_v0  ;;  %v4603_v50 = vld [vmem:[%s10095_s0 + $0x139] sm:$0xff]  ;;  %v10453_v56 = vld [vmem:[#allocation75_spill] sm:$0xff] }
 0x40c   :  { %v7375_v31 = vpop.permute.xlu2 %1988  ;;  %v2525_v24 = vpop.permute.xlu1 %2524  ;;  %v2934_v17 = vsel %vm2916_vm6, %v2869_v60, %v10440_v1  ;;  %v2729_v63 = vsel %vm2721_vm3, %v2664_v36, %v10447_v9  ;;  %v10454_v60 = vld [vmem:[#allocation122_spill] sm:$0xff] }
 0x40d   :  { %v2477_v40 = vpop.permute.xlu0 %2476  ;;  %v3142_v35 = vsel %vm3111_vm8, %v3077_v49, %v2525_v24  ;;  %v2999_v13 = vsel %vm2981_vm5, %v2934_v17, %v7289_v45  ;;  %v4817_v45 = vld [vmem:[%s10095_s0 + $0x170] sm:$0xff]  ;;  %v2794_v10 = vsel %vm2786_vm2, %v2729_v63, %v10448_v23  ;;  %v10450_v49 = vld [vmem:[#allocation240_spill] sm:$0xff]  ;;  %v10459_v36 = vld [vmem:[#allocation146_spill] sm:$0xff] }
 0x40e   :  { %v3118_v18 = vsel %vm3111_vm8, %v3053_v21, %v2477_v40  ;;  %4740 = vmatmul.msk.f32.vlgmr.msra.gmra.mxu2 %vm3185_vm9, %v3142_v35  ;;  %v2688_v39 = vsel %vm2656_vm1, %v4817_v45, %v10442_v43  ;;  %v2859_v24 = vsel %vm2851_vm4, %v2794_v10, %v10449_v30  ;;  %v10451_v21 = vld [vmem:[#allocation232_spill] sm:$0xff]  ;;  %v10455_v17 = vld [vmem:[#allocation191_spill] sm:$0xff]  ;;  %v4566_v30 = vld [vmem:[%s10095_s0 + $0x2a8] sm:$0xff] }
 0x40f   :  { %4716 = vmatmul.msk.f32.gmra.mxu0 %vm3185_vm9, %v3118_v18  ;;  %v2753_v14 = vsel %vm2721_vm3, %v2688_v39, %v10443_v33  ;;  %v4617_v43 = vld [vmem:[%s10095_s0 + $0x211] sm:$0xff]  ;;  %v4593_v39 = vld [vmem:[%s10095_s0 + $0xc1] sm:$0xff] }
 0x410   :  { %v2818_v52 = vsel %vm2786_vm2, %v2753_v14, %v10444_v25  ;;  %v10457_v33 = vld [vmem:[#allocation22_spill] sm:$0xff]  ;;  %v10461_v63 = vld [vmem:[#allocation192_spill] sm:$0xff]  ;;  %v10462_v23 = vld [vmem:[#allocation67_spill] sm:$0xff] }
 0x411   :  { %v2883_v11 = vsel %vm2851_vm4, %v2818_v52, %v10446_v32  ;;  %v10458_v52 = vld [vmem:[#allocation91_spill] sm:$0xff] }
 0x412   :  { %2278 = vrot.lane.b32.xlu2 %v4616_v5, %s4902_s9  ;;  %2230 = vrot.lane.b32.xlu1 %v4592_v19, %s4902_s9  ;;  %v2948_v46 = vsel %vm2916_vm6, %v2883_v11, %v6868_v7  ;;  %v2924_v7 = vsel %vm2916_vm6, %v2859_v24, %v10451_v21  ;;  %v4820_v11 = vld [vmem:[%s10095_s0 + $0x60] sm:$0xff]  ;;  %v10463_v24 = vld [vmem:[#allocation123_spill] sm:$0xff] }
 0x413   :  { %2022 = vrot.lane.b32.xlu0 %v4552_v54, %s4900_s25  ;;  %v2989_v40 = vsel %vm2981_vm5, %v2924_v7, %v7317_v44  ;;  %v4529_v44 = vld [vmem:[%s10095_s0 + $0xc0] sm:$0xff] }
 0x414   :  { %v7409_v22 = vpop.permute.xlu2 %1968  ;;  %v2499_v4 = vpop.permute.xlu1 %2498  ;;  %v4667_v54 = vld [vmem:[%s10095_s0 + $0x13a] sm:$0xff] }
 0x415   :  { %v2243_v26 = vpop.permute.xlu0 %2242  ;;  %v10464_v7 = vld [vmem:[#allocation173_spill] sm:$0xff] }
 0x416   :  { %v3064_v34 = vsel %vm3046_vm7, %v2999_v13, %v2243_v26  ;;  %v10456_v13 = vld [vmem:[#allocation251_spill] sm:$0xff] }
 0x417   :  { %v3129_v51 = vsel %vm3111_vm8, %v3064_v34, %v2499_v4 }
 0x418   :  { %4727 = vmatmul.msk.f32.gmra.mxu1 %vm3185_vm9, %v3129_v51 }
 0x41a   :  { %2534 = vrot.lane.b32.xlu2 %v10441_v20, %s4901_s22  ;;  %2486 = vrot.lane.b32.xlu1 %v4656_v3, %s4901_s22 }
 0x41b   :  { %2048 = vrot.lane.b32.xlu0 %v4565_v53, %s4900_s25 }
 0x41c   :  { %v7431_v47 = vpop.permute.xlu2 %2272  ;;  %v2223_v61 = vpop.permute.xlu1 %2222 }
 0x41d   :  { %v2015_v48 = vpop.permute.xlu0 %2014  ;;  %v3054_v19 = vsel %vm3046_vm7, %v2989_v40, %v2223_v61  ;;  %v4553_v61 = vld [vmem:[%s10095_s0 + $0x210] sm:$0xff] }
 0x41e   :  { %v3013_v38 = vsel %vm2981_vm5, %v2948_v46, %v2015_v48 }
 0x41f   :  { %v3078_v5 = vsel %vm3046_vm7, %v3013_v38, %v7339_v55  ;;  %v4819_v55 = vld [vmem:[%s10095_s0 + $0xd8] sm:$0xff] }
 0x420   :  { %v2675_v27 = vsel %vm2656_vm1, %v4819_v55, %v10452_v6 }
 0x421   :  { %v2740_v15 = vsel %vm2721_vm3, %v2675_v27, %v10453_v56  ;;  %v4821_v27 = vld [vmem:[%s10095_s0 + $0xe0] sm:$0xff]  ;;  %v4630_v56 = vld [vmem:[%s10095_s0 + $0x2a9] sm:$0xff] }
 0x422   :  { %2560 = vrot.lane.b32.xlu2 %v10450_v49, %s4901_s22  ;;  %1996 = vrot.lane.b32.xlu1 %v4539_v58, %s4900_s25  ;;  %v2805_v1 = vsel %vm2786_vm2, %v2740_v15, %v10454_v60  ;;  %v10460_v58 = vld [vmem:[#allocation5_spill] sm:$0xff] }
 0x423   :  { %2304 = vrot.lane.b32.xlu0 %v4629_v42, %s4902_s9  ;;  %v2870_v4 = vsel %vm2851_vm4, %v2805_v1, %v10455_v17  ;;  %v2665_v9 = vsel %vm2656_vm1, %v4820_v11, %v10460_v58  ;;  %v4657_v42 = vld [vmem:[%s10095_s0 + $0xc2] sm:$0xff]  ;;  %v10469_v1 = vld [vmem:[#allocation135_spill] sm:$0xff]  ;;  %v10475_v58 = vld [vmem:[#allocation136_spill] sm:$0xff] }
 0x424   :  { %v7467_v35 = vpop.permute.xlu2 %1990  ;;  %v2527_v18 = vpop.permute.xlu1 %2526  ;;  %v2935_v26 = vsel %vm2916_vm6, %v2870_v4, %v10456_v13  ;;  %v2730_v10 = vsel %vm2721_vm3, %v2665_v9, %v10462_v23  ;;  %v10468_v15 = vld [vmem:[#allocation65_spill] sm:$0xff]  ;;  %v10470_v4 = vld [vmem:[#allocation239_spill] sm:$0xff]  ;;  %v10471_v13 = vld [vmem:[#allocation190_spill] sm:$0xff] }
 0x425   :  { %v2479_v57 = vpop.permute.xlu0 %2478  ;;  %v3143_v12 = vsel %vm3111_vm8, %v3078_v5, %v2527_v18  ;;  %v3000_v3 = vsel %vm2981_vm5, %v2935_v26, %v7375_v31  ;;  %v62_v31 = vld [vmem:[%s10095_s0 + $0x1b0] sm:$0xff]  ;;  %v2795_v49 = vsel %vm2786_vm2, %v2730_v10, %v10463_v24  ;;  %v10477_v23 = vld [vmem:[#allocation206_spill] sm:$0xff] }
 0x426   :  { %v3119_v37 = vsel %vm3111_vm8, %v3054_v19, %v2479_v57  ;;  %4741 = vmatmul.msk.f32.gmra.mxu2 %vm3185_vm9, %v3143_v12  ;;  %v2689_v14 = vsel %vm2656_vm1, %v62_v31, %v10457_v33  ;;  %v2860_v40 = vsel %vm2851_vm4, %v2795_v49, %v10464_v7  ;;  %v10465_v18 = vld [vmem:[#allocation231_spill] sm:$0xff]  ;;  %v4530_v31 = vld [vmem:[%s10095_s0 + $0xc8] sm:$0xff]  ;;  %v4554_v7 = vld [vmem:[%s10095_s0 + $0x218] sm:$0xff] }
 0x427   :  { %4717 = vmatmul.msk.f32.gmra.mxu0 %vm3185_vm9, %v3119_v37  ;;  %v2754_v2 = vsel %vm2721_vm3, %v2689_v14, %v10458_v52  ;;  %v10466_v5 = vld [vmem:[#allocation243_spill] sm:$0xff]  ;;  %v4668_v33 = vld [vmem:[%s10095_s0 + $0x142] sm:$0xff] }
 0x428   :  { %v2819_v32 = vsel %vm2786_vm2, %v2754_v2, %v10459_v36  ;;  %v4604_v14 = vld [vmem:[%s10095_s0 + $0x141] sm:$0xff] }
 0x429   :  { %v2884_v46 = vsel %vm2851_vm4, %v2819_v32, %v10461_v63  ;;  %v10474_v36 = vld [vmem:[#allocation90_spill] sm:$0xff] }
 0x42a   :  { %1976 = vrot.lane.b32.xlu2 %v4529_v44, %s4900_s25  ;;  %2508 = vrot.lane.b32.xlu1 %v4667_v54, %s4901_s22  ;;  %v2949_v38 = vsel %vm2916_vm6, %v2884_v46, %v6936_v62  ;;  %v2925_v62 = vsel %vm2916_vm6, %v2860_v40, %v10466_v5  ;;  %v4822_v63 = vld [vmem:[%s10095_s0 + $0x68] sm:$0xff]  ;;  %v10476_v46 = vld [vmem:[#allocation13_spill] sm:$0xff] }
 0x42b   :  { %2252 = vrot.lane.b32.xlu0 %v4603_v50, %s4902_s9  ;;  %v2990_v19 = vsel %vm2981_vm5, %v2925_v62, %v7409_v22  ;;  %v4540_v22 = vld [vmem:[%s10095_s0 + $0x140] sm:$0xff]  ;;  %v10478_v24 = vld [vmem:[#allocation66_spill] sm:$0xff]  ;;  %v10480_v62 = vld [vmem:[#allocation183_spill] sm:$0xff] }
 0x42c   :  { %v7501_v34 = vpop.permute.xlu2 %1970  ;;  %v2501_v51 = vpop.permute.xlu1 %2500  ;;  %v10479_v40 = vld [vmem:[#allocation117_spill] sm:$0xff] }
 0x42d   :  { %v2245_v53 = vpop.permute.xlu0 %2244 }
 0x42e   :  { %v3065_v20 = vsel %vm3046_vm7, %v3000_v3, %v2245_v53 }
 0x42f   :  { %v3130_v45 = vsel %vm3111_vm8, %v3065_v20, %v2501_v51  ;;  %v10472_v51 = vld [vmem:[#allocation241_spill] sm:$0xff] }
 0x430   :  { %4728 = vmatmul.msk.f32.gmra.mxu1 %vm3185_vm9, %v3130_v45 }
 0x432   :  { %2280 = vrot.lane.b32.xlu2 %v4617_v43, %s4902_s9  ;;  %2232 = vrot.lane.b32.xlu1 %v4593_v39, %s4902_s9 }
 0x433   :  { %2024 = vrot.lane.b32.xlu0 %v4553_v61, %s4900_s25 }
 0x434   :  { %v7525_v48 = vpop.permute.xlu2 %2274  ;;  %v2225_v25 = vpop.permute.xlu1 %2224 }
 0x435   :  { %v2017_v0 = vpop.permute.xlu0 %2016  ;;  %v3055_v44 = vsel %vm3046_vm7, %v2990_v19, %v2225_v25  ;;  %v10473_v25 = vld [vmem:[#allocation35_spill] sm:$0xff] }
 0x436   :  { %v3014_v21 = vsel %vm2981_vm5, %v2949_v38, %v2017_v0  ;;  %v4618_v38 = vld [vmem:[%s10095_s0 + $0x219] sm:$0xff] }
 0x437   :  { %v3079_v37 = vsel %vm3046_vm7, %v3014_v21, %v7431_v47  ;;  %v10467_v47 = vld [vmem:[#allocation20_spill] sm:$0xff] }
 0x438   :  { %v2676_v50 = vsel %vm2656_vm1, %v4821_v27, %v10467_v47 }
 0x439   :  { %v2741_v60 = vsel %vm2721_vm3, %v2676_v50, %v10468_v15  ;;  %v4658_v50 = vld [vmem:[%s10095_s0 + $0xca] sm:$0xff] }
 0x43a   :  { %2536 = vrot.lane.b32.xlu2 %v10465_v18, %s4901_s22  ;;  %2488 = vrot.lane.b32.xlu1 %v4657_v42, %s4901_s22  ;;  %v2806_v17 = vsel %vm2786_vm2, %v2741_v60, %v10469_v1  ;;  %v2666_v42 = vsel %vm2656_vm1, %v4822_v63, %v10476_v46  ;;  %v4567_v60 = vld [vmem:[%s10095_s0 + $0x2b8] sm:$0xff]  ;;  %v10483_v1 = vld [vmem:[#allocation79_spill] sm:$0xff]  ;;  %v10490_v46 = vld [vmem:[#allocation254_spill] sm:$0xff] }
 0x43b   :  { %2050 = vrot.lane.b32.xlu0 %v4566_v30, %s4900_s25  ;;  %v2871_v26 = vsel %vm2851_vm4, %v2806_v17, %v10471_v13  ;;  %v4594_v30 = vld [vmem:[%s10095_s0 + $0xc9] sm:$0xff]  ;;  %v2731_v49 = vsel %vm2721_vm3, %v2666_v42, %v10478_v24 }
 0x43c   :  { %v7561_v57 = vpop.permute.xlu2 %1992  ;;  %v2529_v12 = vpop.permute.xlu1 %2528  ;;  %v2936_v3 = vsel %vm2916_vm6, %v2871_v26, %v10472_v51  ;;  %v2796_v18 = vsel %vm2786_vm2, %v2731_v49, %v10479_v40  ;;  %v10485_v26 = vld [vmem:[#allocation181_spill] sm:$0xff]  ;;  %v4531_v40 = vld [vmem:[%s10095_s0 + $0xd8] sm:$0xff] }
 0x43d   :  { %v2481_v54 = vpop.permute.xlu0 %2480  ;;  %v3144_v55 = vsel %vm3111_vm8, %v3079_v37, %v2529_v12  ;;  %v3001_v45 = vsel %vm2981_vm5, %v2936_v3, %v7467_v35  ;;  %v63_v35 = vld [vmem:[%s10095_s0 + $0x1b8] sm:$0xff]  ;;  %v2861_v19 = vsel %vm2851_vm4, %v2796_v18, %v10480_v62  ;;  %v10481_v12 = vld [vmem:[#allocation242_spill] sm:$0xff]  ;;  %v10492_v49 = vld [vmem:[#allocation61_spill] sm:$0xff] }
 0x43e   :  { %v3120_v6 = vsel %vm3111_vm8, %v3055_v44, %v2481_v54  ;;  %4742 = vmatmul.msk.f32.gmra.mxu2 %vm3185_vm9, %v3144_v55  ;;  %v2690_v52 = vsel %vm2656_vm1, %v63_v35, %v10473_v25  ;;  %v2926_v37 = vsel %vm2916_vm6, %v2861_v19, %v10481_v12  ;;  %v10486_v35 = vld [vmem:[#allocation34_spill] sm:$0xff]  ;;  %v4669_v18 = vld [vmem:[%s10095_s0 + $0x152] sm:$0xff] }
 0x43f   :  { %4718 = vmatmul.msk.f32.gmra.mxu0 %vm3185_vm9, %v3120_v6  ;;  %v2755_v32 = vsel %vm2721_vm3, %v2690_v52, %v10474_v36  ;;  %v10487_v52 = vld [vmem:[#allocation80_spill] sm:$0xff]  ;;  %v10488_v36 = vld [vmem:[#allocation150_spill] sm:$0xff] }
 0x440   :  { %v2820_v9 = vsel %vm2786_vm2, %v2755_v32, %v10475_v58  ;;  %v4605_v12 = vld [vmem:[%s10095_s0 + $0x151] sm:$0xff] }
 0x441   :  { %v2885_v10 = vsel %vm2851_vm4, %v2820_v9, %v10477_v23 }
 0x442   :  { %2562 = vrot.lane.b32.xlu2 %v10470_v4, %s4901_s22  ;;  %1998 = vrot.lane.b32.xlu1 %v4540_v22, %s4900_s25  ;;  %v2950_v21 = vsel %vm2916_vm6, %v2885_v10, %v6934_v41  ;;  %v2991_v41 = vsel %vm2981_vm5, %v2926_v37, %v7501_v34  ;;  %v4682_v34 = vld [vmem:[%s10095_s0 + $0x21a] sm:$0xff]  ;;  %v10484_v4 = vld [vmem:[#allocation134_spill] sm:$0xff] }
 0x443   :  { %2306 = vrot.lane.b32.xlu0 %v4630_v56, %s4902_s9  ;;  %v10482_v56 = vld [vmem:[#allocation11_spill] sm:$0xff]  ;;  %v4825_v10 = vld [vmem:[%s10095_s0 + $0x78] sm:$0xff]  ;;  %v10494_v37 = vld [vmem:[#allocation182_spill] sm:$0xff] }
 0x444   :  { %v7593_v53 = vpop.permute.xlu2 %1972  ;;  %v2503_v20 = vpop.permute.xlu1 %2502 }
 0x445   :  { %v2247_v43 = vpop.permute.xlu0 %2246 }
 0x446   :  { %v3066_v39 = vsel %vm3046_vm7, %v3001_v45, %v2247_v43 }
 0x447   :  { %v3131_v61 = vsel %vm3111_vm8, %v3066_v39, %v2503_v20 }
 0x448   :  { %4729 = vmatmul.msk.f32.gmra.mxu1 %vm3185_vm9, %v3131_v61 }
 0x44a   :  { %1978 = vrot.lane.b32.xlu2 %v4530_v31, %s4900_s25  ;;  %2510 = vrot.lane.b32.xlu1 %v4668_v33, %s4901_s22  ;;  %v4695_v33 = vld [vmem:[%s10095_s0 + $0x2ba] sm:$0xff] }
 0x44b   :  { %2254 = vrot.lane.b32.xlu0 %v4604_v14, %s4902_s9  ;;  %v4541_v14 = vld [vmem:[%s10095_s0 + $0x150] sm:$0xff] }
 0x44c   :  { %v7617_v2 = vpop.permute.xlu2 %2276  ;;  %v2227_v0 = vpop.permute.xlu1 %2226 }
 0x44d   :  { %v2019_v11 = vpop.permute.xlu0 %2018  ;;  %v3056_v6 = vsel %vm3046_vm7, %v2991_v41, %v2227_v0  ;;  %v10495_v41 = vld [vmem:[#allocation235_spill] sm:$0xff] }
 0x44e   :  { %v3015_v5 = vsel %vm2981_vm5, %v2950_v21, %v2019_v11  ;;  %v10489_v11 = vld [vmem:[#allocation205_spill] sm:$0xff] }
 0x44f   :  { %v3080_v55 = vsel %vm3046_vm7, %v3015_v5, %v7525_v48  ;;  %v4823_v48 = vld [vmem:[%s10095_s0 + $0xf0] sm:$0xff] }
 0x450   :  { %v2677_v15 = vsel %vm2656_vm1, %v4823_v48, %v10482_v56  ;;  %v10493_v5 = vld [vmem:[#allocation127_spill] sm:$0xff]  ;;  %v10496_v48 = vld [vmem:[#allocation36_spill] sm:$0xff] }
 0x451   :  { %v2742_v17 = vsel %vm2721_vm3, %v2677_v15, %v10483_v1  ;;  %v4555_v15 = vld [vmem:[%s10095_s0 + $0x228] sm:$0xff] }
 0x452   :  { %2282 = vrot.lane.b32.xlu2 %v4618_v38, %s4902_s9  ;;  %2234 = vrot.lane.b32.xlu1 %v4594_v30, %s4902_s9  ;;  %v2807_v13 = vsel %vm2786_vm2, %v2742_v17, %v10484_v4  ;;  %v10491_v38 = vld [vmem:[#allocation12_spill] sm:$0xff]  ;;  %v10498_v17 = vld [vmem:[#allocation161_spill] sm:$0xff] }
 0x453   :  { %2026 = vrot.lane.b32.xlu0 %v4554_v7, %s4900_s25  ;;  %v2872_v51 = vsel %vm2851_vm4, %v2807_v13, %v10485_v26  ;;  %v2667_v30 = vsel %vm2656_vm1, %v4825_v10, %v10491_v38  ;;  %v10499_v13 = vld [vmem:[#allocation207_spill] sm:$0xff] }
 0x454   :  { %v2533_v44 = vpop.permute.xlu2 %2532  ;;  %v2531_v54 = vpop.permute.xlu1 %2530  ;;  %v2937_v3 = vsel %vm2916_vm6, %v2872_v51, %v6872_v16  ;;  %v4631_v16 = vld [vmem:[%s10095_s0 + $0x2b9] sm:$0xff]  ;;  %v2732_v21 = vsel %vm2721_vm3, %v2667_v30, %v10492_v49  ;;  %v4696_v30 = vld [vmem:[%s10095_s0 + $0x2c2] sm:$0xff] }
 0x455   :  { %v2483_v22 = vpop.permute.xlu0 %2482  ;;  %v3145_v27 = vsel %vm3111_vm8, %v3080_v55, %v2531_v54  ;;  %v3002_v43 = vsel %vm2981_vm5, %v2937_v3, %v7561_v57  ;;  %v4824_v57 = vld [vmem:[%s10095_s0 + $0x1c8] sm:$0xff]  ;;  %v2797_v62 = vsel %vm2786_vm2, %v2732_v21, %v10493_v5  ;;  %v4828_v21 = vld [vmem:[%s10095_s0 + $0x1d0] sm:$0xff] }
 0x456   :  { %v3121_v47 = vsel %vm3111_vm8, %v3056_v6, %v2483_v22  ;;  %4743 = vmatmul.msk.f32.gmra.mxu2 %vm3185_vm9, %v3145_v27  ;;  %v2691_v25 = vsel %vm2656_vm1, %v4824_v57, %v10486_v35  ;;  %v10501_v35 = vld [vmem:[#allocation78_spill] sm:$0xff] }
 0x457   :  { %4719 = vmatmul.msk.f32.gmra.mxu0 %vm3185_vm9, %v3121_v47  ;;  %v2756_v0 = vsel %vm2721_vm3, %v2691_v25, %v10487_v52  ;;  %v10502_v52 = vld [vmem:[#allocation125_spill] sm:$0xff] }
 0x458   :  { %v2821_v32 = vsel %vm2786_vm2, %v2756_v0, %v10488_v36  ;;  %v10503_v36 = vld [vmem:[#allocation194_spill] sm:$0xff] }
 0x459   :  { %v2886_v58 = vsel %vm2851_vm4, %v2821_v32, %v10489_v11  ;;  %v10504_v11 = vld [vmem:[#allocation253_spill] sm:$0xff] }
 0x45a   :  { %2538 = vrot.lane.b32.xlu2 %v4682_v34, %s4901_s22  ;;  %2490 = vrot.lane.b32.xlu1 %v4658_v50, %s4901_s22  ;;  %v2951_v42 = vsel %vm2916_vm6, %v2886_v58, %v10490_v46  ;;  %v4619_v34 = vld [vmem:[%s10095_s0 + $0x229] sm:$0xff]  ;;  %v4595_v50 = vld [vmem:[%s10095_s0 + $0xd9] sm:$0xff] }
 0x45b   :  { %2052 = vrot.lane.b32.xlu0 %v4567_v60, %s4900_s25  ;;  %v10497_v60 = vld [vmem:[#allocation106_spill] sm:$0xff] }
 0x45c   :  { %v7687_v20 = vpop.permute.xlu2 %2558  ;;  %v2505_v45 = vpop.permute.xlu1 %2504  ;;  %v4632_v49 = vld [vmem:[%s10095_s0 + $0x2c1] sm:$0xff] }
 0x45d   :  { %v2249_v39 = vpop.permute.xlu0 %2248 }
 0x45e   :  { %v3067_v61 = vsel %vm3046_vm7, %v3002_v43, %v2249_v39 }
 0x45f   :  { %v3132_v31 = vsel %vm3111_vm8, %v3067_v61, %v2505_v45 }
 0x460   :  { %4730 = vmatmul.msk.f32.gmra.mxu1 %vm3185_vm9, %v3132_v31 }
 0x462   :  { %2564 = vrot.lane.b32.xlu2 %v4695_v33, %s4901_s22  ;;  %2000 = vrot.lane.b32.xlu1 %v4541_v14, %s4900_s25  ;;  %v4683_v33 = vld [vmem:[%s10095_s0 + $0x22a] sm:$0xff]  ;;  %v4659_v14 = vld [vmem:[%s10095_s0 + $0xda] sm:$0xff] }
 0x463   :  { %2308 = vrot.lane.b32.xlu0 %v4631_v16, %s4902_s9  ;;  %v10500_v16 = vld [vmem:[#allocation24_spill] sm:$0xff] }
 0x464   :  { %v7717_v9 = vpop.permute.xlu2 %1974  ;;  %v2229_v63 = vpop.permute.xlu1 %2228 }
 0x465   :  { %v2021_v23 = vpop.permute.xlu0 %2020 }
 0x466   :  { %v3016_v24 = vsel %vm2981_vm5, %v2951_v42, %v2021_v23 }
 0x467   :  { %v3081_v7 = vsel %vm3046_vm7, %v3016_v24, %v7617_v2  ;;  %v2862_v2 = vsel %vm2851_vm4, %v2797_v62, %v10494_v37  ;;  %v4542_v24 = vld [vmem:[%s10095_s0 + $0x158] sm:$0xff]  ;;  %v10507_v62 = vld [vmem:[#allocation149_spill] sm:$0xff] }
 0x468   :  { %v3146_v19 = vsel %vm3111_vm8, %v3081_v7, %v2533_v44  ;;  %v2927_v54 = vsel %vm2916_vm6, %v2862_v2, %v10495_v41  ;;  %v10505_v7 = vld [vmem:[#allocation25_spill] sm:$0xff] }
 0x469   :  { %4744 = vmatmul.msk.f32.gmra.mxu2 %vm3185_vm9, %v3146_v19  ;;  %v2992_v55 = vsel %vm2981_vm5, %v2927_v54, %v7593_v53  ;;  %v4826_v53 = vld [vmem:[%s10095_s0 + $0x260] sm:$0xff] }
 0x46a   :  { %1980 = vrot.lane.b32.xlu2 %v4531_v40, %s4900_s25  ;;  %2512 = vrot.lane.b32.xlu1 %v4669_v18, %s4901_s22  ;;  %v3057_v44 = vsel %vm3046_vm7, %v2992_v55, %v2229_v63  ;;  %v2704_v56 = vsel %vm2656_vm1, %v4826_v53, %v10496_v48  ;;  %v2692_v40 = vsel %vm2656_vm1, %v4828_v21, %v10505_v7  ;;  %v10506_v18 = vld [vmem:[#allocation94_spill] sm:$0xff] }
 0x46b   :  { %2256 = vrot.lane.b32.xlu0 %v4605_v12, %s4902_s9  ;;  %v2769_v1 = vsel %vm2721_vm3, %v2704_v56, %v10497_v60  ;;  %v2757_v5 = vsel %vm2721_vm3, %v2692_v40, %v10506_v18  ;;  %v10508_v12 = vld [vmem:[#allocation195_spill] sm:$0xff]  ;;  %v10510_v53 = vld [vmem:[#allocation70_spill] sm:$0xff]  ;;  %v10521_v40 = vld [vmem:[#allocation193_spill] sm:$0xff] }
 0x46c   :  { %v2279_v6 = vpop.permute.xlu2 %2278  ;;  %v2485_v22 = vpop.permute.xlu1 %2484  ;;  %v2834_v4 = vsel %vm2786_vm2, %v2769_v1, %v10498_v17  ;;  %v2822_v19 = vsel %vm2786_vm2, %v2757_v5, %v10507_v62  ;;  %v10511_v60 = vld [vmem:[#allocation126_spill] sm:$0xff]  ;;  %v10512_v1 = vld [vmem:[#allocation176_spill] sm:$0xff] }
 0x46d   :  { %v2047_v27 = vpop.permute.xlu0 %2046  ;;  %v3122_v47 = vsel %vm3111_vm8, %v3057_v44, %v2485_v22  ;;  %v2899_v26 = vsel %vm2851_vm4, %v2834_v4, %v10499_v13  ;;  %v2887_v37 = vsel %vm2851_vm4, %v2822_v19, %v10508_v12  ;;  %v4829_v22 = vld [vmem:[%s10095_s0 + $0x80] sm:$0xff]  ;;  %v10513_v4 = vld [vmem:[#allocation246_spill] sm:$0xff]  ;;  %v10522_v5 = vld [vmem:[#allocation244_spill] sm:$0xff] }
 0x46e   :  { %4720 = vmatmul.msk.f32.gmra.mxu0 %vm3185_vm9, %v3122_v47  ;;  %v2964_v51 = vsel %vm2916_vm6, %v2899_v26, %v7018_v29  ;;  %v4827_v29 = vld [vmem:[%s10095_s0 + $0xf8] sm:$0xff]  ;;  %v2952_v54 = vsel %vm2916_vm6, %v2887_v37, %v6952_v59  ;;  %v10520_v21 = vld [vmem:[#allocation138_spill] sm:$0xff] }
 0x46f   :  { %v3029_v43 = vsel %vm2981_vm5, %v2964_v51, %v2047_v27  ;;  %v2678_v57 = vsel %vm2656_vm1, %v4827_v29, %v10500_v16  ;;  %v10509_v27 = vld [vmem:[#allocation6_spill] sm:$0xff]  ;;  %v4670_v59 = vld [vmem:[%s10095_s0 + $0x15a] sm:$0xff]  ;;  %v4556_v29 = vld [vmem:[%s10095_s0 + $0x230] sm:$0xff] }
 0x470   :  { %v2743_v25 = vsel %vm2721_vm3, %v2678_v57, %v10501_v35  ;;  %v2668_v47 = vsel %vm2656_vm1, %v4829_v22, %v10509_v27  ;;  %v10515_v16 = vld [vmem:[#allocation105_spill] sm:$0xff]  ;;  %v4543_v22 = vld [vmem:[%s10095_s0 + $0x168] sm:$0xff]  ;;  %v4633_v27 = vld [vmem:[%s10095_s0 + $0x2d1] sm:$0xff] }
 0x471   :  { %v2808_v0 = vsel %vm2786_vm2, %v2743_v25, %v10502_v52  ;;  %v2733_v48 = vsel %vm2721_vm3, %v2668_v47, %v10510_v53  ;;  %v10517_v25 = vld [vmem:[#allocation222_spill] sm:$0xff]  ;;  %v4832_v47 = vld [vmem:[%s10095_s0 + $0x1e0] sm:$0xff] }
 0x472   :  { %2284 = vrot.lane.b32.xlu2 %v4619_v34, %s4902_s9  ;;  %2236 = vrot.lane.b32.xlu1 %v4595_v50, %s4902_s9  ;;  %v2873_v32 = vsel %vm2851_vm4, %v2808_v0, %v10503_v36  ;;  %v4532_v50 = vld [vmem:[%s10095_s0 + $0xe0] sm:$0xff] }
 0x473   :  { %2028 = vrot.lane.b32.xlu0 %v4555_v15, %s4900_s25  ;;  %v2938_v58 = vsel %vm2916_vm6, %v2873_v32, %v10504_v11  ;;  %v4606_v15 = vld [vmem:[%s10095_s0 + $0x159] sm:$0xff] }
 0x474   :  { %v2535_v3 = vpop.permute.xlu2 %2534  ;;  %v1995_v45 = vpop.permute.xlu1 %1994 }
 0x475   :  { %v2303_v39 = vpop.permute.xlu0 %2302  ;;  %v3003_v42 = vsel %vm2981_vm5, %v2938_v58, %v1995_v45 }
 0x476   :  { %v3094_v61 = vsel %vm3046_vm7, %v3029_v43, %v2303_v39 }
 0x477   :  { %v3159_v31 = vsel %vm3111_vm8, %v3094_v61, %v7687_v20  ;;  %v4568_v20 = vld [vmem:[%s10095_s0 + $0x2c0] sm:$0xff]  ;;  %v4620_v61 = vld [vmem:[%s10095_s0 + $0x231] sm:$0xff] }
 0x478   :  { %4757 = vmatmul.msk.f32.vlgmr.msra.gmra.mxu3 %vm3185_vm9, %v3159_v31  ;;  %v4596_v31 = vld [vmem:[%s10095_s0 + $0xe1] sm:$0xff] }
 0x47a   :  { %2540 = vrot.lane.b32.xlu2 %v4683_v33, %s4901_s22  ;;  %2492 = vrot.lane.b32.xlu1 %v4659_v14, %s4901_s22  ;;  %v10514_v33 = vld [vmem:[#allocation50_spill] sm:$0xff] }
 0x47b   :  { %2054 = vrot.lane.b32.xlu0 %v4568_v20, %s4900_s25  ;;  %v10516_v20 = vld [vmem:[#allocation151_spill] sm:$0xff] }
 0x47c   :  { %v7811_v63 = vpop.permute.xlu2 %2560  ;;  %v2507_v46 = vpop.permute.xlu1 %2506 }
 0x47d   :  { %v2251_v23 = vpop.permute.xlu0 %2250 }
 0x47e   :  { %v3068_v10 = vsel %vm3046_vm7, %v3003_v42, %v2251_v23  ;;  %v4684_v23 = vld [vmem:[%s10095_s0 + $0x232] sm:$0xff] }
 0x47f   :  { %v3133_v38 = vsel %vm3111_vm8, %v3068_v10, %v2507_v46  ;;  %v4660_v10 = vld [vmem:[%s10095_s0 + $0xe2] sm:$0xff] }
 0x480   :  { %4731 = vmatmul.msk.f32.gmra.mxu1 %vm3185_vm9, %v3133_v38  ;;  %v10518_v38 = vld [vmem:[#allocation23_spill] sm:$0xff] }
 0x482   :  { %2566 = vrot.lane.b32.xlu2 %v4696_v30, %s4901_s22  ;;  %2002 = vrot.lane.b32.xlu1 %v4542_v24, %s4900_s25  ;;  %v10519_v24 = vld [vmem:[#allocation68_spill] sm:$0xff] }
 0x483   :  { %2310 = vrot.lane.b32.xlu0 %v4632_v49, %s4902_s9 }
 0x484   :  { %v7840_v2 = vpop.permute.xlu2 %1976  ;;  %v2231_v41 = vpop.permute.xlu1 %2230 }
 0x485   :  { %v2023_v55 = vpop.permute.xlu0 %2022 }
 0x486   :  { %v3017_v44 = vsel %vm2981_vm5, %v2952_v54, %v2023_v55 }
 0x487   :  { %v3082_v34 = vsel %vm3046_vm7, %v3017_v44, %v2279_v6  ;;  %v2798_v6 = vsel %vm2786_vm2, %v2733_v48, %v10511_v60  ;;  %v4697_v44 = vld [vmem:[%s10095_s0 + $0x2d2] sm:$0xff] }
 0x488   :  { %v3147_v56 = vsel %vm3111_vm8, %v3082_v34, %v2535_v3  ;;  %v2863_v17 = vsel %vm2851_vm4, %v2798_v6, %v10512_v1  ;;  %v10523_v34 = vld [vmem:[#allocation38_spill] sm:$0xff]  ;;  %v10525_v48 = vld [vmem:[#allocation139_spill] sm:$0xff]  ;;  %v10527_v1 = vld [vmem:[#allocation264_spill] sm:$0xff] }
 0x489   :  { %4745 = vmatmul.msk.f32.gmra.mxu2 %vm3185_vm9, %v3147_v56  ;;  %v2928_v13 = vsel %vm2916_vm6, %v2863_v17, %v10513_v4 }
 0x48a   :  { %1982 = vrot.lane.b32.xlu2 %v4532_v50, %s4900_s25  ;;  %2514 = vrot.lane.b32.xlu1 %v4670_v59, %s4901_s22  ;;  %v2993_v26 = vsel %vm2981_vm5, %v2928_v13, %v7717_v9  ;;  %v4830_v9 = vld [vmem:[%s10095_s0 + $0x270] sm:$0xff]  ;;  %v2693_v50 = vsel %vm2656_vm1, %v4832_v47, %v10523_v34  ;;  %v10524_v59 = vld [vmem:[#allocation93_spill] sm:$0xff]  ;;  %v10539_v47 = vld [vmem:[#allocation82_spill] sm:$0xff] }
 0x48b   :  { %2258 = vrot.lane.b32.xlu0 %v4606_v15, %s4902_s9  ;;  %v3058_v3 = vsel %vm3046_vm7, %v2993_v26, %v2231_v41  ;;  %v2705_v14 = vsel %vm2656_vm1, %v4830_v9, %v10514_v33  ;;  %v2758_v53 = vsel %vm2721_vm3, %v2693_v50, %v10524_v59  ;;  %v10526_v15 = vld [vmem:[#allocation209_spill] sm:$0xff] }
 0x48c   :  { %v7875_v51 = vpop.permute.xlu2 %2280  ;;  %v2487_v45 = vpop.permute.xlu1 %2486  ;;  %v2770_v57 = vsel %vm2721_vm3, %v2705_v14, %v10515_v16  ;;  %v2823_v56 = vsel %vm2786_vm2, %v2758_v53, %v10525_v48  ;;  %v10529_v9 = vld [vmem:[#allocation69_spill] sm:$0xff]  ;;  %v10530_v16 = vld [vmem:[#allocation120_spill] sm:$0xff] }
 0x48d   :  { %v2049_v43 = vpop.permute.xlu0 %2048  ;;  %v3123_v39 = vsel %vm3111_vm8, %v3058_v3, %v2487_v45  ;;  %v2835_v35 = vsel %vm2786_vm2, %v2770_v57, %v10516_v20  ;;  %v2888_v60 = vsel %vm2851_vm4, %v2823_v56, %v10526_v15  ;;  %v4833_v3 = vld [vmem:[%s10095_s0 + $0x90] sm:$0xff]  ;;  %v10528_v45 = vld [vmem:[#allocation16_spill] sm:$0xff]  ;;  %v10531_v57 = vld [vmem:[#allocation186_spill] sm:$0xff] }
 0x48e   :  { %4721 = vmatmul.msk.f32.gmra.mxu0 %vm3185_vm9, %v3123_v39  ;;  %v2900_v52 = vsel %vm2851_vm4, %v2835_v35, %v10517_v25  ;;  %v2953_v17 = vsel %vm2916_vm6, %v2888_v60, %v10527_v1  ;;  %v10532_v35 = vld [vmem:[#allocation245_spill] sm:$0xff]  ;;  %v10541_v53 = vld [vmem:[#allocation184_spill] sm:$0xff] }
 0x48f   :  { %v2965_v0 = vsel %vm2916_vm6, %v2900_v52, %v7016_v8  ;;  %v4831_v8 = vld [vmem:[%s10095_s0 + $0x108] sm:$0xff]  ;;  %v10540_v50 = vld [vmem:[#allocation137_spill] sm:$0xff]  ;;  %v10542_v56 = vld [vmem:[#allocation256_spill] sm:$0xff] }
 0x490   :  { %v3030_v32 = vsel %vm2981_vm5, %v2965_v0, %v2049_v43  ;;  %v2679_v30 = vsel %vm2656_vm1, %v4831_v8, %v10518_v38  ;;  %v2669_v43 = vsel %vm2656_vm1, %v4833_v3, %v10528_v45  ;;  %v4621_v8 = vld [vmem:[%s10095_s0 + $0x241] sm:$0xff]  ;;  %v10534_v38 = vld [vmem:[#allocation95_spill] sm:$0xff] }
 0x491   :  { %v2744_v49 = vsel %vm2721_vm3, %v2679_v30, %v10519_v24  ;;  %v2734_v33 = vsel %vm2721_vm3, %v2669_v43, %v10529_v9  ;;  %v4558_v3 = vld [vmem:[%s10095_s0 + $0x248] sm:$0xff]  ;;  %v4672_v45 = vld [vmem:[%s10095_s0 + $0x172] sm:$0xff] }
 0x492   :  { %2286 = vrot.lane.b32.xlu2 %v4620_v61, %s4902_s9  ;;  %2238 = vrot.lane.b32.xlu1 %v4596_v31, %s4902_s9  ;;  %v2809_v7 = vsel %vm2786_vm2, %v2744_v49, %v10520_v21  ;;  %v4557_v61 = vld [vmem:[%s10095_s0 + $0x240] sm:$0xff]  ;;  %v4671_v31 = vld [vmem:[%s10095_s0 + $0x16a] sm:$0xff] }
 0x493   :  { %2030 = vrot.lane.b32.xlu0 %v4556_v29, %s4900_s25  ;;  %v2874_v18 = vsel %vm2851_vm4, %v2809_v7, %v10521_v40  ;;  %v4607_v29 = vld [vmem:[%s10095_s0 + $0x169] sm:$0xff]  ;;  %v10536_v49 = vld [vmem:[#allocation221_spill] sm:$0xff]  ;;  %v4608_v43 = vld [vmem:[%s10095_s0 + $0x171] sm:$0xff] }
 0x494   :  { %v2537_v36 = vpop.permute.xlu2 %2536  ;;  %v1997_v11 = vpop.permute.xlu1 %1996  ;;  %v2939_v62 = vsel %vm2916_vm6, %v2874_v18, %v10522_v5  ;;  %v10537_v7 = vld [vmem:[#allocation265_spill] sm:$0xff]  ;;  %v10544_v9 = vld [vmem:[#allocation83_spill] sm:$0xff] }
 0x495   :  { %v2305_v58 = vpop.permute.xlu0 %2304  ;;  %v3004_v12 = vsel %vm2981_vm5, %v2939_v62, %v1997_v11 }
 0x496   :  { %v3095_v46 = vsel %vm3046_vm7, %v3030_v32, %v2305_v58 }
 0x497   :  { %v3160_v42 = vsel %vm3111_vm8, %v3095_v46, %v7811_v63  ;;  %v4569_v63 = vld [vmem:[%s10095_s0 + $0x2d0] sm:$0xff]  ;;  %v4685_v46 = vld [vmem:[%s10095_s0 + $0x242] sm:$0xff] }
 0x498   :  { %4758 = vmatmul.msk.f32.gmra.mxu3 %vm3185_vm9, %v3160_v42  ;;  %v4570_v42 = vld [vmem:[%s10095_s0 + $0x2d8] sm:$0xff] }
 0x49a   :  { %2542 = vrot.lane.b32.xlu2 %v4684_v23, %s4901_s22  ;;  %2494 = vrot.lane.b32.xlu1 %v4660_v10, %s4901_s22  ;;  %v10533_v23 = vld [vmem:[#allocation49_spill] sm:$0xff] }
 0x49b   :  { %2056 = vrot.lane.b32.xlu0 %v4569_v63, %s4900_s25  ;;  %v10535_v63 = vld [vmem:[#allocation165_spill] sm:$0xff] }
 0x49c   :  { %v7935_v19 = vpop.permute.xlu2 %2562  ;;  %v2509_v37 = vpop.permute.xlu1 %2508 }
 0x49d   :  { %v2253_v41 = vpop.permute.xlu0 %2252 }
 0x49e   :  { %v3069_v54 = vsel %vm3046_vm7, %v3004_v12, %v2253_v41 }
 0x49f   :  { %v3134_v55 = vsel %vm3111_vm8, %v3069_v54, %v2509_v37  ;;  %v4698_v54 = vld [vmem:[%s10095_s0 + $0x2da] sm:$0xff] }
 0x4a0   :  { %4732 = vmatmul.msk.f32.gmra.mxu1 %vm3185_vm9, %v3134_v55  ;;  %v4544_v55 = vld [vmem:[%s10095_s0 + $0x170] sm:$0xff] }
 0x4a2   :  { %2568 = vrot.lane.b32.xlu2 %v4697_v44, %s4901_s22  ;;  %2004 = vrot.lane.b32.xlu1 %v4543_v22, %s4900_s25  ;;  %v4835_v44 = vld [vmem:[%s10095_s0 + $0x110] sm:$0xff]  ;;  %v10538_v22 = vld [vmem:[#allocation14_spill] sm:$0xff] }
 0x4a3   :  { %2312 = vrot.lane.b32.xlu0 %v4633_v27, %s4902_s9  ;;  %v2680_v27 = vsel %vm2656_vm1, %v4835_v44, %v10538_v22  ;;  %v4635_v44 = vld [vmem:[%s10095_s0 + $0x2e9] sm:$0xff]  ;;  %v10554_v22 = vld [vmem:[#allocation109_spill] sm:$0xff] }
 0x4a4   :  { %v7964_v6 = vpop.permute.xlu2 %1978  ;;  %v2233_v4 = vpop.permute.xlu1 %2232  ;;  %v2745_v34 = vsel %vm2721_vm3, %v2680_v27, %v10539_v47 }
 0x4a5   :  { %v2025_v13 = vpop.permute.xlu0 %2024  ;;  %v2810_v59 = vsel %vm2786_vm2, %v2745_v34, %v10540_v50  ;;  %v10556_v34 = vld [vmem:[#allocation210_spill] sm:$0xff] }
 0x4a6   :  { %v3018_v26 = vsel %vm2981_vm5, %v2953_v17, %v2025_v13  ;;  %v2875_v48 = vsel %vm2851_vm4, %v2810_v59, %v10541_v53  ;;  %v10557_v59 = vld [vmem:[#allocation277_spill] sm:$0xff] }
 0x4a7   :  { %v3083_v39 = vsel %vm3046_vm7, %v3018_v26, %v7875_v51  ;;  %v2799_v51 = vsel %vm2786_vm2, %v2734_v33, %v10530_v16  ;;  %v2940_v15 = vsel %vm2916_vm6, %v2875_v48, %v10542_v56  ;;  %v10546_v16 = vld [vmem:[#allocation208_spill] sm:$0xff] }
 0x4a8   :  { %v3148_v14 = vsel %vm3111_vm8, %v3083_v39, %v2537_v36  ;;  %v2864_v20 = vsel %vm2851_vm4, %v2799_v51, %v10531_v57  ;;  %v4836_v39 = vld [vmem:[%s10095_s0 + $0x1e8] sm:$0xff] }
 0x4a9   :  { %4746 = vmatmul.msk.f32.gmra.mxu2 %vm3185_vm9, %v3148_v14  ;;  %v2929_v25 = vsel %vm2916_vm6, %v2864_v20, %v10532_v35  ;;  %v10545_v14 = vld [vmem:[#allocation153_spill] sm:$0xff] }
 0x4aa   :  { %2032 = vrot.lane.b32.xlu2 %v4557_v61, %s4900_s25  ;;  %2516 = vrot.lane.b32.xlu1 %v4671_v31, %s4901_s22  ;;  %v2994_v52 = vsel %vm2981_vm5, %v2929_v25, %v7840_v2  ;;  %v4834_v2 = vld [vmem:[%s10095_s0 + $0x278] sm:$0xff]  ;;  %v10543_v61 = vld [vmem:[#allocation37_spill] sm:$0xff] }
 0x4ab   :  { %2260 = vrot.lane.b32.xlu0 %v4607_v29, %s4902_s9  ;;  %v3059_v36 = vsel %vm3046_vm7, %v2994_v52, %v2233_v4  ;;  %v2706_v10 = vsel %vm2656_vm1, %v4834_v2, %v10533_v23  ;;  %v2694_v31 = vsel %vm2656_vm1, %v4836_v39, %v10543_v61  ;;  %v10547_v20 = vld [vmem:[#allocation257_spill] sm:$0xff]  ;;  %v4571_v2 = vld [vmem:[%s10095_s0 + $0x2e8] sm:$0xff]  ;;  %v10549_v23 = vld [vmem:[#allocation63_spill] sm:$0xff] }
 0x4ac   :  { %v8000_v0 = vpop.permute.xlu2 %2282  ;;  %v2489_v32 = vpop.permute.xlu1 %2488  ;;  %v2771_v30 = vsel %vm2721_vm3, %v2706_v10, %v10534_v38  ;;  %v2759_v33 = vsel %vm2721_vm3, %v2694_v31, %v10544_v9  ;;  %v4622_v38 = vld [vmem:[%s10095_s0 + $0x249] sm:$0xff]  ;;  %v10559_v39 = vld [vmem:[#allocation81_spill] sm:$0xff]  ;;  %v10560_v31 = vld [vmem:[#allocation128_spill] sm:$0xff] }
 0x4ad   :  { %v2051_v11 = vpop.permute.xlu0 %2050  ;;  %v3124_v58 = vsel %vm3111_vm8, %v3059_v36, %v2489_v32  ;;  %v2836_v24 = vsel %vm2786_vm2, %v2771_v30, %v10535_v63  ;;  %v2824_v29 = vsel %vm2786_vm2, %v2759_v33, %v10545_v14  ;;  %v4837_v32 = vld [vmem:[%s10095_s0 + $0x98] sm:$0xff]  ;;  %v10550_v30 = vld [vmem:[#allocation130_spill] sm:$0xff]  ;;  %v10551_v63 = vld [vmem:[#allocation185_spill] sm:$0xff] }
 0x4ae   :  { %4722 = vmatmul.msk.f32.gmra.mxu0 %vm3185_vm9, %v3124_v58  ;;  %v2901_v21 = vsel %vm2851_vm4, %v2836_v24, %v10536_v49  ;;  %v2889_v51 = vsel %vm2851_vm4, %v2824_v29, %v10546_v16  ;;  %v10552_v49 = vld [vmem:[#allocation237_spill] sm:$0xff]  ;;  %v10562_v29 = vld [vmem:[#allocation255_spill] sm:$0xff] }
 0x4af   :  { %v2966_v40 = vsel %vm2916_vm6, %v2901_v21, %v10537_v7  ;;  %v2954_v35 = vsel %vm2916_vm6, %v2889_v51, %v10547_v20  ;;  %v10561_v33 = vld [vmem:[#allocation197_spill] sm:$0xff] }
 0x4b0   :  { %v3031_v5 = vsel %vm2981_vm5, %v2966_v40, %v2051_v11  ;;  %v10548_v11 = vld [vmem:[#allocation15_spill] sm:$0xff] }
 0x4b1   :  { %v2670_v58 = vsel %vm2656_vm1, %v4837_v32, %v10548_v11  ;;  %v4687_v32 = vld [vmem:[%s10095_s0 + $0x25a] sm:$0xff]  ;;  %v4572_v11 = vld [vmem:[%s10095_s0 + $0x2f0] sm:$0xff] }
 0x4b2   :  { %2544 = vrot.lane.b32.xlu2 %v4685_v46, %s4901_s22  ;;  %2058 = vrot.lane.b32.xlu1 %v4570_v42, %s4900_s25  ;;  %v4686_v42 = vld [vmem:[%s10095_s0 + $0x24a] sm:$0xff]  ;;  %v2735_v10 = vsel %vm2721_vm3, %v2670_v58, %v10549_v23  ;;  %v4623_v58 = vld [vmem:[%s10095_s0 + $0x259] sm:$0xff] }
 0x4b3   :  { %2288 = vrot.lane.b32.xlu0 %v4621_v8, %s4902_s9  ;;  %v10564_v23 = vld [vmem:[#allocation97_spill] sm:$0xff] }
 0x4b4   :  { %v2539_v18 = vpop.permute.xlu2 %2538  ;;  %v1999_v62 = vpop.permute.xlu1 %1998 }
 0x4b5   :  { %v2307_v12 = vpop.permute.xlu0 %2306  ;;  %v3005_v1 = vsel %vm2981_vm5, %v2940_v15, %v1999_v62 }
 0x4b6   :  { %v3096_v37 = vsel %vm3046_vm7, %v3031_v5, %v2307_v12 }
 0x4b7   :  { %v3161_v41 = vsel %vm3111_vm8, %v3096_v37, %v7935_v19  ;;  %v4634_v19 = vld [vmem:[%s10095_s0 + $0x2d9] sm:$0xff]  ;;  %v4699_v37 = vld [vmem:[%s10095_s0 + $0x2ea] sm:$0xff] }
 0x4b8   :  { %4759 = vmatmul.msk.f32.gmra.mxu3 %vm3185_vm9, %v3161_v41  ;;  %v4545_v41 = vld [vmem:[%s10095_s0 + $0x180] sm:$0xff] }
 0x4ba   :  { %2570 = vrot.lane.b32.xlu2 %v4698_v54, %s4901_s22  ;;  %2006 = vrot.lane.b32.xlu1 %v4544_v55, %s4900_s25  ;;  %v10553_v54 = vld [vmem:[#allocation39_spill] sm:$0xff] }
 0x4bb   :  { %2314 = vrot.lane.b32.xlu0 %v4634_v19, %s4902_s9  ;;  %v10555_v19 = vld [vmem:[#allocation164_spill] sm:$0xff] }
 0x4bc   :  { %v8060_v60 = vpop.permute.xlu2 %2564  ;;  %v2511_v17 = vpop.permute.xlu1 %2510 }
 0x4bd   :  { %v2255_v4 = vpop.permute.xlu0 %2254 }
 0x4be   :  { %v3070_v13 = vsel %vm3046_vm7, %v3005_v1, %v2255_v4 }
 0x4bf   :  { %v3135_v26 = vsel %vm3111_vm8, %v3070_v13, %v2511_v17  ;;  %v4559_v13 = vld [vmem:[%s10095_s0 + $0x258] sm:$0xff] }
 0x4c0   :  { %4733 = vmatmul.msk.f32.gmra.mxu1 %vm3185_vm9, %v3135_v26  ;;  %v4673_v26 = vld [vmem:[%s10095_s0 + $0x182] sm:$0xff] }
 0x4c2   :  { %2034 = vrot.lane.b32.xlu2 %v4558_v3, %s4900_s25  ;;  %2518 = vrot.lane.b32.xlu1 %v4672_v45, %s4901_s22  ;;  %v4839_v3 = vld [vmem:[%s10095_s0 + $0x120] sm:$0xff]  ;;  %v10558_v45 = vld [vmem:[#allocation27_spill] sm:$0xff] }
 0x4c3   :  { %2262 = vrot.lane.b32.xlu0 %v4608_v43, %s4902_s9  ;;  %v2681_v43 = vsel %vm2656_vm1, %v4839_v3, %v10558_v45  ;;  %v4610_v3 = vld [vmem:[%s10095_s0 + $0x189] sm:$0xff]  ;;  %v10574_v45 = vld [vmem:[#allocation108_spill] sm:$0xff] }
 0x4c4   :  { %v8089_v57 = vpop.permute.xlu2 %1980  ;;  %v2235_v25 = vpop.permute.xlu1 %2234  ;;  %v2746_v61 = vsel %vm2721_vm3, %v2681_v43, %v10559_v39 }
 0x4c5   :  { %v2027_v52 = vpop.permute.xlu0 %2026  ;;  %v2811_v9 = vsel %vm2786_vm2, %v2746_v61, %v10560_v31  ;;  %v10576_v61 = vld [vmem:[#allocation225_spill] sm:$0xff] }
 0x4c6   :  { %v3019_v36 = vsel %vm2981_vm5, %v2954_v35, %v2027_v52  ;;  %v2876_v14 = vsel %vm2851_vm4, %v2811_v9, %v10561_v33  ;;  %v10577_v9 = vld [vmem:[#allocation276_spill] sm:$0xff] }
 0x4c7   :  { %v3084_v46 = vsel %vm3046_vm7, %v3019_v36, %v8000_v0  ;;  %v2800_v0 = vsel %vm2786_vm2, %v2735_v10, %v10550_v30  ;;  %v2941_v16 = vsel %vm2916_vm6, %v2876_v14, %v10562_v29  ;;  %v10566_v30 = vld [vmem:[#allocation198_spill] sm:$0xff] }
 0x4c8   :  { %v3149_v8 = vsel %vm3111_vm8, %v3084_v46, %v2539_v18  ;;  %v2865_v24 = vsel %vm2851_vm4, %v2800_v0, %v10551_v63  ;;  %v4840_v46 = vld [vmem:[%s10095_s0 + $0x1f8] sm:$0xff] }
 0x4c9   :  { %4747 = vmatmul.msk.f32.gmra.mxu2 %vm3185_vm9, %v3149_v8  ;;  %v2930_v21 = vsel %vm2916_vm6, %v2865_v24, %v10552_v49  ;;  %v10565_v8 = vld [vmem:[#allocation152_spill] sm:$0xff]  ;;  %v10567_v24 = vld [vmem:[#allocation267_spill] sm:$0xff] }
 0x4ca   :  { %2546 = vrot.lane.b32.xlu2 %v4686_v42, %s4901_s22  ;;  %2060 = vrot.lane.b32.xlu1 %v4571_v2, %s4900_s25  ;;  %v2995_v7 = vsel %vm2981_vm5, %v2930_v21, %v7964_v6  ;;  %v4838_v6 = vld [vmem:[%s10095_s0 + $0x288] sm:$0xff]  ;;  %v10563_v42 = vld [vmem:[#allocation28_spill] sm:$0xff] }
 0x4cb   :  { %2290 = vrot.lane.b32.xlu0 %v4622_v38, %s4902_s9  ;;  %v3060_v18 = vsel %vm3046_vm7, %v2995_v7, %v2235_v25  ;;  %v2707_v55 = vsel %vm2656_vm1, %v4838_v6, %v10553_v54  ;;  %v2695_v2 = vsel %vm2656_vm1, %v4840_v46, %v10563_v42  ;;  %v4546_v6 = vld [vmem:[%s10095_s0 + $0x188] sm:$0xff]  ;;  %v10569_v54 = vld [vmem:[#allocation73_spill] sm:$0xff]  ;;  %v10579_v46 = vld [vmem:[#allocation71_spill] sm:$0xff] }
 0x4cc   :  { %v8125_v40 = vpop.permute.xlu2 %2284  ;;  %v2491_v5 = vpop.permute.xlu1 %2490  ;;  %v2772_v27 = vsel %vm2721_vm3, %v2707_v55, %v10554_v22  ;;  %v2760_v10 = vsel %vm2721_vm3, %v2695_v2, %v10564_v23  ;;  %v4636_v22 = vld [vmem:[%s10095_s0 + $0x2f1] sm:$0xff]  ;;  %v10580_v2 = vld [vmem:[#allocation141_spill] sm:$0xff] }
 0x4cd   :  { %v2053_v62 = vpop.permute.xlu0 %2052  ;;  %v3125_v12 = vsel %vm3111_vm8, %v3060_v18, %v2491_v5  ;;  %v2837_v47 = vsel %vm2786_vm2, %v2772_v27, %v10555_v19  ;;  %v2825_v38 = vsel %vm2786_vm2, %v2760_v10, %v10565_v8  ;;  %v4841_v5 = vld [vmem:[%s10095_s0 + $0xa8] sm:$0xff]  ;;  %v10570_v27 = vld [vmem:[#allocation129_spill] sm:$0xff]  ;;  %v10581_v10 = vld [vmem:[#allocation196_spill] sm:$0xff] }
 0x4ce   :  { %4723 = vmatmul.msk.f32.gmra.mxu0 %vm3185_vm9, %v3125_v12  ;;  %v2902_v50 = vsel %vm2851_vm4, %v2837_v47, %v10556_v34  ;;  %v2890_v0 = vsel %vm2851_vm4, %v2825_v38, %v10566_v30  ;;  %v10571_v19 = vld [vmem:[#allocation177_spill] sm:$0xff]  ;;  %v10582_v38 = vld [vmem:[#allocation247_spill] sm:$0xff] }
 0x4cf   :  { %v2967_v53 = vsel %vm2916_vm6, %v2902_v50, %v10557_v59  ;;  %v2955_v49 = vsel %vm2916_vm6, %v2890_v0, %v10567_v24  ;;  %v10572_v34 = vld [vmem:[#allocation249_spill] sm:$0xff] }
 0x4d0   :  { %v3032_v56 = vsel %vm2981_vm5, %v2967_v53, %v2053_v62  ;;  %v10568_v62 = vld [vmem:[#allocation7_spill] sm:$0xff] }
 0x4d1   :  { %v2671_v12 = vsel %vm2656_vm1, %v4841_v5, %v10568_v62  ;;  %v4561_v5 = vld [vmem:[%s10095_s0 + $0x270] sm:$0xff]  ;;  %v4701_v62 = vld [vmem:[%s10095_s0 + $0x302] sm:$0xff] }
 0x4d2   :  { %2572 = vrot.lane.b32.xlu2 %v4699_v37, %s4901_s22  ;;  %2008 = vrot.lane.b32.xlu1 %v4545_v41, %s4900_s25  ;;  %v4700_v41 = vld [vmem:[%s10095_s0 + $0x2f2] sm:$0xff]  ;;  %v2736_v55 = vsel %vm2721_vm3, %v2671_v12, %v10569_v54  ;;  %v4637_v12 = vld [vmem:[%s10095_s0 + $0x301] sm:$0xff] }
 0x4d3   :  { %2316 = vrot.lane.b32.xlu0 %v4635_v44, %s4902_s9  ;;  %v10584_v54 = vld [vmem:[#allocation96_spill] sm:$0xff] }
 0x4d4   :  { %v2541_v48 = vpop.permute.xlu2 %2540  ;;  %v2001_v15 = vpop.permute.xlu1 %2000 }
 0x4d5   :  { %v2309_v1 = vpop.permute.xlu0 %2308  ;;  %v3006_v20 = vsel %vm2981_vm5, %v2941_v16, %v2001_v15 }
 0x4d6   :  { %v3097_v17 = vsel %vm3046_vm7, %v3032_v56, %v2309_v1 }
 0x4d7   :  { %v3162_v4 = vsel %vm3111_vm8, %v3097_v17, %v8060_v60  ;;  %v4609_v60 = vld [vmem:[%s10095_s0 + $0x181] sm:$0xff] }
 0x4d8   :  { %4760 = vmatmul.msk.f32.gmra.mxu3 %vm3185_vm9, %v3162_v4  ;;  %v4560_v17 = vld [vmem:[%s10095_s0 + $0x260] sm:$0xff]  ;;  %v4674_v4 = vld [vmem:[%s10095_s0 + $0x18a] sm:$0xff] }
 0x4da   :  { %2036 = vrot.lane.b32.xlu2 %v4559_v13, %s4900_s25  ;;  %2520 = vrot.lane.b32.xlu1 %v4673_v26, %s4901_s22  ;;  %v10573_v13 = vld [vmem:[#allocation53_spill] sm:$0xff] }
 0x4db   :  { %2264 = vrot.lane.b32.xlu0 %v4609_v60, %s4902_s9  ;;  %v10575_v60 = vld [vmem:[#allocation154_spill] sm:$0xff] }
 0x4dc   :  { %v8185_v51 = vpop.permute.xlu2 %2566  ;;  %v2513_v35 = vpop.permute.xlu1 %2512 }
 0x4dd   :  { %v2257_v25 = vpop.permute.xlu0 %2256 }
 0x4de   :  { %v3071_v52 = vsel %vm3046_vm7, %v3006_v20, %v2257_v25 }
 0x4df   :  { %v3136_v36 = vsel %vm3111_vm8, %v3071_v52, %v2513_v35  ;;  %v4688_v52 = vld [vmem:[%s10095_s0 + $0x262] sm:$0xff] }
 0x4e0   :  { %4734 = vmatmul.msk.f32.gmra.mxu1 %vm3185_vm9, %v3136_v36  ;;  %v4573_v36 = vld [vmem:[%s10095_s0 + $0x300] sm:$0xff] }
 0x4e2   :  { %2548 = vrot.lane.b32.xlu2 %v4687_v32, %s4901_s22  ;;  %2062 = vrot.lane.b32.xlu1 %v4572_v11, %s4900_s25  ;;  %v4843_v32 = vld [vmem:[%s10095_s0 + $0x128] sm:$0xff] }
 0x4e3   :  { %2292 = vrot.lane.b32.xlu0 %v4623_v58, %s4902_s9  ;;  %v10578_v11 = vld [vmem:[#allocation26_spill] sm:$0xff] }
 0x4e4   :  { %v8214_v63 = vpop.permute.xlu2 %1982  ;;  %v2237_v21 = vpop.permute.xlu1 %2236  ;;  %v2682_v58 = vsel %vm2656_vm1, %v4843_v32, %v10578_v11  ;;  %v10594_v11 = vld [vmem:[#allocation98_spill] sm:$0xff] }
 0x4e5   :  { %v2029_v7 = vpop.permute.xlu0 %2028  ;;  %v2747_v42 = vsel %vm2721_vm3, %v2682_v58, %v10579_v46 }
 0x4e6   :  { %v3020_v18 = vsel %vm2981_vm5, %v2955_v49, %v2029_v7  ;;  %v2812_v23 = vsel %vm2786_vm2, %v2747_v42, %v10580_v2  ;;  %v10596_v42 = vld [vmem:[#allocation224_spill] sm:$0xff] }
 0x4e7   :  { %v3085_v37 = vsel %vm3046_vm7, %v3020_v18, %v8125_v40  ;;  %v2801_v40 = vsel %vm2786_vm2, %v2736_v55, %v10570_v27  ;;  %v2877_v8 = vsel %vm2851_vm4, %v2812_v23, %v10581_v10  ;;  %v10586_v27 = vld [vmem:[#allocation212_spill] sm:$0xff] }
 0x4e8   :  { %v3150_v44 = vsel %vm3111_vm8, %v3085_v37, %v2541_v48  ;;  %v2866_v47 = vsel %vm2851_vm4, %v2801_v40, %v10571_v19  ;;  %v2942_v30 = vsel %vm2916_vm6, %v2877_v8, %v10582_v38  ;;  %v4844_v37 = vld [vmem:[%s10095_s0 + $0x200] sm:$0xff]  ;;  %v10597_v23 = vld [vmem:[#allocation268_spill] sm:$0xff] }
 0x4e9   :  { %4748 = vmatmul.msk.f32.gmra.mxu2 %vm3185_vm9, %v3150_v44  ;;  %v2931_v50 = vsel %vm2916_vm6, %v2866_v47, %v10572_v34  ;;  %v10585_v44 = vld [vmem:[#allocation142_spill] sm:$0xff] }
 0x4ea   :  { %2574 = vrot.lane.b32.xlu2 %v4700_v41, %s4901_s22  ;;  %2010 = vrot.lane.b32.xlu1 %v4546_v6, %s4900_s25  ;;  %v2996_v59 = vsel %vm2981_vm5, %v2931_v50, %v8089_v57  ;;  %v4842_v57 = vld [vmem:[%s10095_s0 + $0x290] sm:$0xff]  ;;  %v10583_v41 = vld [vmem:[#allocation41_spill] sm:$0xff]  ;;  %v10587_v47 = vld [vmem:[#allocation266_spill] sm:$0xff] }
 0x4eb   :  { %2318 = vrot.lane.b32.xlu0 %v4636_v22, %s4902_s9  ;;  %v3061_v48 = vsel %vm3046_vm7, %v2996_v59, %v2237_v21  ;;  %v2708_v26 = vsel %vm2656_vm1, %v4842_v57, %v10573_v13  ;;  %v2696_v6 = vsel %vm2656_vm1, %v4844_v37, %v10583_v41  ;;  %v4574_v57 = vld [vmem:[%s10095_s0 + $0x308] sm:$0xff]  ;;  %v10589_v13 = vld [vmem:[#allocation72_spill] sm:$0xff]  ;;  %v10599_v41 = vld [vmem:[#allocation85_spill] sm:$0xff] }
 0x4ec   :  { %v8250_v53 = vpop.permute.xlu2 %2286  ;;  %v2493_v56 = vpop.permute.xlu1 %2492  ;;  %v2773_v43 = vsel %vm2721_vm3, %v2708_v26, %v10574_v45  ;;  %v2761_v55 = vsel %vm2721_vm3, %v2696_v6, %v10584_v54  ;;  %v4625_v45 = vld [vmem:[%s10095_s0 + $0x271] sm:$0xff] }
 0x4ed   :  { %v2055_v15 = vpop.permute.xlu0 %2054  ;;  %v3126_v1 = vsel %vm3111_vm8, %v3061_v48, %v2493_v56  ;;  %v2838_v39 = vsel %vm2786_vm2, %v2773_v43, %v10575_v60  ;;  %v2826_v22 = vsel %vm2786_vm2, %v2761_v55, %v10585_v44  ;;  %v4845_v56 = vld [vmem:[%s10095_s0 + $0xb0] sm:$0xff]  ;;  %v10590_v43 = vld [vmem:[#allocation121_spill] sm:$0xff]  ;;  %v10591_v60 = vld [vmem:[#allocation188_spill] sm:$0xff] }
 0x4ee   :  { %4724 = vmatmul.msk.f32.gmra.mxu0 %vm3185_vm9, %v3126_v1  ;;  %v2903_v31 = vsel %vm2851_vm4, %v2838_v39, %v10576_v61  ;;  %v2891_v40 = vsel %vm2851_vm4, %v2826_v22, %v10586_v27  ;;  %v10592_v61 = vld [vmem:[#allocation248_spill] sm:$0xff]  ;;  %v10601_v55 = vld [vmem:[#allocation187_spill] sm:$0xff] }
 0x4ef   :  { %v2968_v33 = vsel %vm2916_vm6, %v2903_v31, %v10577_v9  ;;  %v2956_v34 = vsel %vm2916_vm6, %v2891_v40, %v10587_v47  ;;  %v10602_v22 = vld [vmem:[#allocation259_spill] sm:$0xff] }
 0x4f0   :  { %v3033_v29 = vsel %vm2981_vm5, %v2968_v33, %v2055_v15  ;;  %v10588_v15 = vld [vmem:[#allocation18_spill] sm:$0xff] }
 0x4f1   :  { %v2672_v1 = vsel %vm2656_vm1, %v4845_v56, %v10588_v15  ;;  %v4703_v56 = vld [vmem:[%s10095_s0 + $0x31a] sm:$0xff] }
 0x4f2   :  { %2038 = vrot.lane.b32.xlu2 %v4560_v17, %s4900_s25  ;;  %2522 = vrot.lane.b32.xlu1 %v4674_v4, %s4901_s22  ;;  %v4689_v4 = vld [vmem:[%s10095_s0 + $0x272] sm:$0xff]  ;;  %v2737_v26 = vsel %vm2721_vm3, %v2672_v1, %v10589_v13  ;;  %v10604_v13 = vld [vmem:[#allocation86_spill] sm:$0xff] }
 0x4f3   :  { %2266 = vrot.lane.b32.xlu0 %v4610_v3, %s4902_s9  ;;  %v4639_v1 = vld [vmem:[%s10095_s0 + $0x319] sm:$0xff] }
 0x4f4   :  { %v2543_v14 = vpop.permute.xlu2 %2542  ;;  %v2003_v16 = vpop.permute.xlu1 %2002 }
 0x4f5   :  { %v2311_v20 = vpop.permute.xlu0 %2310  ;;  %v3007_v24 = vsel %vm2981_vm5, %v2942_v30, %v2003_v16 }
 0x4f6   :  { %v3098_v35 = vsel %vm3046_vm7, %v3033_v29, %v2311_v20 }
 0x4f7   :  { %v3163_v25 = vsel %vm3111_vm8, %v3098_v35, %v8185_v51  ;;  %v4624_v51 = vld [vmem:[%s10095_s0 + $0x261] sm:$0xff]  ;;  %v4562_v35 = vld [vmem:[%s10095_s0 + $0x278] sm:$0xff] }
 0x4f8   :  { %4761 = vmatmul.msk.f32.gmra.mxu3 %vm3185_vm9, %v3163_v25  ;;  %v4702_v25 = vld [vmem:[%s10095_s0 + $0x30a] sm:$0xff] }
 0x4fa   :  { %2550 = vrot.lane.b32.xlu2 %v4688_v52, %s4901_s22  ;;  %2064 = vrot.lane.b32.xlu1 %v4573_v36, %s4900_s25  ;;  %v4846_v52 = vld [vmem:[%s10095_s0 + $0x2a0] sm:$0xff]  ;;  %v10593_v36 = vld [vmem:[#allocation52_spill] sm:$0xff] }
 0x4fb   :  { %2294 = vrot.lane.b32.xlu0 %v4624_v51, %s4902_s9  ;;  %v2709_v32 = vsel %vm2656_vm1, %v4846_v52, %v10593_v36  ;;  %v10595_v51 = vld [vmem:[#allocation168_spill] sm:$0xff]  ;;  %v10609_v36 = vld [vmem:[#allocation111_spill] sm:$0xff] }
 0x4fc   :  { %v8310_v0 = vpop.permute.xlu2 %2568  ;;  %v2515_v49 = vpop.permute.xlu1 %2514  ;;  %v2774_v58 = vsel %vm2721_vm3, %v2709_v32, %v10594_v11 }
 0x4fd   :  { %v2259_v21 = vpop.permute.xlu0 %2258  ;;  %v2839_v46 = vsel %vm2786_vm2, %v2774_v58, %v10595_v51  ;;  %v10611_v58 = vld [vmem:[#allocation213_spill] sm:$0xff] }
 0x4fe   :  { %v3072_v7 = vsel %vm3046_vm7, %v3007_v24, %v2259_v21  ;;  %v2904_v2 = vsel %vm2851_vm4, %v2839_v46, %v10596_v42  ;;  %v4690_v21 = vld [vmem:[%s10095_s0 + $0x27a] sm:$0xff]  ;;  %v10612_v46 = vld [vmem:[#allocation279_spill] sm:$0xff] }
 0x4ff   :  { %v3137_v18 = vsel %vm3111_vm8, %v3072_v7, %v2515_v49  ;;  %v2969_v10 = vsel %vm2916_vm6, %v2904_v2, %v10597_v23  ;;  %v4575_v7 = vld [vmem:[%s10095_s0 + $0x318] sm:$0xff] }
 0x500   :  { %4735 = vmatmul.msk.f32.gmra.mxu1 %vm3185_vm9, %v3137_v18 }
 0x502   :  { %2040 = vrot.lane.b32.xlu2 %v4561_v5, %s4900_s25  ;;  %2576 = vrot.lane.b32.xlu1 %v4701_v62, %s4901_s22  ;;  %v4626_v5 = vld [vmem:[%s10095_s0 + $0x279] sm:$0xff] }
 0x503   :  { %2320 = vrot.lane.b32.xlu0 %v4637_v12, %s4902_s9  ;;  %v4847_v62 = vld [vmem:[%s10095_s0 + $0x138] sm:$0xff]  ;;  %v10598_v12 = vld [vmem:[#allocation17_spill] sm:$0xff] }
 0x504   :  { %v8339_v19 = vpop.permute.xlu2 %2032  ;;  %v2239_v50 = vpop.permute.xlu1 %2238  ;;  %v2683_v37 = vsel %vm2656_vm1, %v4847_v62, %v10598_v12  ;;  %v10613_v62 = vld [vmem:[#allocation30_spill] sm:$0xff] }
 0x505   :  { %v2031_v59 = vpop.permute.xlu0 %2030  ;;  %v2748_v6 = vsel %vm2721_vm3, %v2683_v37, %v10599_v41  ;;  %v10614_v37 = vld [vmem:[#allocation84_spill] sm:$0xff] }
 0x506   :  { %v3021_v48 = vsel %vm2981_vm5, %v2956_v34, %v2031_v59 }
 0x507   :  { %v3086_v17 = vsel %vm3046_vm7, %v3021_v48, %v8250_v53  ;;  %v2802_v53 = vsel %vm2786_vm2, %v2737_v26, %v10590_v43  ;;  %v4563_v48 = vld [vmem:[%s10095_s0 + $0x288] sm:$0xff]  ;;  %v10606_v43 = vld [vmem:[#allocation211_spill] sm:$0xff] }
 0x508   :  { %v3151_v3 = vsel %vm3111_vm8, %v3086_v17, %v2543_v14  ;;  %v2867_v39 = vsel %vm2851_vm4, %v2802_v53, %v10591_v60  ;;  %v4848_v17 = vld [vmem:[%s10095_s0 + $0x210] sm:$0xff]  ;;  %v10607_v60 = vld [vmem:[#allocation260_spill] sm:$0xff] }
 0x509   :  { %4749 = vmatmul.msk.f32.gmra.mxu2 %vm3185_vm9, %v3151_v3  ;;  %v2932_v31 = vsel %vm2916_vm6, %v2867_v39, %v10592_v61  ;;  %v10605_v3 = vld [vmem:[#allocation156_spill] sm:$0xff] }
 0x50a   :  { %2552 = vrot.lane.b32.xlu2 %v4689_v4, %s4901_s22  ;;  %2066 = vrot.lane.b32.xlu1 %v4574_v57, %s4900_s25  ;;  %v2997_v9 = vsel %vm2981_vm5, %v2932_v31, %v8214_v63  ;;  %v4638_v63 = vld [vmem:[%s10095_s0 + $0x309] sm:$0xff]  ;;  %v10603_v4 = vld [vmem:[#allocation40_spill] sm:$0xff] }
 0x50b   :  { %2296 = vrot.lane.b32.xlu0 %v4625_v45, %s4902_s9  ;;  %v3062_v33 = vsel %vm3046_vm7, %v2997_v9, %v2239_v50  ;;  %v2697_v57 = vsel %vm2656_vm1, %v4848_v17, %v10603_v4  ;;  %v4851_v17 = vld [vmem:[%s10095_s0 + $0x218] sm:$0xff]  ;;  %v10618_v4 = vld [vmem:[#allocation31_spill] sm:$0xff] }
 0x50c   :  { %v8376_v14 = vpop.permute.xlu2 %2544  ;;  %v2495_v29 = vpop.permute.xlu1 %2494  ;;  %v2762_v26 = vsel %vm2721_vm3, %v2697_v57, %v10604_v13  ;;  %v2698_v57 = vsel %vm2656_vm1, %v4851_v17, %v10618_v4  ;;  %v10619_v13 = vld [vmem:[#allocation100_spill] sm:$0xff]  ;;  %v4854_v17 = vld [vmem:[%s10095_s0 + $0x228] sm:$0xff] }
 0x50d   :  { %v2057_v16 = vpop.permute.xlu0 %2056  ;;  %v3127_v20 = vsel %vm3111_vm8, %v3062_v33, %v2495_v29  ;;  %v2827_v45 = vsel %vm2786_vm2, %v2762_v26, %v10605_v3  ;;  %v2763_v26 = vsel %vm2721_vm3, %v2698_v57, %v10619_v13  ;;  %v10620_v3 = vld [vmem:[#allocation155_spill] sm:$0xff]  ;;  %v10633_v4 = vld [vmem:[#allocation44_spill] sm:$0xff] }
 0x50e   :  { %4725 = vmatmul.msk.f32.gmra.mxu0 %vm3185_vm9, %v3127_v20  ;;  %v3034_v30 = vsel %vm2981_vm5, %v2969_v10, %v2057_v16  ;;  %v2892_v53 = vsel %vm2851_vm4, %v2827_v45, %v10606_v43  ;;  %v4691_v16 = vld [vmem:[%s10095_s0 + $0x28a] sm:$0xff]  ;;  %v4576_v20 = vld [vmem:[%s10095_s0 + $0x320] sm:$0xff]  ;;  %v8503_v10 = vpop.f32.mrf.mxu0  ;;  %v2828_v45 = vsel %vm2786_vm2, %v2763_v26, %v10620_v3  ;;  %v2699_v57 = vsel %vm2656_vm1, %v4854_v17, %v10633_v4 }
 0x50f   :  { %v2957_v39 = vsel %vm2916_vm6, %v2892_v53, %v10607_v60  ;;  %v10621_v43 = vld [vmem:[#allocation201_spill] sm:$0xff]  ;;  %v10622_v60 = vld [vmem:[#allocation270_spill] sm:$0xff]  ;;  %v10634_v13 = vld [vmem:[#allocation99_spill] sm:$0xff] }
 0x510   :  { %v3022_v9 = vsel %vm2981_vm5, %v2957_v39, %v8339_v19  ;;  %v4849_v19 = vld [vmem:[%s10095_s0 + $0x2a8] sm:$0xff]  ;;  %v2893_v53 = vsel %vm2851_vm4, %v2828_v45, %v10621_v43  ;;  %v2764_v26 = vsel %vm2721_vm3, %v2699_v57, %v10634_v13  ;;  %v10635_v3 = vld [vmem:[#allocation145_spill] sm:$0xff]  ;;  %v10636_v43 = vld [vmem:[#allocation215_spill] sm:$0xff] }
 0x511   :  { %v2958_v39 = vsel %vm2916_vm6, %v2893_v53, %v10622_v60  ;;  %v2829_v45 = vsel %vm2786_vm2, %v2764_v26, %v10635_v3  ;;  %v10637_v60 = vld [vmem:[#allocation269_spill] sm:$0xff]  ;;  %v10650_v17 = vld [vmem:[#allocation159_spill] sm:$0xff]  ;;  %v10651_v57 = vld [vmem:[#allocation214_spill] sm:$0xff] }
 0x512   :  { %2042 = vrot.lane.b32.xlu2 %v4562_v35, %s4900_s25  ;;  %2578 = vrot.lane.b32.xlu1 %v4702_v25, %s4901_s22  ;;  %v4627_v25 = vld [vmem:[%s10095_s0 + $0x289] sm:$0xff]  ;;  %v2894_v53 = vsel %vm2851_vm4, %v2829_v45, %v10636_v43 }
 0x513   :  { %2322 = vrot.lane.b32.xlu0 %v4638_v63, %s4902_s9  ;;  %v10608_v63 = vld [vmem:[#allocation42_spill] sm:$0xff] }
 0x514   :  { %v8405_v8 = vpop.permute.xlu2 %2570  ;;  %v2005_v38 = vpop.permute.xlu1 %2004  ;;  %v2710_v52 = vsel %vm2656_vm1, %v4849_v19, %v10608_v63  ;;  %v10623_v19 = vld [vmem:[#allocation55_spill] sm:$0xff]  ;;  %v10652_v26 = vld [vmem:[#allocation262_spill] sm:$0xff] }
 0x515   :  { %v2313_v24 = vpop.permute.xlu0 %2312  ;;  %v2775_v32 = vsel %vm2721_vm3, %v2710_v52, %v10609_v36  ;;  %v10624_v36 = vld [vmem:[#allocation110_spill] sm:$0xff] }
 0x516   :  { %v3099_v49 = vsel %vm3046_vm7, %v3034_v30, %v2313_v24 }
 0x517   :  { %v3164_v18 = vsel %vm3111_vm8, %v3099_v49, %v8310_v0  ;;  %v10600_v0 = vld [vmem:[#allocation140_spill] sm:$0xff]  ;;  %v4577_v49 = vld [vmem:[%s10095_s0 + $0x330] sm:$0xff] }
 0x518   :  { %4762 = vmatmul.msk.f32.gmra.mxu3 %vm3185_vm9, %v3164_v18  ;;  %v2813_v54 = vsel %vm2786_vm2, %v2748_v6, %v10600_v0  ;;  %v4640_v18 = vld [vmem:[%s10095_s0 + $0x321] sm:$0xff]  ;;  %v10616_v0 = vld [vmem:[#allocation200_spill] sm:$0xff] }
 0x519   :  { %v2878_v44 = vsel %vm2851_vm4, %v2813_v54, %v10601_v55  ;;  %v10617_v55 = vld [vmem:[#allocation258_spill] sm:$0xff] }
 0x51a   :  { %2554 = vrot.lane.b32.xlu2 %v4690_v21, %s4901_s22  ;;  %2068 = vrot.lane.b32.xlu1 %v4575_v7, %s4900_s25  ;;  %v2943_v27 = vsel %vm2916_vm6, %v2878_v44, %v10602_v22  ;;  %v4704_v21 = vld [vmem:[%s10095_s0 + $0x322] sm:$0xff] }
 0x51b   :  { %2298 = vrot.lane.b32.xlu0 %v4626_v5, %s4902_s9  ;;  %v3008_v34 = vsel %vm2981_vm5, %v2943_v27, %v2005_v38  ;;  %v4850_v5 = vld [vmem:[%s10095_s0 + $0x140] sm:$0xff] }
 0x51c   :  { %v8437_v40 = vpop.permute.xlu2 %2034  ;;  %v2517_v47 = vpop.permute.xlu1 %2516  ;;  %v2684_v12 = vsel %vm2656_vm1, %v4850_v5, %v10613_v62  ;;  %v4853_v5 = vld [vmem:[%s10095_s0 + $0x150] sm:$0xff]  ;;  %v10628_v62 = vld [vmem:[#allocation29_spill] sm:$0xff] }
 0x51d   :  { %v2261_v50 = vpop.permute.xlu0 %2260  ;;  %v2749_v41 = vsel %vm2721_vm3, %v2684_v12, %v10614_v37  ;;  %v2685_v12 = vsel %vm2656_vm1, %v4853_v5, %v10628_v62  ;;  %v10629_v37 = vld [vmem:[#allocation74_spill] sm:$0xff]  ;;  %v10645_v62 = vld [vmem:[#allocation143_spill] sm:$0xff] }
 0x51e   :  { %v3073_v59 = vsel %vm3046_vm7, %v3008_v34, %v2261_v50 }
 0x51f   :  { %v3138_v15 = vsel %vm3111_vm8, %v3073_v59, %v2517_v47  ;;  %v4578_v59 = vld [vmem:[%s10095_s0 + $0x338] sm:$0xff] }
 0x520   :  { %4736 = vmatmul.msk.f32.gmra.mxu1 %vm3185_vm9, %v3138_v15 }
 0x522   :  { %2044 = vrot.lane.b32.xlu2 %v4563_v48, %s4900_s25  ;;  %2580 = vrot.lane.b32.xlu1 %v4703_v56, %s4901_s22  ;;  %v4705_v48 = vld [vmem:[%s10095_s0 + $0x332] sm:$0xff]  ;;  %v8545_v56 = vpop.f32.mrf.mxu0 }
 0x523   :  { %2324 = vrot.lane.b32.xlu0 %v4639_v1, %s4902_s9  ;;  %v4641_v1 = vld [vmem:[%s10095_s0 + $0x331] sm:$0xff] }
 0x524   :  { %v8468_v61 = vpop.permute.xlu2 %2546  ;;  %v2059_v31 = vpop.permute.xlu1 %2058 }
 0x525   :  { %v2289_v33 = vpop.permute.xlu0 %2288 }
 0x526   :  { %v3087_v29 = vsel %vm3046_vm7, %v3022_v9, %v2289_v33  ;;  %v3023_v9 = vsel %vm2981_vm5, %v2958_v39, %v8437_v40  ;;  %v4852_v40 = vld [vmem:[%s10095_s0 + $0x2b8] sm:$0xff]  ;;  %v2959_v39 = vsel %vm2916_vm6, %v2894_v53, %v10637_v60 }
 0x527   :  { %v3152_v35 = vsel %vm3111_vm8, %v3087_v29, %v8376_v14  ;;  %v10610_v14 = vld [vmem:[#allocation167_spill] sm:$0xff]  ;;  %v2711_v63 = vsel %vm2656_vm1, %v4852_v40, %v10623_v19  ;;  %v10638_v40 = vld [vmem:[#allocation54_spill] sm:$0xff] }
 0x528   :  { %4750 = vmatmul.msk.f32.gmra.mxu2 %vm3185_vm9, %v3152_v35  ;;  %v2840_v11 = vsel %vm2786_vm2, %v2775_v32, %v10610_v14  ;;  %v2776_v32 = vsel %vm2721_vm3, %v2711_v63, %v10624_v36  ;;  %v10639_v63 = vld [vmem:[#allocation101_spill] sm:$0xff] }
 0x529   :  { %v2905_v51 = vsel %vm2851_vm4, %v2840_v11, %v10611_v58  ;;  %v10626_v58 = vld [vmem:[#allocation227_spill] sm:$0xff] }
 0x52a   :  { %2556 = vrot.lane.b32.xlu2 %v4691_v16, %s4901_s22  ;;  %2070 = vrot.lane.b32.xlu1 %v4576_v20, %s4900_s25  ;;  %v2970_v42 = vsel %vm2916_vm6, %v2905_v51, %v10612_v46  ;;  %v4579_v16 = vld [vmem:[%s10095_s0 + $0x348] sm:$0xff]  ;;  %v4706_v20 = vld [vmem:[%s10095_s0 + $0x33a] sm:$0xff]  ;;  %v8590_v14 = vpop.f32.mrf.mxu0 }
 0x52b   :  { %2300 = vrot.lane.b32.xlu0 %v4627_v25, %s4902_s9  ;;  %v3035_v38 = vsel %vm2981_vm5, %v2970_v42, %v2059_v31  ;;  %v4642_v25 = vld [vmem:[%s10095_s0 + $0x339] sm:$0xff]  ;;  %v10627_v46 = vld [vmem:[#allocation278_spill] sm:$0xff] }
 0x52c   :  { %v8501_v2 = vpop.permute.xlu2 %2572  ;;  %v2007_v23 = vpop.permute.xlu1 %2006 }
 0x52d   :  { %v2315_v30 = vpop.permute.xlu0 %2314 }
 0x52e   :  { %v3100_v24 = vsel %vm3046_vm7, %v3035_v38, %v2315_v30 }
 0x52f   :  { %v3165_v7 = vsel %vm3111_vm8, %v3100_v24, %v8405_v8  ;;  %v10615_v8 = vld [vmem:[#allocation131_spill] sm:$0xff] }
 0x530   :  { %4763 = vmatmul.msk.f32.gmra.mxu3 %vm3185_vm9, %v3165_v7  ;;  %v2814_v6 = vsel %vm2786_vm2, %v2749_v41, %v10615_v8  ;;  %v2750_v41 = vsel %vm2721_vm3, %v2685_v12, %v10629_v37  ;;  %v10646_v37 = vld [vmem:[#allocation189_spill] sm:$0xff] }
 0x531   :  { %v2879_v54 = vsel %vm2851_vm4, %v2814_v6, %v10616_v0  ;;  %v10631_v0 = vld [vmem:[#allocation199_spill] sm:$0xff] }
 0x532   :  { %2072 = vrot.lane.b32.xlu2 %v4577_v49, %s4900_s25  ;;  %2582 = vrot.lane.b32.xlu1 %v4704_v21, %s4901_s22  ;;  %v2944_v44 = vsel %vm2916_vm6, %v2879_v54, %v10617_v55  ;;  %v4580_v49 = vld [vmem:[%s10095_s0 + $0x350] sm:$0xff]  ;;  %v8629_v55 = vpop.f32.mrf.mxu0 }
 0x533   :  { %2326 = vrot.lane.b32.xlu0 %v4640_v18, %s4902_s9  ;;  %v3009_v27 = vsel %vm2981_vm5, %v2944_v44, %v2007_v23  ;;  %v4707_v21 = vld [vmem:[%s10095_s0 + $0x34a] sm:$0xff] }
 0x534   :  { %v2519_v22 = vpop.permute.xlu1 %2518  ;;  %v8536_v34 = vpop.permute.xlu2 %2036  ;;  %v4643_v18 = vld [vmem:[%s10095_s0 + $0x349] sm:$0xff] }
 0x535   :  { %v2263_v47 = vpop.permute.xlu0 %2262  ;;  %v10632_v44 = vld [vmem:[#allocation250_spill] sm:$0xff] }
 0x536   :  { %v3074_v50 = vsel %vm3046_vm7, %v3009_v27, %v2263_v47 }
 0x537   :  { %v3139_v15 = vsel %vm3111_vm8, %v3074_v50, %v2519_v22 }
 0x538   :  { %4737 = vmatmul.msk.f32.gmra.mxu1 %vm3185_vm9, %v3139_v15 }
 0x53a   :  { %2074 = vrot.lane.b32.xlu2 %v4578_v59, %s4900_s25  ;;  %2584 = vrot.lane.b32.xlu1 %v4705_v48, %s4901_s22  ;;  %v4708_v48 = vld [vmem:[%s10095_s0 + $0x352] sm:$0xff] }
 0x53b   :  { %2328 = vrot.lane.b32.xlu0 %v4641_v1, %s4902_s9  ;;  %v4644_v1 = vld [vmem:[%s10095_s0 + $0x351] sm:$0xff] }
 0x53c   :  { %v2061_v31 = vpop.permute.xlu1 %2060  ;;  %v2549_v52 = vpop.permute.xlu2 %2548 }
 0x53d   :  { %v2291_v33 = vpop.permute.xlu0 %2290 }
 0x53e   :  { %v3088_v29 = vsel %vm3046_vm7, %v3023_v9, %v2291_v33  ;;  %v8658_v33 = vpop.f32.mrf.mxu0 }
 0x53f   :  { %v3153_v35 = vsel %vm3111_vm8, %v3088_v29, %v8468_v61  ;;  %v10625_v61 = vld [vmem:[#allocation157_spill] sm:$0xff]  ;;  %v3024_v29 = vsel %vm2981_vm5, %v2959_v39, %v8536_v34 }
 0x540   :  { %4751 = vmatmul.msk.f32.gmra.mxu2 %vm3185_vm9, %v3153_v35  ;;  %v2841_v11 = vsel %vm2786_vm2, %v2776_v32, %v10625_v61  ;;  %v10640_v32 = vld [vmem:[#allocation170_spill] sm:$0xff] }
 0x541   :  { %v2906_v51 = vsel %vm2851_vm4, %v2841_v11, %v10626_v58  ;;  %v10641_v61 = vld [vmem:[#allocation226_spill] sm:$0xff]  ;;  %v10642_v58 = vld [vmem:[#allocation271_spill] sm:$0xff] }
 0x542   :  { %2076 = vrot.lane.b32.xlu2 %v4579_v16, %s4900_s25  ;;  %2586 = vrot.lane.b32.xlu1 %v4706_v20, %s4901_s22  ;;  %v2971_v42 = vsel %vm2916_vm6, %v2906_v51, %v10627_v46 }
 0x543   :  { %2330 = vrot.lane.b32.xlu0 %v4642_v25, %s4902_s9  ;;  %v3036_v38 = vsel %vm2981_vm5, %v2971_v42, %v2061_v31  ;;  %v4855_v25 = vld [vmem:[%s10095_s0 + $0x2c0] sm:$0xff] }
 0x544   :  { %v2009_v23 = vpop.permute.xlu1 %2008  ;;  %v2575_v6 = vpop.permute.xlu2 %2574  ;;  %v2712_v19 = vsel %vm2656_vm1, %v4855_v25, %v10638_v40 }
 0x545   :  { %v2317_v30 = vpop.permute.xlu0 %2316  ;;  %v2777_v36 = vsel %vm2721_vm3, %v2712_v19, %v10639_v63  ;;  %v10656_v63 = vld [vmem:[#allocation217_spill] sm:$0xff] }
 0x546   :  { %v3101_v24 = vsel %vm3046_vm7, %v3036_v38, %v2317_v30  ;;  %v2842_v34 = vsel %vm2786_vm2, %v2777_v36, %v10640_v32  ;;  %v8680_v30 = vpop.f32.mrf.mxu0 }
 0x547   :  { %v3166_v7 = vsel %vm3111_vm8, %v3101_v24, %v8501_v2  ;;  %v10630_v2 = vld [vmem:[#allocation144_spill] sm:$0xff]  ;;  %v2907_v11 = vsel %vm2851_vm4, %v2842_v34, %v10641_v61 }
 0x548   :  { %4764 = vmatmul.msk.f32.gmra.mxu3 %vm3185_vm9, %v3166_v7  ;;  %v2815_v8 = vsel %vm2786_vm2, %v2750_v41, %v10630_v2  ;;  %v10647_v2 = vld [vmem:[#allocation261_spill] sm:$0xff] }
 0x549   :  { %v2880_v54 = vsel %vm2851_vm4, %v2815_v8, %v10631_v0 }
 0x54a   :  { %2078 = vrot.lane.b32.xlu2 %v4580_v49, %s4900_s25  ;;  %2588 = vrot.lane.b32.xlu1 %v4707_v21, %s4901_s22  ;;  %v2945_v22 = vsel %vm2916_vm6, %v2880_v54, %v10632_v44  ;;  %v4856_v49 = vld [vmem:[%s10095_s0 + $0x158] sm:$0xff]  ;;  %v10643_v21 = vld [vmem:[#allocation19_spill] sm:$0xff] }
 0x54b   :  { %2332 = vrot.lane.b32.xlu0 %v4643_v18, %s4902_s9  ;;  %v3010_v47 = vsel %vm2981_vm5, %v2945_v22, %v2009_v23  ;;  %v2686_v7 = vsel %vm2656_vm1, %v4856_v49, %v10643_v21  ;;  %v10644_v18 = vld [vmem:[#allocation88_spill] sm:$0xff] }
 0x54c   :  { %v2521_v27 = vpop.permute.xlu1 %2520  ;;  %v2039_v31 = vpop.permute.xlu2 %2038  ;;  %v2751_v5 = vsel %vm2721_vm3, %v2686_v7, %v10644_v18  ;;  %v10660_v21 = vld [vmem:[#allocation204_spill] sm:$0xff]  ;;  %v10661_v18 = vld [vmem:[#allocation273_spill] sm:$0xff] }
 0x54d   :  { %v2265_v50 = vpop.permute.xlu0 %2264  ;;  %v2816_v12 = vsel %vm2786_vm2, %v2751_v5, %v10645_v62 }
 0x54e   :  { %v3075_v59 = vsel %vm3046_vm7, %v3010_v47, %v2265_v50  ;;  %v2881_v41 = vsel %vm2851_vm4, %v2816_v12, %v10646_v37  ;;  %v8699_v22 = vpop.f32.mrf.mxu0  ;;  %v4857_v47 = vld [vmem:[%s10095_s0 + $0x230] sm:$0xff]  ;;  %v8754_v37 = vpop.f32.mrf.mxu1 }
 0x54f   :  { %v3140_v15 = vsel %vm3111_vm8, %v3075_v59, %v2521_v27  ;;  %v2946_v8 = vsel %vm2916_vm6, %v2881_v41, %v10647_v2  ;;  %v10648_v50 = vld [vmem:[#allocation43_spill] sm:$0xff] }
 0x550   :  { %4738 = vmatmul.msk.f32.gmra.mxu1 %vm3185_vm9, %v3140_v15  ;;  %v2700_v59 = vsel %vm2656_vm1, %v4857_v47, %v10648_v50  ;;  %v10649_v15 = vld [vmem:[#allocation89_spill] sm:$0xff]  ;;  %v10663_v47 = vld [vmem:[#allocation112_spill] sm:$0xff] }
 0x552   :  { %2590 = vrot.lane.b32.xlu1 %v4708_v48, %s4901_s22 }
 0x553   :  { %2334 = vrot.lane.b32.xlu0 %v4644_v1, %s4902_s9  ;;  %v2765_v1 = vsel %vm2721_vm3, %v2700_v59, %v10649_v15  ;;  %v10664_v59 = vld [vmem:[#allocation160_spill] sm:$0xff]  ;;  %v10665_v15 = vld [vmem:[#allocation230_spill] sm:$0xff] }
 0x554   :  { %v2063_v9 = vpop.permute.xlu1 %2062  ;;  %v2551_v23 = vpop.permute.xlu2 %2550  ;;  %v2830_v4 = vsel %vm2786_vm2, %v2765_v1, %v10650_v17  ;;  %v10666_v17 = vld [vmem:[#allocation280_spill] sm:$0xff] }
 0x555   :  { %v2293_v16 = vpop.permute.xlu0 %2292  ;;  %v2895_v13 = vsel %vm2851_vm4, %v2830_v4, %v10651_v57 }
 0x556   :  { %v3089_v20 = vsel %vm3046_vm7, %v3024_v29, %v2293_v16  ;;  %v2960_v3 = vsel %vm2916_vm6, %v2895_v13, %v10652_v26  ;;  %v8718_v39 = vpop.f32.mrf.mxu0  ;;  %v4858_v29 = vld [vmem:[%s10095_s0 + $0x2d0] sm:$0xff]  ;;  %v10653_v16 = vld [vmem:[#allocation45_spill] sm:$0xff]  ;;  %v8775_v13 = vpop.f32.mrf.mxu1 }
 0x557   :  { %v3154_v35 = vsel %vm3111_vm8, %v3089_v20, %v2549_v52  ;;  %v2972_v52 = vsel %vm2916_vm6, %v2907_v11, %v10642_v58  ;;  %v3025_v43 = vsel %vm2981_vm5, %v2960_v3, %v2039_v31  ;;  %v2713_v20 = vsel %vm2656_vm1, %v4858_v29, %v10653_v16  ;;  %v10655_v31 = vld [vmem:[#allocation169_spill] sm:$0xff]  ;;  %v10667_v29 = vld [vmem:[#allocation47_spill] sm:$0xff] }
 0x558   :  { %4752 = vmatmul.msk.f32.gmra.mxu2 %vm3185_vm9, %v3154_v35  ;;  %v3037_v46 = vsel %vm2981_vm5, %v2972_v52, %v2063_v9  ;;  %v10654_v35 = vld [vmem:[#allocation113_spill] sm:$0xff] }
 0x559   :  { %v2778_v25 = vsel %vm2721_vm3, %v2713_v20, %v10654_v35  ;;  %v10668_v20 = vld [vmem:[#allocation102_spill] sm:$0xff] }
 0x55a   :  { %v2843_v40 = vsel %vm2786_vm2, %v2778_v25, %v10655_v31  ;;  %v10669_v25 = vld [vmem:[#allocation148_spill] sm:$0xff] }
 0x55b   :  { %v2908_v36 = vsel %vm2851_vm4, %v2843_v40, %v10656_v63  ;;  %v10670_v40 = vld [vmem:[#allocation219_spill] sm:$0xff]  ;;  %v10671_v63 = vld [vmem:[#allocation272_spill] sm:$0xff] }
 0x55c   :  { %v2011_v51 = vpop.permute.xlu1 %2010  ;;  %v2041_v48 = vpop.permute.xlu2 %2040  ;;  %v2973_v32 = vsel %vm2916_vm6, %v2908_v36, %v7081_v28  ;;  %v10658_v28 = vld [vmem:[#allocation103_spill] sm:$0xff] }
 0x55d   :  { %v2319_v42 = vpop.permute.xlu0 %2318  ;;  %v3011_v0 = vsel %vm2981_vm5, %v2946_v8, %v2011_v51 }
 0x55e   :  { %v3102_v38 = vsel %vm3046_vm7, %v3037_v46, %v2319_v42  ;;  %v8737_v52 = vpop.f32.mrf.mxu0  ;;  %v4859_v46 = vld [vmem:[%s10095_s0 + $0x240] sm:$0xff] }
 0x55f   :  { %v3167_v24 = vsel %vm3111_vm8, %v3102_v38, %v2575_v6  ;;  %v10657_v42 = vld [vmem:[#allocation33_spill] sm:$0xff] }
 0x560   :  { %4765 = vmatmul.msk.f32.gmra.mxu3 %vm3185_vm9, %v3167_v24  ;;  %v10659_v24 = vld [vmem:[#allocation158_spill] sm:$0xff] }
 0x564   :  { %v2523_v6 = vpop.permute.xlu1 %2522  ;;  %v2553_v19 = vpop.permute.xlu2 %2552 }
 0x565   :  { %v2267_v54 = vpop.permute.xlu0 %2266 }
 0x566   :  { %v3076_v44 = vsel %vm3046_vm7, %v3011_v0, %v2267_v54  ;;  %v4860_v54 = vld [vmem:[%s10095_s0 + $0x2d8] sm:$0xff] }
 0x567   :  { %v3141_v27 = vsel %vm3111_vm8, %v3076_v44, %v2523_v6  ;;  %v8758_v6 = vpop.f32.mrf.mxu0  ;;  %v10662_v44 = vld [vmem:[#allocation57_spill] sm:$0xff] }
 0x568   :  { %4739 = vmatmul.msk.f32.gmra.mxu1 %vm3185_vm9, %v3141_v27  ;;  %v2714_v27 = vsel %vm2656_vm1, %v4860_v54, %v10662_v44 }
 0x569   :  { %v2779_v50 = vsel %vm2721_vm3, %v2714_v27, %v10663_v47 }
 0x56c   :  { %v2065_v45 = vpop.permute.xlu1 %2064  ;;  %v2043_v62 = vpop.permute.xlu2 %2042 }
 0x56d   :  { %v2295_v53 = vpop.permute.xlu0 %2294  ;;  %v3038_v61 = vsel %vm2981_vm5, %v2973_v32, %v2065_v45 }
 0x56e   :  { %v3090_v60 = vsel %vm3046_vm7, %v3025_v43, %v2295_v53 }
 0x56f   :  { %v3155_v9 = vsel %vm3111_vm8, %v3090_v60, %v2551_v23  ;;  %v2701_v23 = vsel %vm2656_vm1, %v4859_v46, %v10657_v42  ;;  %v8779_v53 = vpop.f32.mrf.mxu0  ;;  %v4862_v42 = vld [vmem:[%s10095_s0 + $0x2e8] sm:$0xff] }
 0x570   :  { %4753 = vmatmul.msk.f32.gmra.mxu2 %vm3185_vm9, %v3155_v9  ;;  %v2766_v38 = vsel %vm2721_vm3, %v2701_v23, %v10658_v28  ;;  %v4861_v9 = vld [vmem:[%s10095_s0 + $0x248] sm:$0xff]  ;;  %v10672_v23 = vld [vmem:[#allocation56_spill] sm:$0xff] }
 0x571   :  { %v2831_v49 = vsel %vm2786_vm2, %v2766_v38, %v10659_v24  ;;  %v2702_v16 = vsel %vm2656_vm1, %v4861_v9, %v10667_v29  ;;  %v2715_v28 = vsel %vm2656_vm1, %v4862_v42, %v10672_v23  ;;  %v10673_v24 = vld [vmem:[#allocation104_spill] sm:$0xff]  ;;  %v10684_v42 = vld [vmem:[#allocation171_spill] sm:$0xff] }
 0x572   :  { %v2896_v7 = vsel %vm2851_vm4, %v2831_v49, %v10660_v21  ;;  %v2767_v35 = vsel %vm2721_vm3, %v2702_v16, %v10668_v20  ;;  %v2780_v49 = vsel %vm2721_vm3, %v2715_v28, %v10673_v24  ;;  %v10674_v21 = vld [vmem:[#allocation172_spill] sm:$0xff] }
 0x573   :  { %v2961_v5 = vsel %vm2916_vm6, %v2896_v7, %v10661_v18  ;;  %v2832_v31 = vsel %vm2786_vm2, %v2767_v35, %v10669_v25  ;;  %v2845_v7 = vsel %vm2786_vm2, %v2780_v49, %v10674_v21  ;;  %v10675_v18 = vld [vmem:[#allocation229_spill] sm:$0xff]  ;;  %v10685_v24 = vld [vmem:[#allocation220_spill] sm:$0xff]  ;;  %v8896_v21 = vpop.f32.mrf.mxu2 }
 0x574   :  { %v2577_v34 = vpop.permute.xlu1 %2576  ;;  %v3026_v41 = vsel %vm2981_vm5, %v2961_v5, %v2041_v48  ;;  %v2844_v48 = vsel %vm2786_vm2, %v2779_v50, %v10664_v59  ;;  %v2555_v45 = vpop.permute.xlu2 %2554  ;;  %v2910_v5 = vsel %vm2851_vm4, %v2845_v7, %v10675_v18  ;;  %v4863_v59 = vld [vmem:[%s10095_s0 + $0x258] sm:$0xff] }
 0x575   :  { %v2321_v11 = vpop.permute.xlu0 %2320  ;;  %v2909_v1 = vsel %vm2851_vm4, %v2844_v48, %v10665_v15  ;;  %v10677_v48 = vld [vmem:[#allocation46_spill] sm:$0xff] }
 0x576   :  { %v3103_v58 = vsel %vm3046_vm7, %v3038_v61, %v2321_v11  ;;  %v2974_v4 = vsel %vm2916_vm6, %v2909_v1, %v10666_v17  ;;  %v2703_v15 = vsel %vm2656_vm1, %v4863_v59, %v10677_v48  ;;  %v10678_v17 = vld [vmem:[#allocation92_spill] sm:$0xff] }
 0x577   :  { %v3168_v51 = vsel %vm3111_vm8, %v3103_v58, %v2577_v34  ;;  %v8796_v34 = vpop.f32.mrf.mxu1 }
 0x578   :  { %4766 = vmatmul.msk.f32.gmra.mxu3 %vm3185_vm9, %v3168_v51  ;;  %v8800_v51 = vpop.f32.mrf.mxu0 }
 0x57c   :  { %v2067_v12 = vpop.permute.xlu1 %2066  ;;  %v2045_v38 = vpop.permute.xlu2 %2044 }
 0x57d   :  { %v2297_v2 = vpop.permute.xlu0 %2296  ;;  %v3039_v26 = vsel %vm2981_vm5, %v2974_v4, %v2067_v12  ;;  %v2768_v4 = vsel %vm2721_vm3, %v2703_v15, %v10678_v17  ;;  %v10687_v15 = vld [vmem:[#allocation60_spill] sm:$0xff] }
 0x57e   :  { %v3091_v8 = vsel %vm3046_vm7, %v3026_v41, %v2297_v2  ;;  %v8820_v41 = vld [vmem:[%s10097_s2] ss:$0 sm:$0xff] }
 0x57f   :  { %v3156_v0 = vsel %vm3111_vm8, %v3091_v8, %v2553_v19  ;;  %v2897_v19 = vsel %vm2851_vm4, %v2832_v31, %v10670_v40  ;;  %v8822_v8 = vpop.f32.mrf.mxu1  ;;  %v8827_v44 = vadd.f32 %v8820_v41, %v8545_v56  ;;  %v8838_v1 = vadd.f32 %v8820_v41, %v8503_v10 }
 0x580   :  { %4754 = vmatmul.msk.f32.gmra.mxu2 %vm3185_vm9, %v3156_v0  ;;  %v2962_v36 = vsel %vm2916_vm6, %v2897_v19, %v10671_v63  ;;  %v3435_v47 = vpop.f32.mrf.mxu0  ;;  %v8842_v56 = vadd.f32 %v8820_v41, %v8590_v14  ;;  %v8862_v16 = vadd.f32 %v8820_v41, %v8658_v33  ;;  %v8870_v40 = vadd.f32 %v8820_v41, %v8680_v30  ;;  %v4864_v33 = vld [vmem:[%s10095_s0 + $0x2f0] sm:$0xff]  ;;  %v10683_v30 = vld [vmem:[#allocation116_spill] sm:$0xff] }
 0x581   :  { %v3027_v61 = vsel %vm2981_vm5, %v2962_v36, %v2043_v62  ;;  %v10676_v62 = vld [vmem:[#allocation274_spill] sm:$0xff] }
 0x582   :  { %v2975_v12 = vsel %vm2916_vm6, %v2910_v5, %v10676_v62  ;;  %v8903_v5 = vadd.f32 %v8820_v41, %v8737_v52  ;;  %v4865_v52 = vld [vmem:[%s10095_s0 + $0x300] sm:$0xff] }
 0x583   :  { %v2717_v17 = vsel %vm2656_vm1, %v4865_v52, %v10687_v15 }
 0x584   :  { %v2579_v57 = vpop.permute.xlu1 %2578  ;;  %v2557_v10 = vpop.permute.xlu2 %2556 }
 0x585   :  { %v2323_v3 = vpop.permute.xlu0 %2322 }
 0x586   :  { %v3104_v43 = vsel %vm3046_vm7, %v3039_v26, %v2323_v3  ;;  %v3591_v3 = vadd.f32 %v8827_v44, %v8838_v1 }
 0x587   :  { %v3169_v60 = vsel %vm3111_vm8, %v3104_v43, %v2579_v57  ;;  %v10679_v57 = vld [vmem:[#allocation162_spill] sm:$0xff]  ;;  %v8864_v35 = vpop.f32.mrf.mxu1 }
 0x588   :  { %4767 = vmatmul.msk.f32.gmra.mxu3 %vm3185_vm9, %v3169_v60  ;;  %v2833_v26 = vsel %vm2786_vm2, %v2768_v4, %v10679_v57  ;;  %v10680_v43 = vld [vmem:[#allocation218_spill] sm:$0xff]  ;;  %v10681_v60 = vld [vmem:[#allocation263_spill] sm:$0xff]  ;;  %v3592_v29 = vadd.f32 %v3591_v3, %v8842_v56  ;;  %v3438_v63 = vpop.f32.mrf.mxu0  ;;  %v8923_v57 = vadd.f32 %v8820_v41, %v8779_v53  ;;  %v10691_v53 = vld [vmem:[#allocation281_spill] sm:$0xff] }
 0x589   :  { %v2898_v14 = vsel %vm2851_vm4, %v2833_v26, %v10680_v43  ;;  %v10689_v3 = vld [vmem:[#allocation163_spill] sm:$0xff] }
 0x58a   :  { %v2963_v9 = vsel %vm2916_vm6, %v2898_v14, %v10681_v60  ;;  %v8933_v14 = vadd.f32 %v8820_v41, %v8800_v51  ;;  %v10690_v60 = vld [vmem:[#allocation234_spill] sm:$0xff] }
 0x58b   :  { %v3028_v25 = vsel %vm2981_vm5, %v2963_v9, %v2045_v38  ;;  %v8892_v38 = vadd.f32 %v8820_v41, %v8718_v39 }
 0x58c   :  { %v2069_v32 = vpop.permute.xlu1 %2068  ;;  %v2073_v62 = vpop.permute.xlu2 %2072 }
 0x58d   :  { %v2299_v11 = vpop.permute.xlu0 %2298  ;;  %v3040_v0 = vsel %vm2981_vm5, %v2975_v12, %v2069_v32  ;;  %v10682_v32 = vld [vmem:[#allocation48_spill] sm:$0xff] }
 0x58e   :  { %v3092_v58 = vsel %vm3046_vm7, %v3027_v61, %v2299_v11  ;;  %v2716_v61 = vsel %vm2656_vm1, %v4864_v33, %v10682_v32  ;;  %v8950_v32 = vadd.f32 %v8820_v41, %v3438_v63  ;;  %v10693_v63 = vld [vmem:[#allocation107_spill] sm:$0xff] }
 0x58f   :  { %v3157_v46 = vsel %vm3111_vm8, %v3092_v58, %v2555_v45  ;;  %v8853_v45 = vadd.f32 %v8820_v41, %v8629_v55  ;;  %v8882_v58 = vadd.f32 %v8820_v41, %v8699_v22  ;;  %v10686_v22 = vld [vmem:[#allocation282_spill] sm:$0xff] }
 0x590   :  { %4755 = vmatmul.msk.f32.gmra.mxu2 %vm3185_vm9, %v3157_v46  ;;  %v2781_v46 = vsel %vm2721_vm3, %v2716_v61, %v10683_v30  ;;  %v3441_v59 = vpop.f32.mrf.mxu0 }
 0x591   :  { %v3593_v31 = vadd.f32 %v3592_v29, %v8853_v45  ;;  %v2846_v23 = vsel %vm2786_vm2, %v2781_v46, %v10684_v42  ;;  %v8937_v29 = vpop.f32.mrf.mxu2  ;;  %v10692_v42 = vld [vmem:[#allocation59_spill] sm:$0xff] }
 0x592   :  { %v2911_v49 = vsel %vm2851_vm4, %v2846_v23, %v10685_v24  ;;  %v8961_v24 = vadd.f32 %v8820_v41, %v3441_v59 }
 0x593   :  { %v3594_v11 = vadd.f32 %v3593_v31, %v8862_v16  ;;  %v2976_v7 = vsel %vm2916_vm6, %v2911_v49, %v10686_v22  ;;  %v10694_v22 = vld [vmem:[#allocation175_spill] sm:$0xff] }
 0x594   :  { %v2581_v2 = vpop.permute.xlu1 %2580  ;;  %v2075_v61 = vpop.permute.xlu2 %2074 }
 0x595   :  { %v2325_v54 = vpop.permute.xlu0 %2324  ;;  %v3595_v28 = vadd.f32 %v3594_v11, %v8870_v40 }
 0x596   :  { %v3105_v27 = vsel %vm3046_vm7, %v3040_v0, %v2325_v54 }
 0x597   :  { %v3170_v50 = vsel %vm3111_vm8, %v3105_v27, %v2581_v2  ;;  %v3596_v18 = vadd.f32 %v3595_v28, %v8882_v58  ;;  %v8905_v2 = vpop.f32.mrf.mxu1  ;;  %v8911_v27 = vadd.f32 %v8820_v41, %v8758_v6  ;;  %v10688_v6 = vld [vmem:[#allocation115_spill] sm:$0xff] }
 0x598   :  { %4768 = vmatmul.msk.f32.gmra.mxu3 %vm3185_vm9, %v3170_v50  ;;  %v2782_v26 = vsel %vm2721_vm3, %v2717_v17, %v10688_v6  ;;  %v3444_v30 = vpop.f32.mrf.mxu0 }
 0x599   :  { %v3597_v54 = vadd.f32 %v3596_v18, %v8892_v38 }
 0x59b   :  { %v3598_v4 = vadd.f32 %v3597_v54, %v8903_v5  ;;  %v10696_v54 = vld [vmem:[#allocation275_spill] sm:$0xff] }
 0x59c   :  { %v2071_v20 = vpop.permute.xlu1 %2070 }
 0x59d   :  { %v2301_v55 = vpop.permute.xlu0 %2300  ;;  %v3041_v39 = vsel %vm2981_vm5, %v2976_v7, %v2071_v20  ;;  %v3599_v43 = vadd.f32 %v3598_v4, %v8911_v27 }
 0x59e   :  { %v3093_v19 = vsel %vm3046_vm7, %v3028_v25, %v2301_v55  ;;  %v8943_v55 = vadd.f32 %v8820_v41, %v3435_v47  ;;  %v4866_v47 = vld [vmem:[%s10095_s0 + $0x308] sm:$0xff] }
 0x59f   :  { %v3158_v36 = vsel %vm3111_vm8, %v3093_v19, %v2557_v10  ;;  %v2847_v10 = vsel %vm2786_vm2, %v2782_v26, %v10689_v3  ;;  %v3600_v25 = vadd.f32 %v3599_v43, %v8923_v57  ;;  %v8945_v19 = vpop.f32.mrf.mxu1  ;;  %v2718_v23 = vsel %vm2656_vm1, %v4866_v47, %v10692_v42  ;;  %v4867_v3 = vld [vmem:[%s10095_s0 + $0x318] sm:$0xff] }
 0x5a0   :  { %4756 = vmatmul.msk.f32.gmra.mxu2 %vm3185_vm9, %v3158_v36  ;;  %v2912_v9 = vsel %vm2851_vm4, %v2847_v10, %v10690_v60  ;;  %v2783_v49 = vsel %vm2721_vm3, %v2718_v23, %v10693_v63  ;;  %v10697_v10 = vld [vmem:[#allocation51_spill] sm:$0xff]  ;;  %v8990_v60 = vadd.f32 %v8820_v41, %v8754_v37 }
 0x5a1   :  { %v2977_v20 = vsel %vm2916_vm6, %v2912_v9, %v10691_v53  ;;  %v3601_v33 = vadd.f32 %v3600_v25, %v8933_v14  ;;  %v2848_v7 = vsel %vm2786_vm2, %v2783_v49, %v10694_v22  ;;  %v2719_v43 = vsel %vm2656_vm1, %v4867_v3, %v10697_v10  ;;  %v2077_v9 = vpop.permute.xlu2 %2076  ;;  %v10698_v53 = vld [vmem:[#allocation119_spill] sm:$0xff]  ;;  %v10699_v25 = vld [vmem:[#allocation174_spill] sm:$0xff]  ;;  %v4868_v22 = vld [vmem:[%s10095_s0 + $0x320] sm:$0xff] }
 0x5a2   :  { %v3042_v36 = vsel %vm2981_vm5, %v2977_v20, %v2073_v62  ;;  %v8970_v62 = vadd.f32 %v8820_v41, %v3444_v30  ;;  %v2784_v20 = vsel %vm2721_vm3, %v2719_v43, %v10698_v53  ;;  %v9006_v30 = vadd.f32 %v8820_v41, %v8775_v13 }
 0x5a3   :  { %v3602_v28 = vadd.f32 %v3601_v33, %v8943_v55  ;;  %v9019_v13 = vadd.f32 %v8820_v41, %v8796_v34  ;;  %v9033_v34 = vadd.f32 %v8820_v41, %v8822_v8 }
 0x5a4   :  { %v2583_v12 = vpop.permute.xlu1 %2582 }
 0x5a5   :  { %v2327_v0 = vpop.permute.xlu0 %2326  ;;  %v3603_v18 = vadd.f32 %v3602_v28, %v8950_v32 }
 0x5a6   :  { %v3106_v50 = vsel %vm3046_vm7, %v3041_v39, %v2327_v0  ;;  %v8974_v0 = vpop.f32.mrf.mxu2 }
 0x5a7   :  { %v3171_v48 = vsel %vm3111_vm8, %v3106_v50, %v2583_v12  ;;  %v10695_v12 = vld [vmem:[#allocation233_spill] sm:$0xff]  ;;  %v3604_v59 = vadd.f32 %v3603_v18, %v8961_v24  ;;  %v3468_v52 = vpop.f32.mrf.mxu1 }
 0x5a8   :  { %4769 = vmatmul.msk.f32.gmra.mxu3 %vm3185_vm9, %v3171_v48  ;;  %v2913_v39 = vsel %vm2851_vm4, %v2848_v7, %v10695_v12  ;;  %v10702_v7 = vld [vmem:[#allocation62_spill] sm:$0xff] }
 0x5a9   :  { %v2978_v50 = vsel %vm2916_vm6, %v2913_v39, %v10696_v54  ;;  %v3605_v4 = vadd.f32 %v3604_v59, %v8970_v62  ;;  %v2720_v18 = vsel %vm2656_vm1, %v4868_v22, %v10702_v7  ;;  %v10703_v12 = vld [vmem:[#allocation118_spill] sm:$0xff] }
 0x5aa   :  { %v3043_v15 = vsel %vm2981_vm5, %v2978_v50, %v2075_v61  ;;  %v2785_v39 = vsel %vm2721_vm3, %v2720_v18, %v10703_v12  ;;  %v10704_v54 = vld [vmem:[#allocation166_spill] sm:$0xff] }
 0x5ab   :  { %v2850_v50 = vsel %vm2786_vm2, %v2785_v39, %v10704_v54 }
 0x5ac   :  { %v2585_v31 = vpop.permute.xlu1 %2584 }
 0x5ad   :  { %v2329_v51 = vpop.permute.xlu0 %2328 }
 0x5ae   :  { %v3107_v11 = vsel %vm3046_vm7, %v3042_v36, %v2329_v51  ;;  %v3606_v36 = vadd.f32 %v3605_v4, %v8990_v60  ;;  %v10700_v51 = vld [vmem:[#allocation223_spill] sm:$0xff]  ;;  %v9000_v61 = vpop.f32.mrf.mxu2 }
 0x5af   :  { %v3172_v46 = vsel %vm3111_vm8, %v3107_v11, %v2585_v31  ;;  %v2849_v31 = vsel %vm2786_vm2, %v2784_v20, %v10699_v25  ;;  %v10701_v11 = vld [vmem:[#allocation284_spill] sm:$0xff]  ;;  %v3471_v47 = vpop.f32.mrf.mxu1 }
 0x5b0   :  { %4770 = vmatmul.msk.f32.gmra.mxu3 %vm3185_vm9, %v3172_v46  ;;  %v2914_v33 = vsel %vm2851_vm4, %v2849_v31, %v10700_v51  ;;  %v3607_v28 = vadd.f32 %v3606_v36, %v9006_v30  ;;  %v9041_v31 = vadd.f32 %v8820_v41, %v8864_v35  ;;  %v9045_v36 = vpop.f32.mrf.mxu3 }
 0x5b1   :  { %v2979_v37 = vsel %vm2916_vm6, %v2914_v33, %v10701_v11  ;;  %v9049_v33 = vadd.f32 %v8820_v41, %v8905_v2  ;;  %v9064_v2 = vadd.f32 %v8820_v41, %v3471_v47 }
 0x5b2   :  { %v3044_v42 = vsel %vm2981_vm5, %v2979_v37, %v2077_v9  ;;  %v3608_v59 = vadd.f32 %v3607_v28, %v9019_v13  ;;  %v9060_v28 = vadd.f32 %v8820_v41, %v3468_v52 }
 0x5b4   :  { %v2587_v48 = vpop.permute.xlu1 %2586  ;;  %v3609_v53 = vadd.f32 %v3608_v59, %v9033_v34 }
 0x5b5   :  { %v2331_v17 = vpop.permute.xlu0 %2330 }
 0x5b6   :  { %v3108_v6 = vsel %vm3046_vm7, %v3043_v15, %v2331_v17  ;;  %v10705_v15 = vld [vmem:[#allocation236_spill] sm:$0xff]  ;;  %v3501_v4 = vpop.f32.mrf.mxu2  ;;  %v3610_v8 = vadd.f32 %v3609_v53, %v9041_v31 }
 0x5b7   :  { %v3173_v26 = vsel %vm3111_vm8, %v3108_v6, %v2587_v48  ;;  %v2079_v48 = vpop.permute.xlu2 %2078  ;;  %v2915_v17 = vsel %vm2851_vm4, %v2850_v50, %v10705_v15  ;;  %v10706_v6 = vld [vmem:[#allocation283_spill] sm:$0xff]  ;;  %v3474_v10 = vpop.f32.mrf.mxu1 }
 0x5b8   :  { %4771 = vmatmul.msk.f32.gmra.mxu3 %vm3185_vm9, %v3173_v26  ;;  %v2980_v26 = vsel %vm2916_vm6, %v2915_v17, %v10706_v6  ;;  %v3611_v37 = vadd.f32 %v3610_v8, %v9049_v33  ;;  %v9070_v18 = vadd.f32 %v8820_v41, %v3474_v10  ;;  %v9103_v8 = vadd.f32 %v8820_v41, %v8974_v0 }
 0x5b9   :  { %v3045_v43 = vsel %vm2981_vm5, %v2980_v26, %v2079_v48 }
 0x5ba   :  { %10709 = vst [vmem:[#allocation10_spill] sm:$0xff] %v9103_v8 }
 0x5bc   :  { %v2589_v46 = vpop.permute.xlu1 %2588 }
 0x5bd   :  { %v2333_v23 = vpop.permute.xlu0 %2332 }
 0x5be   :  { %v3109_v63 = vsel %vm3046_vm7, %v3044_v42, %v2333_v23  ;;  %v3504_v51 = vpop.f32.mrf.mxu2  ;;  %v9057_v42 = vpop.f32.mrf.mxu3 }
 0x5bf   :  { %v3174_v49 = vsel %vm3111_vm8, %v3109_v63, %v2589_v46  ;;  %v3477_v11 = vpop.f32.mrf.mxu1  ;;  %v9054_v46 = vadd.f32 %v8820_v41, %v8945_v19 }
 0x5c0   :  { %4772 = vmatmul.msk.f32.gmra.mxu3 %vm3185_vm9, %v3174_v49  ;;  %v9074_v52 = vadd.f32 %v8820_v41, %v3477_v11 }
 0x5c1   :  { %v3612_v35 = vadd.f32 %v3611_v37, %v9054_v46 }
 0x5c3   :  { %v3613_v49 = vadd.f32 %v3612_v35, %v9060_v28  ;;  %v9108_v35 = vadd.f32 %v8820_v41, %v9000_v61 }
 0x5c4   :  { %v2591_v3 = vpop.permute.xlu1 %2590 }
 0x5c5   :  { %v2335_v9 = vpop.permute.xlu0 %2334  ;;  %v3614_v22 = vadd.f32 %v3613_v49, %v9064_v2  ;;  %10710 = vst [vmem:[#allocation203_spill] sm:$0xff] %v9108_v35  ;;  %v9115_v49 = vadd.f32 %v8820_v41, %v3501_v4 }
 0x5c6   :  { %v3110_v20 = vsel %vm3046_vm7, %v3045_v43, %v2335_v9  ;;  %v3507_v23 = vpop.f32.mrf.mxu2  ;;  %v9067_v7 = vpop.f32.mrf.mxu3 }
 0x5c7   :  { %v3175_v25 = vsel %vm3111_vm8, %v3110_v20, %v2591_v3  ;;  %v3480_v63 = vpop.f32.mrf.mxu1  ;;  %v3615_v39 = vadd.f32 %v3614_v22, %v9070_v18  ;;  %v9092_v3 = vadd.f32 %v8820_v41, %v8896_v21  ;;  %v9098_v20 = vadd.f32 %v8820_v41, %v8937_v29  ;;  %v4145_v29 = vld [vmem:[%s10101_s6 + $0x18] sm:$0xff]  ;;  %10711 = vst [vmem:[#allocation64_spill] sm:$0xff] %v9115_v49 }
 0x5c8   :  { %4773 = vmatmul.msk.f32.gmra.mxu3 %vm3185_vm9, %v3175_v25  ;;  %v9077_v54 = vadd.f32 %v8820_v41, %v3480_v63  ;;  %4165 = vmatpush.msrb.mxu1 %v4145_v29 }
 0x5c9   :  { %v3616_v47 = vadd.f32 %v3615_v39, %v9074_v52  ;;  %10707 = vst [vmem:[#allocation87_spill] sm:$0xff] %v9092_v3  ;;  %v9119_v39 = vadd.f32 %v8820_v41, %v3504_v51 }
 0x5ca   :  { %10708 = vst [vmem:[#allocation133_spill] sm:$0xff] %v9098_v20 }
 0x5cb   :  { %v3617_v15 = vadd.f32 %v3616_v47, %v9077_v54  ;;  %10712 = vst [vmem:[#allocation114_spill] sm:$0xff] %v9119_v39  ;;  %v9123_v47 = vadd.f32 %v8820_v41, %v3507_v23 }
 0x5cd   :  { %10713 = vst [vmem:[#allocation180_spill] sm:$0xff] %v9123_v47 }
 0x5ce   :  { %v3510_v19 = vpop.f32.mrf.mxu2  ;;  %v9083_v59 = vpop.f32.mrf.mxu3 }
 0x5cf   :  { %v3483_v12 = vpop.f32.mrf.mxu1 }
 0x5d0   :  { %v9081_v50 = vadd.f32 %v8820_v41, %v3483_v12 }
 0x5d2   :  { %v3618_v6 = vadd.f32 %v3617_v15, %v9081_v50 }
 0x5d6   :  { %v3513_v48 = vpop.f32.mrf.mxu2  ;;  %v3552_v9 = vpop.f32.mrf.mxu3 }
 0x5de   :  { %v3516_v53 = vpop.f32.mrf.mxu2  ;;  %v3555_v21 = vpop.f32.mrf.mxu3 }
 0x5e5   :  { %v3486_v17 = vpop.f32.mrf.mxu1 }
 0x5e6   :  { %v9088_v26 = vadd.f32 %v8820_v41, %v3486_v17  ;;  %v3519_v37 = vpop.f32.mrf.mxu2  ;;  %v3558_v22 = vpop.f32.mrf.mxu3 }
 0x5e7   :  { %v9139_v29 = vadd.f32 %v8820_v41, %v3519_v37 }
 0x5e8   :  { %v3619_v10 = vadd.f32 %v3618_v6, %v9088_v26 }
 0x5e9   :  { %10717 = vst [vmem:[#allocation76_spill] sm:$0xff] %v9139_v29 }
 0x5ea   :  { %v3620_v43 = vadd.f32 %v3619_v10, %v9092_v3  ;;  %v9127_v10 = vadd.f32 %v8820_v41, %v3510_v19 }
 0x5ec   :  { %v3621_v25 = vadd.f32 %v3620_v43, %v9098_v20  ;;  %10714 = vst [vmem:[#allocation216_spill] sm:$0xff] %v9127_v10  ;;  %v9131_v43 = vadd.f32 %v8820_v41, %v3513_v48 }
 0x5ee   :  { %v3622_v11 = vadd.f32 %v3621_v25, %v9103_v8  ;;  %v3522_v12 = vpop.f32.mrf.mxu2  ;;  %v3561_v17 = vpop.f32.mrf.mxu3  ;;  %10715 = vst [vmem:[#allocation238_spill] sm:$0xff] %v9131_v43 }
 0x5f0   :  { %v3623_v63 = vadd.f32 %v3622_v11, %v9108_v35 }
 0x5f2   :  { %v3624_v0 = vadd.f32 %v3623_v63, %v9115_v49  ;;  %v9135_v63 = vadd.f32 %v8820_v41, %v3516_v53 }
 0x5f4   :  { %v3625_v61 = vadd.f32 %v3624_v0, %v9119_v39  ;;  %10716 = vst [vmem:[#allocation8_spill] sm:$0xff] %v9135_v63 }
 0x5f6   :  { %v3626_v15 = vadd.f32 %v3625_v61, %v9123_v47  ;;  %v3525_v6 = vpop.f32.mrf.mxu2  ;;  %v3564_v25 = vpop.f32.mrf.mxu3 }
 0x5f8   :  { %v3627_v4 = vadd.f32 %v3626_v15, %v9127_v10  ;;  %v9143_v15 = vadd.f32 %v8820_v41, %v3522_v12 }
 0x5fa   :  { %v3628_v51 = vadd.f32 %v3627_v4, %v9131_v43  ;;  %10718 = vst [vmem:[#allocation132_spill] sm:$0xff] %v9143_v15  ;;  %v9147_v4 = vadd.f32 %v8820_v41, %v3525_v6  ;;  %v4144_v6 = vld [vmem:[%s10101_s6 + $0x10] sm:$0xff] }
 0x5fb   :  { %4166 = vmatpush.msrb.mxu1 %v4144_v6 }
 0x5fc   :  { %v3629_v23 = vadd.f32 %v3628_v51, %v9135_v63  ;;  %10719 = vst [vmem:[#allocation178_spill] sm:$0xff] %v9147_v4 }
 0x5fe   :  { %v3528_v11 = vpop.f32.mrf.mxu2  ;;  %v3630_v19 = vadd.f32 %v3629_v23, %v9139_v29  ;;  %v3567_v0 = vpop.f32.mrf.mxu3  ;;  %v3556_v29 = vadd.f32 %v8820_v41, %v3555_v21 }
 0x5ff   :  { %v9151_v51 = vadd.f32 %v8820_v41, %v3528_v11  ;;  %v3568_v47 = vadd.f32 %v8820_v41, %v3567_v0 }
 0x600   :  { %v3631_v48 = vadd.f32 %v3630_v19, %v9143_v15 }
 0x601   :  { %10720 = vst [vmem:[#allocation252_spill] sm:$0xff] %v9151_v51 }
 0x602   :  { %v3632_v53 = vadd.f32 %v3631_v48, %v9147_v4 }
 0x604   :  { %v3633_v37 = vadd.f32 %v3632_v53, %v9151_v51  ;;  %v3544_v53 = vadd.f32 %v8820_v41, %v9057_v42 }
 0x606   :  { %v3531_v61 = vpop.f32.mrf.mxu2 }
 0x607   :  { %v9155_v23 = vadd.f32 %v8820_v41, %v3531_v61  ;;  %v9170_v61 = vadd.f32 %v8820_v41, %v9045_v36 }
 0x609   :  { %10721 = vst [vmem:[#allocation228_spill] sm:$0xff] %v9155_v23  ;;  %v3634_v19 = vadd.f32 %v3633_v37, %v9155_v23  ;;  %v3547_v37 = vadd.f32 %v8820_v41, %v9067_v7  ;;  %v3565_v7 = vadd.f32 %v8820_v41, %v3564_v25 }
 0x60a   :  { %10724 = vst [vmem:[#allocation147_spill] sm:$0xff] %v9170_v61 }
 0x60b   :  { %v3570_v43 = vpop.f32.mrf.mxu3 }
 0x613   :  { %v3534_v10 = vpop.f32.mrf.mxu2 }
 0x614   :  { %v9158_v12 = vadd.f32 %v8820_v41, %v3534_v10 }
 0x616   :  { %10722 = vst [vmem:[#allocation32_spill] sm:$0xff] %v9158_v12  ;;  %v3635_v11 = vadd.f32 %v3634_v19, %v9158_v12  ;;  %v3553_v12 = vadd.f32 %v8820_v41, %v3552_v9 }
 0x61b   :  { %v3573_v48 = vpop.f32.mrf.mxu3 }
 0x61c   :  { %v3574_v21 = vadd.f32 %v8820_v41, %v3573_v48 }
 0x623   :  { %v3537_v4 = vpop.f32.mrf.mxu2 }
 0x624   :  { %v9166_v15 = vadd.f32 %v8820_v41, %v3537_v4  ;;  %v3550_v4 = vadd.f32 %v8820_v41, %v9083_v59 }
 0x626   :  { %10723 = vst [vmem:[#allocation77_spill] sm:$0xff] %v9166_v15  ;;  %v3636_v10 = vadd.f32 %v3635_v11, %v9166_v15  ;;  %v3559_v15 = vadd.f32 %v8820_v41, %v3558_v22 }
 0x628   :  { %v3637_v6 = vadd.f32 %v3636_v10, %v9170_v61  ;;  %v3562_v10 = vadd.f32 %v8820_v41, %v3561_v17 }
 0x62a   :  { %v3638_v23 = vadd.f32 %v3637_v6, %v3544_v53 }
 0x62b   :  { %v3576_v51 = vpop.f32.mrf.mxu3 }
 0x62c   :  { %v3639_v19 = vadd.f32 %v3638_v23, %v3547_v37  ;;  %v3571_v23 = vadd.f32 %v8820_v41, %v3570_v43  ;;  %v3577_v22 = vadd.f32 %v8820_v41, %v3576_v51 }
 0x62e   :  { %v3640_v36 = vadd.f32 %v3639_v19, %v3550_v4 }
 0x630   :  { %v3641_v11 = vadd.f32 %v3640_v36, %v3553_v12 }
 0x632   :  { %v3642_v42 = vadd.f32 %v3641_v11, %v3556_v29 }
 0x633   :  { %v3579_v63 = vpop.f32.mrf.mxu3 }
 0x634   :  { %v3643_v61 = vadd.f32 %v3642_v42, %v3559_v15  ;;  %v3580_v17 = vadd.f32 %v8820_v41, %v3579_v63 }
 0x636   :  { %v3644_v6 = vadd.f32 %v3643_v61, %v3562_v10 }
 0x638   :  { %v3645_v59 = vadd.f32 %v3644_v6, %v3565_v7  ;;  %v4903_v6 = vmov 512.0  }
 0x639   :  { %4805 = vrcp.f32 %v4903_v6 }
 0x63a   :  { %v3646_v9 = vadd.f32 %v3645_v59, %v3568_v47 }
 0x63b   :  { %v3582_v19 = vpop.f32.mrf.mxu3 }
 0x63c   :  { %v3647_v36 = vadd.f32 %v3646_v9, %v3571_v23  ;;  %v3583_v25 = vadd.f32 %v8820_v41, %v3582_v19 }
 0x63e   :  { %v3648_v11 = vadd.f32 %v3647_v36, %v3574_v21 }
 0x63f   :  { %v4806_v35 = vpop.eup %4805 }
 0x640   :  { %v3649_v39 = vadd.f32 %v3648_v11, %v3577_v22  ;;  %v3661_v11 = vmul.f32 512.0, %v4806_v35  ;;  %vm3665_vm10 = vweird.f32 %v4806_v35 }
 0x642   :  { %v3650_v49 = vadd.f32 %v3649_v39, %v3580_v17  ;;  %v3662_v63 = vsub.f32 1.0, %v3661_v11 }
 0x643   :  { %v3585_v42 = vpop.f32.mrf.mxu3 }
 0x644   :  { %v3651_v61 = vadd.f32 %v3650_v49, %v3583_v25  ;;  %v3586_v0 = vadd.f32 %v8820_v41, %v3585_v42  ;;  %v3663_v39 = vmul.f32 %v4806_v35, %v3662_v63 }
 0x646   :  { %v3652_v59 = vadd.f32 %v3651_v61, %v3586_v0  ;;  %v3664_v19 = vadd.f32 %v4806_v35, %v3663_v39 }
 0x648   :  { %v9193_v42 = vsel %vm3665_vm10, %v4806_v35, %v3664_v19 }
 0x64b   :  { %v3588_v43 = vpop.f32.mrf.mxu3 }
 0x64c   :  { %v3589_v48 = vadd.f32 %v8820_v41, %v3588_v43 }
 0x64e   :  { %v3653_v9 = vadd.f32 %v3652_v59, %v3589_v48 }
 0x650   :  { %v3654_v51 = vrot.slane %v3653_v9, 4 }
 0x652   :  { %v3655_v36 = vadd.f32 %v3654_v51, %v3653_v9 }
 0x654   :  { %v3656_v8 = vrot.slane %v3655_v36, 2 }
 0x656   :  { %v3657_v20 = vadd.f32 %v3656_v8, %v3655_v36 }
 0x658   :  { %v3658_v3 = vrot.slane %v3657_v20, 1 }
 0x65a   :  { %v3659_v49 = vadd.f32 %v3658_v3, %v3657_v20 }
 0x65c   :  { %v9196_v6 = vmul.f32 %v9193_v42, %v3659_v49 }
 0x65e   :  { %v9199_v41 = vsub.f32 %v3544_v53, %v9196_v6  ;;  %v9202_v61 = vsub.f32 %v3547_v37, %v9196_v6  ;;  %v9205_v43 = vsub.f32 %v3550_v4, %v9196_v6  ;;  %v9208_v8 = vsub.f32 %v3553_v12, %v9196_v6 }
 0x65f   :  { %v9211_v59 = vsub.f32 %v3556_v29, %v9196_v6  ;;  %v9214_v3 = vsub.f32 %v3559_v15, %v9196_v6  ;;  %v9217_v20 = vsub.f32 %v3562_v10, %v9196_v6  ;;  %v9220_v35 = vsub.f32 %v3565_v7, %v9196_v6 }
 0x660   :  { %v9223_v53 = vsub.f32 %v3568_v47, %v9196_v6  ;;  %v9226_v37 = vsub.f32 %v3571_v23, %v9196_v6  ;;  %v9229_v12 = vsub.f32 %v3574_v21, %v9196_v6  ;;  %v9232_v29 = vsub.f32 %v3577_v22, %v9196_v6 }
 0x661   :  { %v9235_v15 = vsub.f32 %v3580_v17, %v9196_v6  ;;  %v9238_v4 = vsub.f32 %v3583_v25, %v9196_v6  ;;  %v9241_v10 = vsub.f32 %v3586_v0, %v9196_v6  ;;  %v9244_v47 = vsub.f32 %v3589_v48, %v9196_v6 }
 0x662   :  { %10725 = vst [vmem:[#allocation9_spill] sm:$0xff] %v9226_v37  ;;  %v9248_v7 = vsub.f32 %v8838_v1, %v9196_v6  ;;  %v9252_v23 = vsub.f32 %v8827_v44, %v9196_v6  ;;  %v9256_v21 = vsub.f32 %v8842_v56, %v9196_v6  ;;  %v9264_v25 = vsub.f32 %v8853_v45, %v9196_v6 }
 0x663   :  { %10726 = vst [vmem:[#allocation202_spill] sm:$0xff] %v9229_v12  ;;  %v9268_v1 = vsub.f32 %v8862_v16, %v9196_v6  ;;  %v9274_v56 = vsub.f32 %v8870_v40, %v9196_v6  ;;  %v9280_v45 = vsub.f32 %v8882_v58, %v9196_v6  ;;  %v9286_v36 = vsub.f32 %v8892_v38, %v9196_v6 }
 0x664   :  { %10727 = vst [vmem:[#allocation58_spill] sm:$0xff] %v9232_v29  ;;  %v3732_v22 = vmul.f32 %v9248_v7, %v9248_v7  ;;  %v3733_v17 = vmul.f32 %v9252_v23, %v9252_v23  ;;  %v3734_v44 = vmul.f32 %v9256_v21, %v9256_v21  ;;  %v3735_v48 = vmul.f32 %v9264_v25, %v9264_v25 }
 0x665   :  { %10728 = vst [vmem:[#allocation124_spill] sm:$0xff] %v9235_v15  ;;  %v3736_v16 = vmul.f32 %v9268_v1, %v9268_v1  ;;  %v3737_v40 = vmul.f32 %v9274_v56, %v9274_v56  ;;  %v9292_v63 = vsub.f32 %v8903_v5, %v9196_v6  ;;  %v3738_v58 = vmul.f32 %v9280_v45, %v9280_v45 }
 0x666   :  { %10729 = vst [vmem:[#allocation179_spill] sm:$0xff] %v9238_v4  ;;  %v3796_v0 = vadd.f32 %v3733_v17, %v3732_v22  ;;  %v9298_v19 = vsub.f32 %v8911_v27, %v9196_v6  ;;  %v3739_v38 = vmul.f32 %v9286_v36, %v9286_v36  ;;  %v9304_v22 = vsub.f32 %v8923_v57, %v9196_v6 }
 0x667   :  { %10730 = vst [vmem:[#allocation240_spill] sm:$0xff] %v9241_v10  ;;  %v3740_v5 = vmul.f32 %v9292_v63, %v9292_v63 }
 0x668   :  { %v3797_v9 = vadd.f32 %v3796_v0, %v3734_v44  ;;  %v9310_v44 = vsub.f32 %v8933_v14, %v9196_v6  ;;  %v3741_v27 = vmul.f32 %v9298_v19, %v9298_v19  ;;  %v3742_v57 = vmul.f32 %v9304_v22, %v9304_v22 }
 0x66a   :  { %v3798_v51 = vadd.f32 %v3797_v9, %v3735_v48  ;;  %v9316_v48 = vsub.f32 %v8943_v55, %v9196_v6  ;;  %v3743_v14 = vmul.f32 %v9310_v44, %v9310_v44 }
 0x66c   :  { %v3799_v11 = vadd.f32 %v3798_v51, %v3736_v16  ;;  %v9322_v16 = vsub.f32 %v8950_v32, %v9196_v6  ;;  %v3744_v55 = vmul.f32 %v9316_v48, %v9316_v48 }
 0x66e   :  { %v3800_v39 = vadd.f32 %v3799_v11, %v3737_v40  ;;  %v9328_v40 = vsub.f32 %v8961_v24, %v9196_v6  ;;  %v3745_v32 = vmul.f32 %v9322_v16, %v9322_v16 }
 0x670   :  { %v3801_v49 = vadd.f32 %v3800_v39, %v3738_v58  ;;  %v9334_v58 = vsub.f32 %v8970_v62, %v9196_v6  ;;  %v3746_v24 = vmul.f32 %v9328_v40, %v9328_v40 }
 0x672   :  { %v3802_v17 = vadd.f32 %v3801_v49, %v3739_v38  ;;  %v9340_v38 = vsub.f32 %v8990_v60, %v9196_v6  ;;  %v3747_v62 = vmul.f32 %v9334_v58, %v9334_v58 }
 0x674   :  { %v3803_v0 = vadd.f32 %v3802_v17, %v3740_v5  ;;  %v9346_v5 = vsub.f32 %v9006_v30, %v9196_v6  ;;  %v3748_v60 = vmul.f32 %v9340_v38, %v9340_v38 }
 0x676   :  { %v3804_v9 = vadd.f32 %v3803_v0, %v3741_v27  ;;  %v9352_v27 = vsub.f32 %v9019_v13, %v9196_v6  ;;  %v3749_v30 = vmul.f32 %v9346_v5, %v9346_v5 }
 0x678   :  { %v3805_v51 = vadd.f32 %v3804_v9, %v3742_v57  ;;  %v9358_v57 = vsub.f32 %v9033_v34, %v9196_v6  ;;  %v3750_v13 = vmul.f32 %v9352_v27, %v9352_v27 }
 0x67a   :  { %v3806_v11 = vadd.f32 %v3805_v51, %v3743_v14  ;;  %v9364_v14 = vsub.f32 %v9041_v31, %v9196_v6  ;;  %v3751_v34 = vmul.f32 %v9358_v57, %v9358_v57 }
 0x67c   :  { %v3807_v39 = vadd.f32 %v3806_v11, %v3744_v55  ;;  %v9370_v55 = vsub.f32 %v9049_v33, %v9196_v6  ;;  %v3752_v31 = vmul.f32 %v9364_v14, %v9364_v14 }
 0x67e   :  { %v3808_v49 = vadd.f32 %v3807_v39, %v3745_v32  ;;  %v9376_v32 = vsub.f32 %v9054_v46, %v9196_v6  ;;  %v3753_v33 = vmul.f32 %v9370_v55, %v9370_v55 }
 0x680   :  { %v3809_v17 = vadd.f32 %v3808_v49, %v3746_v24  ;;  %v9382_v24 = vsub.f32 %v9060_v28, %v9196_v6  ;;  %v3754_v46 = vmul.f32 %v9376_v32, %v9376_v32 }
 0x682   :  { %v3810_v0 = vadd.f32 %v3809_v17, %v3747_v62  ;;  %v9388_v62 = vsub.f32 %v9064_v2, %v9196_v6  ;;  %v3755_v28 = vmul.f32 %v9382_v24, %v9382_v24 }
 0x684   :  { %v3811_v9 = vadd.f32 %v3810_v0, %v3748_v60  ;;  %v9394_v60 = vsub.f32 %v9070_v18, %v9196_v6  ;;  %v3756_v2 = vmul.f32 %v9388_v62, %v9388_v62 }
 0x686   :  { %v3812_v51 = vadd.f32 %v3811_v9, %v3749_v30  ;;  %v9400_v30 = vsub.f32 %v9074_v52, %v9196_v6  ;;  %v3757_v18 = vmul.f32 %v9394_v60, %v9394_v60 }
 0x688   :  { %v3813_v11 = vadd.f32 %v3812_v51, %v3750_v13  ;;  %v9406_v13 = vsub.f32 %v9077_v54, %v9196_v6  ;;  %v3758_v52 = vmul.f32 %v9400_v30, %v9400_v30 }
 0x68a   :  { %v3814_v39 = vadd.f32 %v3813_v11, %v3751_v34  ;;  %v9412_v34 = vsub.f32 %v9081_v50, %v9196_v6  ;;  %v3759_v54 = vmul.f32 %v9406_v13, %v9406_v13 }
 0x68c   :  { %v3815_v49 = vadd.f32 %v3814_v39, %v3752_v31  ;;  %v9418_v31 = vsub.f32 %v9088_v26, %v9196_v6  ;;  %v3760_v50 = vmul.f32 %v9412_v34, %v9412_v34 }
 0x68e   :  { %v3816_v17 = vadd.f32 %v3815_v49, %v3753_v33  ;;  %v10731_v33 = vld [vmem:[#allocation87_spill] sm:$0xff]  ;;  %v3761_v26 = vmul.f32 %v9418_v31, %v9418_v31 }
 0x68f   :  { %v9424_v49 = vsub.f32 %v10731_v33, %v9196_v6 }
 0x690   :  { %v3817_v0 = vadd.f32 %v3816_v17, %v3754_v46  ;;  %v10733_v17 = vld [vmem:[#allocation133_spill] sm:$0xff] }
 0x691   :  { %10732 = vst [vmem:[#allocation232_spill] sm:$0xff] %v9424_v49 }
 0x692   :  { %v3818_v9 = vadd.f32 %v3817_v0, %v3755_v28  ;;  %v9430_v28 = vsub.f32 %v10733_v17, %v9196_v6 }
 0x694   :  { %v3819_v51 = vadd.f32 %v3818_v9, %v3756_v2  ;;  %10734 = vst [vmem:[#allocation21_spill] sm:$0xff] %v9430_v28  ;;  %v10735_v2 = vld [vmem:[#allocation10_spill] sm:$0xff] }
 0x695   :  { %v9436_v9 = vsub.f32 %v10735_v2, %v9196_v6  ;;  %v4141_v2 = vld [vmem:[%s10100_s5] sm:$0x3] }
 0x696   :  { %v3820_v11 = vadd.f32 %v3819_v51, %v3757_v18  ;;  %v3762_v18 = vmul.f32 %v9424_v49, %v9424_v49  ;;  %v10747_v49 = vld [vmem:[#allocation238_spill] sm:$0xff] }
 0x697   :  { %10736 = vst [vmem:[#allocation75_spill] sm:$0xff] %v9436_v9 }
 0x698   :  { %v3821_v39 = vadd.f32 %v3820_v11, %v3758_v52  ;;  %v4143_v52 = vld [vmem:[%s10101_s6 + $0x8] sm:$0xff]  ;;  %v10737_v11 = vld [vmem:[#allocation203_spill] sm:$0xff] }
 0x699   :  { %4167 = vmatpush.msrb.mxu1 %v4143_v52 }
 0x69a   :  { %v3822_v46 = vadd.f32 %v3821_v39, %v3759_v54  ;;  %v9445_v54 = vsub.f32 %v10737_v11, %v9196_v6  ;;  %v3763_v39 = vmul.f32 %v9430_v28, %v9430_v28 }
 0x69c   :  { %v3823_v0 = vadd.f32 %v3822_v46, %v3760_v50  ;;  %10738 = vst [vmem:[#allocation122_spill] sm:$0xff] %v9445_v54  ;;  %v4142_v50 = vld [vmem:[%s10101_s6] sm:$0xff]  ;;  %v10739_v46 = vld [vmem:[#allocation64_spill] sm:$0xff]  ;;  %v3765_v52 = vmul.f32 %v9445_v54, %v9445_v54  ;;  %v9482_v54 = vsub.f32 %v10747_v49, %v9196_v6 }
 0x69d   :  { %v9454_v17 = vsub.f32 %v10739_v46, %v9196_v6  ;;  %4168 = vmatpush.msrb.mxu1 %v4142_v50  ;;  %v10743_v46 = vld [vmem:[#allocation180_spill] sm:$0xff] }
 0x69e   :  { %v3824_v51 = vadd.f32 %v3823_v0, %v3761_v26  ;;  %v3764_v26 = vmul.f32 %v9436_v9, %v9436_v9  ;;  %4774 = vmatmul.msk.f32.vlgmr.msrb.gmra.mxu1 %vm3111_vm8, %v4141_v2  ;;  %v9470_v28 = vsub.f32 %v10743_v46, %v9196_v6  ;;  %v10745_v50 = vld [vmem:[#allocation216_spill] sm:$0xff]  ;;  %10748 = vst [vmem:[#allocation146_spill] sm:$0xff] %v9482_v54 }
 0x69f   :  { %10740 = vst [vmem:[#allocation191_spill] sm:$0xff] %v9454_v17  ;;  %v9476_v9 = vsub.f32 %v10745_v50, %v9196_v6  ;;  %v10749_v46 = vld [vmem:[#allocation8_spill] sm:$0xff]  ;;  %v3770_v49 = vmul.f32 %v9482_v54, %v9482_v54 }
 0x6a0   :  { %v3825_v33 = vadd.f32 %v3824_v51, %v3762_v18  ;;  %v10741_v18 = vld [vmem:[#allocation114_spill] sm:$0xff]  ;;  %10744 = vst [vmem:[#allocation22_spill] sm:$0xff] %v9470_v28  ;;  %v10751_v50 = vld [vmem:[#allocation76_spill] sm:$0xff] }
 0x6a1   :  { %v9464_v51 = vsub.f32 %v10741_v18, %v9196_v6  ;;  %10746 = vst [vmem:[#allocation91_spill] sm:$0xff] %v9476_v9 }
 0x6a2   :  { %v3826_v0 = vadd.f32 %v3825_v33, %v3763_v39  ;;  %v3766_v39 = vmul.f32 %v9454_v17, %v9454_v17  ;;  %v9488_v17 = vsub.f32 %v10749_v46, %v9196_v6  ;;  %v10755_v46 = vld [vmem:[#allocation178_spill] sm:$0xff] }
 0x6a3   :  { %10742 = vst [vmem:[#allocation251_spill] sm:$0xff] %v9464_v51  ;;  %v3767_v2 = vmul.f32 %v9464_v51, %v9464_v51  ;;  %v9494_v51 = vsub.f32 %v10751_v50, %v9196_v6  ;;  %v10757_v50 = vld [vmem:[#allocation252_spill] sm:$0xff] }
 0x6a4   :  { %v3827_v11 = vadd.f32 %v3826_v0, %v3764_v26  ;;  %v3768_v26 = vmul.f32 %v9470_v28, %v9470_v28  ;;  %10750 = vst [vmem:[#allocation5_spill] sm:$0xff] %v9488_v17  ;;  %v9512_v54 = vsub.f32 %v10757_v50, %v9196_v6  ;;  %v10761_v50 = vld [vmem:[#allocation77_spill] sm:$0xff] }
 0x6a5   :  { %10752 = vst [vmem:[#allocation192_spill] sm:$0xff] %v9494_v51 }
 0x6a6   :  { %v3828_v33 = vadd.f32 %v3827_v11, %v3765_v52  ;;  %v3769_v52 = vmul.f32 %v9476_v9, %v9476_v9  ;;  %v9506_v9 = vsub.f32 %v10755_v46, %v9196_v6  ;;  %v10760_v46 = vld [vmem:[#allocation32_spill] sm:$0xff] }
 0x6a8   :  { %v3829_v18 = vadd.f32 %v3828_v33, %v3766_v39  ;;  %v10753_v33 = vld [vmem:[#allocation132_spill] sm:$0xff]  ;;  %10756 = vst [vmem:[#allocation123_spill] sm:$0xff] %v9506_v9 }
 0x6a9   :  { %v9500_v28 = vsub.f32 %v10753_v33, %v9196_v6  ;;  %v10758_v33 = vld [vmem:[#allocation228_spill] sm:$0xff] }
 0x6aa   :  { %v3830_v0 = vadd.f32 %v3829_v18, %v3767_v2  ;;  %v3771_v2 = vmul.f32 %v9488_v17, %v9488_v17  ;;  %v9518_v17 = vsub.f32 %v10758_v33, %v9196_v6  ;;  %v10762_v33 = vld [vmem:[#allocation147_spill] sm:$0xff] }
 0x6ab   :  { %10754 = vst [vmem:[#allocation67_spill] sm:$0xff] %v9500_v28 }
 0x6ac   :  { %v3831_v11 = vadd.f32 %v3830_v0, %v3768_v26  ;;  %v3772_v26 = vmul.f32 %v9494_v51, %v9494_v51  ;;  %10759 = vst [vmem:[#allocation173_spill] sm:$0xff] %v9518_v17  ;;  %v9524_v51 = vsub.f32 %v10760_v46, %v9196_v6 }
 0x6ae   :  { %v3832_v39 = vadd.f32 %v3831_v11, %v3769_v52  ;;  %v3773_v52 = vmul.f32 %v9500_v28, %v9500_v28  ;;  %v9530_v28 = vsub.f32 %v10761_v50, %v9196_v6 }
 0x6b0   :  { %v3833_v18 = vadd.f32 %v3832_v39, %v3770_v49  ;;  %v3774_v49 = vmul.f32 %v9506_v9, %v9506_v9  ;;  %v9536_v9 = vsub.f32 %v10762_v33, %v9196_v6  ;;  %v3778_v46 = vmul.f32 %v9530_v28, %v9530_v28 }
 0x6b1   :  { %v3781_v6 = vmul.f32 %v9202_v61, %v9202_v61  ;;  %v3782_v33 = vmul.f32 %v9205_v43, %v9205_v43 }
 0x6b2   :  { %v3834_v0 = vadd.f32 %v3833_v18, %v3771_v2  ;;  %v3775_v2 = vmul.f32 %v9512_v54, %v9512_v54 }
 0x6b4   :  { %v3835_v11 = vadd.f32 %v3834_v0, %v3772_v26  ;;  %v3776_v26 = vmul.f32 %v9518_v17, %v9518_v17  ;;  %v3780_v17 = vmul.f32 %v9199_v41, %v9199_v41 }
 0x6b6   :  { %v3836_v39 = vadd.f32 %v3835_v11, %v3773_v52  ;;  %v3777_v52 = vmul.f32 %v9524_v51, %v9524_v51 }
 0x6b8   :  { %v3837_v18 = vadd.f32 %v3836_v39, %v3774_v49  ;;  %v3779_v39 = vmul.f32 %v9536_v9, %v9536_v9 }
 0x6ba   :  { %v3838_v0 = vadd.f32 %v3837_v18, %v3775_v2 }
 0x6bc   :  { %v3839_v11 = vadd.f32 %v3838_v0, %v3776_v26  ;;  %v3783_v0 = vmul.f32 %v9208_v8, %v9208_v8 }
 0x6be   :  { %v3840_v49 = vadd.f32 %v3839_v11, %v3777_v52  ;;  %v3784_v11 = vmul.f32 %v9211_v59, %v9211_v59 }
 0x6c0   :  { %v3841_v50 = vadd.f32 %v3840_v49, %v3778_v46  ;;  %v3785_v49 = vmul.f32 %v9214_v3, %v9214_v3 }
 0x6c2   :  { %v3842_v2 = vadd.f32 %v3841_v50, %v3779_v39  ;;  %v3786_v50 = vmul.f32 %v9217_v20, %v9217_v20 }
 0x6c4   :  { %v3843_v18 = vadd.f32 %v3842_v2, %v3780_v17  ;;  %v3787_v2 = vmul.f32 %v9220_v35, %v9220_v35 }
 0x6c6   :  { %v3844_v26 = vadd.f32 %v3843_v18, %v3781_v6  ;;  %v3788_v18 = vmul.f32 %v9223_v53, %v9223_v53 }
 0x6c8   :  { %v3845_v52 = vadd.f32 %v3844_v26, %v3782_v33  ;;  %v3789_v26 = vmul.f32 %v9226_v37, %v9226_v37 }
 0x6ca   :  { %v3846_v46 = vadd.f32 %v3845_v52, %v3783_v0  ;;  %v3790_v52 = vmul.f32 %v9229_v12, %v9229_v12 }
 0x6cc   :  { %v3847_v39 = vadd.f32 %v3846_v46, %v3784_v11  ;;  %v3791_v46 = vmul.f32 %v9232_v29, %v9232_v29 }
 0x6ce   :  { %v3848_v17 = vadd.f32 %v3847_v39, %v3785_v49  ;;  %v3792_v39 = vmul.f32 %v9235_v15, %v9235_v15 }
 0x6d0   :  { %v3849_v6 = vadd.f32 %v3848_v17, %v3786_v50  ;;  %v3793_v17 = vmul.f32 %v9238_v4, %v9238_v4 }
 0x6d2   :  { %v3850_v33 = vadd.f32 %v3849_v6, %v3787_v2  ;;  %v3794_v6 = vmul.f32 %v9241_v10, %v9241_v10 }
 0x6d4   :  { %v3851_v0 = vadd.f32 %v3850_v33, %v3788_v18  ;;  %v3795_v33 = vmul.f32 %v9244_v47, %v9244_v47 }
 0x6d6   :  { %v3852_v11 = vadd.f32 %v3851_v0, %v3789_v26 }
 0x6d8   :  { %v3853_v49 = vadd.f32 %v3852_v11, %v3790_v52 }
 0x6da   :  { %v3854_v50 = vadd.f32 %v3853_v49, %v3791_v46 }
 0x6dc   :  { %v3855_v2 = vadd.f32 %v3854_v50, %v3792_v39 }
 0x6de   :  { %v3856_v18 = vadd.f32 %v3855_v2, %v3793_v17 }
 0x6e0   :  { %v3857_v26 = vadd.f32 %v3856_v18, %v3794_v6 }
 0x6e2   :  { %v3858_v0 = vadd.f32 %v3857_v26, %v3795_v33 }
 0x6e4   :  { %v3859_v12 = vrot.slane %v3858_v0, 4 }
 0x6e6   :  { %v3860_v29 = vadd.f32 %v3859_v12, %v3858_v0  ;;  %v9580_v12 = vld [vmem:[%s10098_s3] ss:$0 sm:$0xff] }
 0x6e8   :  { %v3861_v52 = vrot.slane %v3860_v29, 2 }
 0x6ea   :  { %v3862_v11 = vadd.f32 %v3861_v52, %v3860_v29  ;;  %v10766_v52 = vld [vmem:[#allocation75_spill] sm:$0xff] }
 0x6ec   :  { %v3863_v37 = vrot.slane %v3862_v11, 1 }
 0x6ee   :  { %v3864_v15 = vadd.f32 %v3863_v37, %v3862_v11  ;;  %v10767_v11 = vld [vmem:[#allocation122_spill] sm:$0xff] }
 0x6f0   :  { %v3865_v46 = vmul.f32 %v3864_v15, %v9193_v42  ;;  %v9587_v42 = vld [vmem:[%s10099_s4] ss:$0 sm:$0xff] }
 0x6f2   :  { %v3866_v49 = vadd.f32 1e-05, %v3865_v46  ;;  %v10768_v46 = vld [vmem:[#allocation191_spill] sm:$0xff] }
 0x6f4   :  { %4807 = vrsqrt.f32 %v3866_v49  ;;  %vm3873_vm12 = vweird.f32 %v3866_v49 }
 0x6fa   :  { %v4808_v39 = vpop.eup %4807 }
 0x6fb   :  { %v3868_v50 = vmul.f32 %v4808_v39, %v3866_v49  ;;  %vm3874_vm11 = vweird.f32 %v4808_v39  ;;  %v10769_v49 = vld [vmem:[#allocation251_spill] sm:$0xff] }
 0x6fc   :  { %vm3875_vm13 = vmor %vm3873_vm12, %vm3874_vm11 }
 0x6fd   :  { %v3869_v4 = vmul.f32 %v4808_v39, %v3868_v50  ;;  %v10770_v50 = vld [vmem:[#allocation22_spill] sm:$0xff] }
 0x6ff   :  { %v3870_v10 = vmul.f32 0.5, %v3869_v4 }
 0x701   :  { %v3871_v17 = vsub.f32 1.5, %v3870_v10 }
 0x703   :  { %v3872_v2 = vmul.f32 %v4808_v39, %v3871_v17 }
 0x705   :  { %v9582_v29 = vsel %vm3875_vm13, %v4808_v39, %v3872_v2  ;;  %v10771_v2 = vld [vmem:[#allocation91_spill] sm:$0xff] }
 0x706   :  { %v3940_v37 = vmul.f32 %v9582_v29, %v9244_v47  ;;  %v3877_v10 = vmul.f32 %v9582_v29, %v9248_v7  ;;  %v3878_v6 = vmul.f32 %v9582_v29, %v9252_v23  ;;  %v3879_v18 = vmul.f32 %v9582_v29, %v9256_v21 }
 0x707   :  { %v3880_v33 = vmul.f32 %v9582_v29, %v9264_v25  ;;  %v3881_v47 = vmul.f32 %v9582_v29, %v9268_v1  ;;  %v3882_v26 = vmul.f32 %v9582_v29, %v9274_v56  ;;  %v3883_v0 = vmul.f32 %v9582_v29, %v9280_v45 }
 0x708   :  { %v4008_v15 = vmul.f32 %v9580_v12, %v3940_v37  ;;  %v9611_v7 = vmul.f32 %v9582_v29, %v9286_v36  ;;  %v9615_v23 = vmul.f32 %v9582_v29, %v9292_v63  ;;  %v9619_v21 = vmul.f32 %v9582_v29, %v9298_v19 }
 0x709   :  { %v9623_v25 = vmul.f32 %v9582_v29, %v9304_v22  ;;  %v9627_v1 = vmul.f32 %v9582_v29, %v9310_v44  ;;  %v9631_v56 = vmul.f32 %v9582_v29, %v9316_v48  ;;  %v9635_v45 = vmul.f32 %v9582_v29, %v9322_v16 }
 0x70a   :  { %v9593_v4 = vadd.f32 %v9587_v42, %v4008_v15  ;;  %v9639_v36 = vmul.f32 %v9582_v29, %v9328_v40  ;;  %v9643_v63 = vmul.f32 %v9582_v29, %v9334_v58  ;;  %v9647_v19 = vmul.f32 %v9582_v29, %v9340_v38  ;;  %v10772_v15 = vld [vmem:[#allocation146_spill] sm:$0xff] }
 0x70b   :  { %v9651_v22 = vmul.f32 %v9582_v29, %v9346_v5  ;;  %v9655_v44 = vmul.f32 %v9582_v29, %v9352_v27  ;;  %v9659_v48 = vmul.f32 %v9582_v29, %v9358_v57  ;;  %v9663_v16 = vmul.f32 %v9582_v29, %v9364_v14 }
 0x70c   :  { %10763 = vst [vmem:[#allocation231_spill] sm:$0xff] %v9593_v4  ;;  %v9667_v40 = vmul.f32 %v9582_v29, %v9370_v55  ;;  %v9671_v58 = vmul.f32 %v9582_v29, %v9376_v32  ;;  %v9675_v38 = vmul.f32 %v9582_v29, %v9382_v24  ;;  %v9679_v5 = vmul.f32 %v9582_v29, %v9388_v62  ;;  %v10764_v24 = vld [vmem:[#allocation232_spill] sm:$0xff]  ;;  %v10777_v4 = vld [vmem:[#allocation123_spill] sm:$0xff] }
 0x70d   :  { %v9683_v27 = vmul.f32 %v9582_v29, %v9394_v60  ;;  %v9687_v57 = vmul.f32 %v9582_v29, %v9400_v30  ;;  %v9691_v14 = vmul.f32 %v9582_v29, %v9406_v13  ;;  %v9695_v55 = vmul.f32 %v9582_v29, %v9412_v34  ;;  %v10765_v60 = vld [vmem:[#allocation21_spill] sm:$0xff] }
 0x70e   :  { %v9699_v32 = vmul.f32 %v9582_v29, %v9418_v31  ;;  %v9703_v62 = vmul.f32 %v9582_v29, %v10764_v24  ;;  %v9707_v30 = vmul.f32 %v9582_v29, %v10765_v60  ;;  %v9711_v13 = vmul.f32 %v9582_v29, %v10766_v52  ;;  %v10774_v60 = vld [vmem:[#allocation5_spill] sm:$0xff] }
 0x70f   :  { %v9715_v34 = vmul.f32 %v9582_v29, %v10767_v11  ;;  %v9719_v31 = vmul.f32 %v9582_v29, %v10768_v46  ;;  %v9723_v39 = vmul.f32 %v9582_v29, %v10769_v49  ;;  %v9727_v17 = vmul.f32 %v9582_v29, %v10770_v50  ;;  %v10775_v11 = vld [vmem:[#allocation192_spill] sm:$0xff]  ;;  %v10776_v49 = vld [vmem:[#allocation67_spill] sm:$0xff] }
 0x710   :  { %v9731_v37 = vmul.f32 %v9582_v29, %v10771_v2  ;;  %v9735_v24 = vmul.f32 %v9582_v29, %v10772_v15  ;;  %v9739_v52 = vmul.f32 %v9582_v29, %v10774_v60  ;;  %v9743_v46 = vmul.f32 %v9582_v29, %v10775_v11 }
 0x711   :  { %v9747_v50 = vmul.f32 %v9582_v29, %v10776_v49  ;;  %v9751_v2 = vmul.f32 %v9582_v29, %v10777_v4  ;;  %v9755_v15 = vmul.f32 %v9582_v29, %v9512_v54  ;;  %v9763_v11 = vmul.f32 %v9582_v29, %v9524_v51 }
 0x712   :  { %10773 = vst [vmem:[#allocation243_spill] sm:$0xff] %v9735_v24  ;;  %v10778_v24 = vld [vmem:[#allocation173_spill] sm:$0xff]  ;;  %v9767_v49 = vmul.f32 %v9582_v29, %v9530_v28  ;;  %v9771_v4 = vmul.f32 %v9582_v29, %v9536_v9  ;;  %v9775_v54 = vmul.f32 %v9582_v29, %v9199_v41  ;;  %v9783_v51 = vmul.f32 %v9582_v29, %v9205_v43 }
 0x713   :  { %v9759_v60 = vmul.f32 %v9582_v29, %v10778_v24  ;;  %v9779_v24 = vmul.f32 %v9582_v29, %v9202_v61  ;;  %v9787_v28 = vmul.f32 %v9582_v29, %v9208_v8  ;;  %v3946_v9 = vmul.f32 %v9580_v12, %v3878_v6 }
 0x714   :  { %10779 = vst [vmem:[#allocation20_spill] sm:$0xff] %v9767_v49  ;;  %v3945_v49 = vmul.f32 %v9580_v12, %v3877_v10  ;;  %v9794_v41 = vmul.f32 %v9582_v29, %v9211_v59  ;;  %v9798_v61 = vmul.f32 %v9582_v29, %v9214_v3  ;;  %v9802_v43 = vmul.f32 %v9582_v29, %v9217_v20  ;;  %v10786_v59 = vld [vmem:[#allocation9_spill] sm:$0xff] }
 0x715   :  { %10780 = vst [vmem:[#allocation65_spill] sm:$0xff] %v9771_v4  ;;  %v3947_v4 = vmul.f32 %v9580_v12, %v3879_v18  ;;  %v3948_v8 = vmul.f32 %v9580_v12, %v3880_v33  ;;  %v9807_v10 = vmul.f32 %v9582_v29, %v9220_v35  ;;  %v9811_v6 = vmul.f32 %v9582_v29, %v9223_v53  ;;  %v10792_v53 = vld [vmem:[#allocation124_spill] sm:$0xff] }
 0x716   :  { %10781 = vst [vmem:[#allocation135_spill] sm:$0xff] %v9794_v41  ;;  %v9815_v18 = vmul.f32 %v9582_v29, %v10786_v59  ;;  %v3949_v3 = vmul.f32 %v9580_v12, %v3881_v47  ;;  %v3950_v35 = vmul.f32 %v9580_v12, %v3882_v26  ;;  %v4013_v59 = vadd.f32 %v9587_v42, %v3945_v49  ;;  %v10796_v26 = vld [vmem:[#allocation240_spill] sm:$0xff] }
 0x717   :  { %10782 = vst [vmem:[#allocation239_spill] sm:$0xff] %v9798_v61  ;;  %v10788_v61 = vld [vmem:[#allocation202_spill] sm:$0xff]  ;;  %v4014_v47 = vadd.f32 %v9587_v42, %v3946_v9  ;;  %v4016_v49 = vadd.f32 %v9587_v42, %v3948_v8 }
 0x718   :  { %10783 = vst [vmem:[#allocation190_spill] sm:$0xff] %v9802_v43  ;;  %v9820_v20 = vmul.f32 %v9582_v29, %v10788_v61  ;;  %v10790_v43 = vld [vmem:[#allocation58_spill] sm:$0xff]  ;;  %v4804_v61 = vld [vmem:[%s10102_s7] ss:$0 sm:$0xff]  ;;  %v4018_v8 = vadd.f32 %v9587_v42, %v3950_v35  ;;  %s4904_s7 = smov [#allocation2]  }
 0x719   :  { %10784 = vst [vmem:[#allocation241_spill] sm:$0xff] %v9807_v10  ;;  %v9824_v33 = vmul.f32 %v9582_v29, %v10790_v43  ;;  %v3951_v10 = vmul.f32 %v9580_v12, %v3883_v0  ;;  %v10794_v43 = vld [vmem:[#allocation179_spill] sm:$0xff]  ;;  %v9844_v0 = vmul.f32 %v9582_v29, %v10796_v26  ;;  %s4311_s21 = sshll.u32 %s4904_s7, 4  ;;  %s4312_s21 = int_to_ptr.vmem [resolvable:$true] %s4311_s21 }
 0x71a   :  { %10785 = vst [vmem:[#allocation35_spill] sm:$0xff] %v9811_v6  ;;  %v9830_v6 = vmul.f32 %v9582_v29, %v10792_v53  ;;  %v3952_v53 = vmul.f32 %v9580_v12, %v9611_v7  ;;  %v3957_v7 = vmul.f32 %v9580_v12, %v9631_v56  ;;  %v3960_v56 = vmul.f32 %v9580_v12, %v9643_v63 }
 0x71b   :  { %10787 = vst [vmem:[#allocation90_spill] sm:$0xff] %v9815_v18  ;;  %v4015_v18 = vadd.f32 %v9587_v42, %v3947_v4  ;;  %v4170_v9 = vpop.f32.mrf.mxu1  ;;  %v3953_v4 = vmul.f32 %v9580_v12, %v9615_v23  ;;  %v4019_v26 = vadd.f32 %v9587_v42, %v3951_v10  ;;  %v4078_v23 = vmax.f32 %v4014_v47, 0.0 }
 0x71c   :  { %10789 = vst [vmem:[#allocation136_spill] sm:$0xff] %v9820_v20  ;;  %v9862_v41 = vadd.f32 %v4804_v61, %v4170_v9 }
 0x71d   :  { %10791 = vst [vmem:[#allocation13_spill] sm:$0xff] %v9824_v33  ;;  %v9840_v33 = vmul.f32 %v9582_v29, %v10794_v43  ;;  %v3955_v43 = vmul.f32 %v9580_v12, %v9623_v25  ;;  %v3956_v29 = vmul.f32 %v9580_v12, %v9627_v1  ;;  %v4079_v20 = vmax.f32 %v4015_v18, 0.0 }
 0x71e   :  { %10793 = vst [vmem:[#allocation206_spill] sm:$0xff] %v9830_v6  ;;  %v3954_v6 = vmul.f32 %v9580_v12, %v9619_v21  ;;  %v3958_v21 = vmul.f32 %v9580_v12, %v9635_v45  ;;  %v3959_v25 = vmul.f32 %v9580_v12, %v9639_v36  ;;  %v4020_v1 = vadd.f32 %v9587_v42, %v3952_v53 }
 0x71f   :  { %10795 = vst [vmem:[#allocation66_spill] sm:$0xff] %v9840_v33  ;;  %v4017_v33 = vadd.f32 %v9587_v42, %v3949_v3  ;;  %v4080_v3 = vmax.f32 %v4016_v49, 0.0  ;;  %v4021_v35 = vadd.f32 %v9587_v42, %v3953_v4  ;;  %v3961_v18 = vmul.f32 %v9580_v12, %v9647_v19 }
 0x720   :  { %10797 = vst [vmem:[#allocation117_spill] sm:$0xff] %v9844_v0  ;;  %v4077_v0 = vmax.f32 %v4013_v59, 0.0  ;;  %v9873_v59 = vperm.slane %v9862_v41, 0  ;;  %v4022_v45 = vadd.f32 %v9587_v42, %v3954_v6  ;;  %v4023_v47 = vadd.f32 %v9587_v42, %v3955_v43 }
 0x721   :  { %v4081_v10 = vmax.f32 %v4017_v33, 0.0  ;;  %v4082_v36 = vmax.f32 %v4018_v8, 0.0  ;;  %v4083_v61 = vmax.f32 %v4019_v26, 0.0  ;;  %v3962_v33 = vmul.f32 %v9580_v12, %v9651_v22 }
 0x722   :  { %v4179_v53 = vadd.f32 %v9873_v59, %v4077_v0  ;;  %v4180_v49 = vadd.f32 %v9873_v59, %v4078_v23  ;;  %v4181_v63 = vadd.f32 %v9873_v59, %v4079_v20  ;;  %v4024_v9 = vadd.f32 %v9587_v42, %v3956_v29 }
 0x723   :  { %v4084_v4 = vmax.f32 %v4020_v1, 0.0  ;;  %v4182_v19 = vadd.f32 %v9873_v59, %v4080_v3  ;;  %v3963_v6 = vmul.f32 %v9580_v12, %v9655_v44  ;;  %v4025_v43 = vadd.f32 %v9587_v42, %v3957_v7 }
 0x724   :  { %v4085_v8 = vmax.f32 %v4021_v35, 0.0  ;;  %v4183_v0 = vadd.f32 %v9873_v59, %v4081_v10  ;;  %4243 = vst [vmem:[#allocation2] sm:$0xff] %v4179_v53  ;;  %v3964_v20 = vmul.f32 %v9580_v12, %v9659_v48  ;;  %v4026_v26 = vadd.f32 %v9587_v42, %v3958_v21 }
 0x725   :  { %v4086_v22 = vmax.f32 %v4022_v45, 0.0  ;;  %v4184_v29 = vadd.f32 %v9873_v59, %v4082_v36  ;;  %4244 = vst [vmem:[#allocation2 + $0x8] sm:$0xff] %v4180_v49  ;;  %v3965_v23 = vmul.f32 %v9580_v12, %v9663_v16  ;;  %v4027_v44 = vadd.f32 %v9587_v42, %v3959_v25 }
 0x726   :  { %v4087_v1 = vmax.f32 %v4023_v47, 0.0  ;;  %v4185_v7 = vadd.f32 %v9873_v59, %v4083_v61  ;;  %4245 = vst [vmem:[#allocation2 + $0x10] sm:$0xff] %v4181_v63  ;;  %v3966_v3 = vmul.f32 %v9580_v12, %v9667_v40  ;;  %v4028_v48 = vadd.f32 %v9587_v42, %v3960_v56 }
 0x727   :  { %v4088_v35 = vmax.f32 %v4024_v9, 0.0  ;;  %v4186_v21 = vadd.f32 %v9873_v59, %v4084_v4  ;;  %4246 = vst [vmem:[#allocation2 + $0x18] sm:$0xff] %v4182_v19  ;;  %v3967_v10 = vmul.f32 %v9580_v12, %v9671_v58  ;;  %v4029_v16 = vadd.f32 %v9587_v42, %v3961_v18 }
 0x728   :  { %v4089_v45 = vmax.f32 %v4025_v43, 0.0  ;;  %v4187_v25 = vadd.f32 %v9873_v59, %v4085_v8  ;;  %4247 = vst [vmem:[#allocation2 + $0x20] sm:$0xff] %v4183_v0  ;;  %v3968_v47 = vmul.f32 %v9580_v12, %v9675_v38  ;;  %v4030_v40 = vadd.f32 %v9587_v42, %v3962_v33 }
 0x729   :  { %v4090_v36 = vmax.f32 %v4026_v26, 0.0  ;;  %v4188_v56 = vadd.f32 %v9873_v59, %v4086_v22  ;;  %4248 = vst [vmem:[#allocation2 + $0x28] sm:$0xff] %v4184_v29  ;;  %v3969_v61 = vmul.f32 %v9580_v12, %v9679_v5  ;;  %v4031_v58 = vadd.f32 %v9587_v42, %v3963_v6 }
 0x72a   :  { %v4091_v53 = vmax.f32 %v4027_v44, 0.0  ;;  %v4189_v18 = vadd.f32 %v9873_v59, %v4087_v1  ;;  %4249 = vst [vmem:[#allocation2 + $0x30] sm:$0xff] %v4185_v7  ;;  %v3970_v49 = vmul.f32 %v9580_v12, %v9683_v27  ;;  %v4032_v38 = vadd.f32 %v9587_v42, %v3964_v20 }
 0x72b   :  { %v4092_v63 = vmax.f32 %v4028_v48, 0.0  ;;  %v4190_v33 = vadd.f32 %v9873_v59, %v4088_v35  ;;  %4250 = vst [vmem:[#allocation2 + $0x38] sm:$0xff] %v4186_v21  ;;  %v3971_v9 = vmul.f32 %v9580_v12, %v9687_v57  ;;  %v4033_v5 = vadd.f32 %v9587_v42, %v3965_v23 }
 0x72c   :  { %v4093_v4 = vmax.f32 %v4029_v16, 0.0  ;;  %v4191_v19 = vadd.f32 %v9873_v59, %v4089_v45  ;;  %4251 = vst [vmem:[#allocation2 + $0x40] sm:$0xff] %v4187_v25  ;;  %v3972_v6 = vmul.f32 %v9580_v12, %v9691_v14  ;;  %v4034_v27 = vadd.f32 %v9587_v42, %v3966_v3 }
 0x72d   :  { %v4094_v43 = vmax.f32 %v4030_v40, 0.0  ;;  %v4192_v8 = vadd.f32 %v9873_v59, %v4090_v36  ;;  %4252 = vst [vmem:[#allocation2 + $0x48] sm:$0xff] %v4188_v56  ;;  %v3973_v0 = vmul.f32 %v9580_v12, %v9695_v55  ;;  %v4035_v57 = vadd.f32 %v9587_v42, %v3967_v10 }
 0x72e   :  { %v4095_v20 = vmax.f32 %v4031_v58, 0.0  ;;  %v4193_v26 = vadd.f32 %v9873_v59, %v4091_v53  ;;  %4253 = vst [vmem:[#allocation2 + $0x50] sm:$0xff] %v4189_v18  ;;  %v3974_v22 = vmul.f32 %v9580_v12, %v9699_v32  ;;  %v4036_v14 = vadd.f32 %v9587_v42, %v3968_v47 }
 0x72f   :  { %v4096_v29 = vmax.f32 %v4032_v38, 0.0  ;;  %v4194_v23 = vadd.f32 %v9873_v59, %v4092_v63  ;;  %4254 = vst [vmem:[#allocation2 + $0x58] sm:$0xff] %v4190_v33  ;;  %v3975_v44 = vmul.f32 %v9580_v12, %v9703_v62  ;;  %v4037_v55 = vadd.f32 %v9587_v42, %v3969_v61 }
 0x730   :  { %v4097_v1 = vmax.f32 %v4033_v5, 0.0  ;;  %v4195_v7 = vadd.f32 %v9873_v59, %v4093_v4  ;;  %4255 = vst [vmem:[#allocation2 + $0x60] sm:$0xff] %v4191_v19  ;;  %v3976_v3 = vmul.f32 %v9580_v12, %v9707_v30  ;;  %v4038_v32 = vadd.f32 %v9587_v42, %v3970_v49 }
 0x731   :  { %v4098_v48 = vmax.f32 %v4034_v27, 0.0  ;;  %v4196_v35 = vadd.f32 %v9873_v59, %v4094_v43  ;;  %4256 = vst [vmem:[#allocation2 + $0x68] sm:$0xff] %v4192_v8  ;;  %v3977_v21 = vmul.f32 %v9580_v12, %v9711_v13  ;;  %v4039_v62 = vadd.f32 %v9587_v42, %v3971_v9 }
 0x732   :  { %v4099_v10 = vmax.f32 %v4035_v57, 0.0  ;;  %v4197_v16 = vadd.f32 %v9873_v59, %v4095_v20  ;;  %4257 = vst [vmem:[#allocation2 + $0x70] sm:$0xff] %v4193_v26  ;;  %v3978_v45 = vmul.f32 %v9580_v12, %v9715_v34  ;;  %v4040_v30 = vadd.f32 %v9587_v42, %v3972_v6  ;;  %v10798_v6 = vld [vmem:[#allocation243_spill] sm:$0xff] }
 0x733   :  { %v4100_v25 = vmax.f32 %v4036_v14, 0.0  ;;  %v4198_v47 = vadd.f32 %v9873_v59, %v4096_v29  ;;  %4258 = vst [vmem:[#allocation2 + $0x78] sm:$0xff] %v4194_v23  ;;  %v3979_v40 = vmul.f32 %v9580_v12, %v9719_v31  ;;  %v4041_v13 = vadd.f32 %v9587_v42, %v3973_v0 }
 0x734   :  { %v4101_v36 = vmax.f32 %v4037_v55, 0.0  ;;  %v4199_v56 = vadd.f32 %v9873_v59, %v4097_v1  ;;  %4259 = vst [vmem:[#allocation2 + $0x80] sm:$0xff] %v4195_v7  ;;  %v3980_v61 = vmul.f32 %v9580_v12, %v9723_v39  ;;  %v4042_v34 = vadd.f32 %v9587_v42, %v3974_v22 }
 0x735   :  { %v4102_v58 = vmax.f32 %v4038_v32, 0.0  ;;  %v4200_v53 = vadd.f32 %v9873_v59, %v4098_v48  ;;  %4260 = vst [vmem:[#allocation2 + $0x88] sm:$0xff] %v4196_v35  ;;  %v3981_v18 = vmul.f32 %v9580_v12, %v9727_v17  ;;  %v4043_v31 = vadd.f32 %v9587_v42, %v3975_v44 }
 0x736   :  { %v4103_v49 = vmax.f32 %v4039_v62, 0.0  ;;  %v4201_v38 = vadd.f32 %v9873_v59, %v4099_v10  ;;  %4261 = vst [vmem:[#allocation2 + $0x90] sm:$0xff] %v4197_v16  ;;  %v3982_v63 = vmul.f32 %v9580_v12, %v9731_v37  ;;  %v4044_v39 = vadd.f32 %v9587_v42, %v3976_v3 }
 0x737   :  { %v4104_v33 = vmax.f32 %v4040_v30, 0.0  ;;  %v4202_v9 = vadd.f32 %v9873_v59, %v4100_v25  ;;  %4262 = vst [vmem:[#allocation2 + $0x98] sm:$0xff] %v4198_v47  ;;  %v4045_v5 = vadd.f32 %v9587_v42, %v3977_v21  ;;  %v4105_v4 = vmax.f32 %v4041_v13, 0.0 }
 0x738   :  { %v4174_v17 = vrot.slane %v9862_v41, 1  ;;  %v4203_v19 = vadd.f32 %v9873_v59, %v4101_v36  ;;  %4263 = vst [vmem:[#allocation2 + $0xa0] sm:$0xff] %v4199_v56  ;;  %v3983_v27 = vmul.f32 %v9580_v12, %v10798_v6  ;;  %v4046_v43 = vadd.f32 %v9587_v42, %v3978_v45 }
 0x739   :  { %v4106_v37 = vmax.f32 %v4042_v34, 0.0  ;;  %v4204_v8 = vadd.f32 %v9873_v59, %v4102_v58  ;;  %4264 = vst [vmem:[#allocation2 + $0xa8] sm:$0xff] %v4200_v53  ;;  %v3984_v0 = vmul.f32 %v9580_v12, %v9739_v52  ;;  %v4047_v57 = vadd.f32 %v9587_v42, %v3979_v40  ;;  %v10800_v34 = vld [vmem:[#allocation65_spill] sm:$0xff] }
 0x73a   :  { %v4107_v20 = vmax.f32 %v4043_v31, 0.0  ;;  %v4205_v41 = vadd.f32 %v9873_v59, %v4103_v49  ;;  %4265 = vst [vmem:[#allocation2 + $0xb0] sm:$0xff] %v4201_v38  ;;  %v3985_v26 = vmul.f32 %v9580_v12, %v9743_v46  ;;  %v4048_v22 = vadd.f32 %v9587_v42, %v3980_v61 }
 0x73b   :  { %v4108_v14 = vmax.f32 %v4044_v39, 0.0  ;;  %v4206_v29 = vadd.f32 %v9873_v59, %v4104_v33  ;;  %4266 = vst [vmem:[#allocation2 + $0xb8] sm:$0xff] %v4202_v9  ;;  %v4049_v23 = vadd.f32 %v9587_v42, %v3981_v18  ;;  %v4109_v44 = vmax.f32 %v4045_v5, 0.0 }
 0x73c   :  { %v9982_v55 = vperm.slane %v4174_v17, 0  ;;  %v4207_v52 = vadd.f32 %v9873_v59, %v4105_v4  ;;  %4267 = vst [vmem:[#allocation2 + $0xc0] sm:$0xff] %v4203_v19  ;;  %v3986_v1 = vmul.f32 %v9580_v12, %v9747_v50  ;;  %v4050_v7 = vadd.f32 %v9587_v42, %v3982_v63 }
 0x73d   :  { %v4110_v46 = vmax.f32 %v4046_v43, 0.0  ;;  %v4208_v3 = vadd.f32 %v9873_v59, %v4106_v37  ;;  %4268 = vst [vmem:[#allocation2 + $0xc8] sm:$0xff] %v4204_v8  ;;  %v3987_v32 = vmul.f32 %v9580_v12, %v9751_v2  ;;  %v4051_v48 = vadd.f32 %v9587_v42, %v3983_v27  ;;  %v10801_v37 = vld [vmem:[#allocation135_spill] sm:$0xff] }
 0x73e   :  { %v4111_v35 = vmax.f32 %v4047_v57, 0.0  ;;  %v4209_v21 = vadd.f32 %v9873_v59, %v4107_v20  ;;  %4269 = vst [vmem:[#allocation2 + $0xd0] sm:$0xff] %v4205_v41  ;;  %v3988_v62 = vmul.f32 %v9580_v12, %v9755_v15  ;;  %v4052_v50 = vadd.f32 %v9587_v42, %v3984_v0  ;;  %v10802_v20 = vld [vmem:[#allocation239_spill] sm:$0xff] }
 0x73f   :  { %v4112_v10 = vmax.f32 %v4048_v22, 0.0  ;;  %v4210_v16 = vadd.f32 %v9873_v59, %v4108_v14  ;;  %4270 = vst [vmem:[#allocation2 + $0xd8] sm:$0xff] %v4206_v29  ;;  %v3989_v45 = vmul.f32 %v9580_v12, %v9759_v60  ;;  %v4053_v2 = vadd.f32 %v9587_v42, %v3985_v26  ;;  %v10799_v59 = vld [vmem:[#allocation20_spill] sm:$0xff]  ;;  %v10803_v14 = vld [vmem:[#allocation190_spill] sm:$0xff] }
 0x740   :  { %v4113_v30 = vmax.f32 %v4049_v23, 0.0  ;;  %v4211_v25 = vadd.f32 %v9982_v55, %v4109_v44  ;;  %4271 = vst [vmem:[#allocation2 + $0xe0] sm:$0xff] %v4207_v52  ;;  %v3990_v47 = vmul.f32 %v9580_v12, %v9763_v11  ;;  %v4054_v15 = vadd.f32 %v9587_v42, %v3986_v1  ;;  %v10804_v1 = vld [vmem:[#allocation241_spill] sm:$0xff] }
 0x741   :  { %v4114_v40 = vmax.f32 %v4050_v7, 0.0  ;;  %v4212_v13 = vadd.f32 %v9982_v55, %v4110_v46  ;;  %4272 = vst [vmem:[#allocation2 + $0xe8] sm:$0xff] %v4208_v3  ;;  %v3991_v36 = vmul.f32 %v9580_v12, %v10799_v59  ;;  %v4055_v60 = vadd.f32 %v9587_v42, %v3987_v32  ;;  %v10808_v59 = vld [vmem:[#allocation13_spill] sm:$0xff] }
 0x742   :  { %v4115_v56 = vmax.f32 %v4051_v48, 0.0  ;;  %v4213_v61 = vadd.f32 %v9982_v55, %v4111_v35  ;;  %4273 = vst [vmem:[#allocation2 + $0xf0] sm:$0xff] %v4209_v21  ;;  %v3992_v58 = vmul.f32 %v9580_v12, %v10800_v34  ;;  %v4056_v11 = vadd.f32 %v9587_v42, %v3988_v62  ;;  %v10805_v48 = vld [vmem:[#allocation35_spill] sm:$0xff]  ;;  %v10809_v34 = vld [vmem:[#allocation206_spill] sm:$0xff] }
 0x743   :  { %v4116_v53 = vmax.f32 %v4052_v50, 0.0  ;;  %v4214_v18 = vadd.f32 %v9982_v55, %v4112_v10  ;;  %4274 = vst [vmem:[#allocation2 + $0xf8] sm:$0xff] %v4210_v16  ;;  %v3993_v31 = vmul.f32 %v9580_v12, %v9775_v54  ;;  %v4057_v49 = vadd.f32 %v9587_v42, %v3989_v45  ;;  %v10806_v10 = vld [vmem:[#allocation90_spill] sm:$0xff] }
 0x744   :  { %v4117_v38 = vmax.f32 %v4053_v2, 0.0  ;;  %v4215_v63 = vadd.f32 %v9982_v55, %v4113_v30  ;;  %4275 = vst [vmem:[#allocation2 + $0x100] sm:$0xff] %v4211_v25  ;;  %v3994_v39 = vmul.f32 %v9580_v12, %v9779_v24  ;;  %v4058_v33 = vadd.f32 %v9587_v42, %v3990_v47  ;;  %v10807_v25 = vld [vmem:[#allocation136_spill] sm:$0xff] }
 0x745   :  { %v4118_v9 = vmax.f32 %v4054_v15, 0.0  ;;  %v4216_v5 = vadd.f32 %v9982_v55, %v4114_v40  ;;  %4276 = vst [vmem:[#allocation2 + $0x108] sm:$0xff] %v4212_v13  ;;  %v3995_v4 = vmul.f32 %v9580_v12, %v9783_v51  ;;  %v4059_v54 = vadd.f32 %v9587_v42, %v3991_v36 }
 0x746   :  { %v4119_v17 = vmax.f32 %v4055_v60, 0.0  ;;  %v4217_v19 = vadd.f32 %v9982_v55, %v4115_v56  ;;  %4277 = vst [vmem:[#allocation2 + $0x110] sm:$0xff] %v4213_v61  ;;  %v3996_v6 = vmul.f32 %v9580_v12, %v9787_v28  ;;  %v4060_v24 = vadd.f32 %v9587_v42, %v3992_v58 }
 0x747   :  { %v4120_v27 = vmax.f32 %v4056_v11, 0.0  ;;  %v4218_v43 = vadd.f32 %v9982_v55, %v4116_v53  ;;  %4278 = vst [vmem:[#allocation2 + $0x118] sm:$0xff] %v4214_v18  ;;  %v3997_v8 = vmul.f32 %v9580_v12, %v10801_v37  ;;  %v4061_v51 = vadd.f32 %v9587_v42, %v3993_v31  ;;  %v10810_v31 = vld [vmem:[#allocation66_spill] sm:$0xff] }
 0x748   :  { %v4121_v0 = vmax.f32 %v4057_v49, 0.0  ;;  %v4219_v57 = vadd.f32 %v9982_v55, %v4117_v38  ;;  %4279 = vst [vmem:[#allocation2 + $0x120] sm:$0xff] %v4215_v63  ;;  %v3998_v41 = vmul.f32 %v9580_v12, %v10802_v20  ;;  %v4062_v28 = vadd.f32 %v9587_v42, %v3994_v39 }
 0x749   :  { %v4122_v26 = vmax.f32 %v4058_v33, 0.0  ;;  %v4220_v22 = vadd.f32 %v9982_v55, %v4118_v9  ;;  %4280 = vst [vmem:[#allocation2 + $0x128] sm:$0xff] %v4216_v5  ;;  %v3999_v29 = vmul.f32 %v9580_v12, %v10803_v14  ;;  %v4063_v23 = vadd.f32 %v9587_v42, %v3995_v4  ;;  %v10811_v33 = vld [vmem:[#allocation117_spill] sm:$0xff] }
 0x74a   :  { %v4123_v44 = vmax.f32 %v4059_v54, 0.0  ;;  %v4221_v52 = vadd.f32 %v9982_v55, %v4119_v17  ;;  %4281 = vst [vmem:[#allocation2 + $0x130] sm:$0xff] %v4217_v19  ;;  %v4000_v7 = vmul.f32 %v9580_v12, %v10804_v1  ;;  %v4064_v46 = vadd.f32 %v9587_v42, %v3996_v6 }
 0x74b   :  { %v4124_v3 = vmax.f32 %v4060_v24, 0.0  ;;  %v4222_v32 = vadd.f32 %v9982_v55, %v4120_v27  ;;  %4282 = vst [vmem:[#allocation2 + $0x138] sm:$0xff] %v4218_v43  ;;  %v4001_v35 = vmul.f32 %v9580_v12, %v10805_v48  ;;  %v4065_v21 = vadd.f32 %v9587_v42, %v3997_v8 }
 0x74c   :  { %v4125_v62 = vmax.f32 %v4061_v51, 0.0  ;;  %v4223_v50 = vadd.f32 %v9982_v55, %v4121_v0  ;;  %4283 = vst [vmem:[#allocation2 + $0x140] sm:$0xff] %v4219_v57  ;;  %v4002_v16 = vmul.f32 %v9580_v12, %v10806_v10  ;;  %v4066_v45 = vadd.f32 %v9587_v42, %v3998_v41 }
 0x74d   :  { %v4126_v2 = vmax.f32 %v4062_v28, 0.0  ;;  %v4224_v30 = vadd.f32 %v9982_v55, %v4122_v26  ;;  %4284 = vst [vmem:[#allocation2 + $0x148] sm:$0xff] %v4220_v22  ;;  %v4003_v47 = vmul.f32 %v9580_v12, %v10807_v25  ;;  %v4067_v15 = vadd.f32 %v9587_v42, %v3999_v29 }
 0x74e   :  { %v4127_v40 = vmax.f32 %v4063_v23, 0.0  ;;  %v4225_v13 = vadd.f32 %v9982_v55, %v4123_v44  ;;  %4285 = vst [vmem:[#allocation2 + $0x150] sm:$0xff] %v4221_v52  ;;  %v4004_v36 = vmul.f32 %v9580_v12, %v10808_v59  ;;  %v4068_v60 = vadd.f32 %v9587_v42, %v4000_v7 }
 0x74f   :  { %v4128_v56 = vmax.f32 %v4064_v46, 0.0  ;;  %v4226_v61 = vadd.f32 %v9982_v55, %v4124_v3  ;;  %4286 = vst [vmem:[#allocation2 + $0x158] sm:$0xff] %v4222_v32  ;;  %v4005_v58 = vmul.f32 %v9580_v12, %v10809_v34  ;;  %v4069_v11 = vadd.f32 %v9587_v42, %v4001_v35 }
 0x750   :  { %v4129_v53 = vmax.f32 %v4065_v21, 0.0  ;;  %v4227_v18 = vadd.f32 %v9982_v55, %v4125_v62  ;;  %4287 = vst [vmem:[#allocation2 + $0x160] sm:$0xff] %v4223_v50  ;;  %v4006_v49 = vmul.f32 %v9580_v12, %v10810_v31  ;;  %v4070_v38 = vadd.f32 %v9587_v42, %v4002_v16 }
 0x751   :  { %v4130_v63 = vmax.f32 %v4066_v45, 0.0  ;;  %v4228_v39 = vadd.f32 %v9982_v55, %v4126_v2  ;;  %4288 = vst [vmem:[#allocation2 + $0x168] sm:$0xff] %v4224_v30  ;;  %v4007_v9 = vmul.f32 %v9580_v12, %v10811_v33  ;;  %v4071_v5 = vadd.f32 %v9587_v42, %v4003_v47 }
 0x752   :  { %v4131_v4 = vmax.f32 %v4067_v15, 0.0  ;;  %v4229_v54 = vadd.f32 %v9982_v55, %v4127_v40  ;;  %4289 = vst [vmem:[#allocation2 + $0x170] sm:$0xff] %v4225_v13  ;;  %v4072_v17 = vadd.f32 %v9587_v42, %v4004_v36  ;;  %v4132_v19 = vmax.f32 %v4068_v60, 0.0 }
 0x753   :  { %v4230_v6 = vadd.f32 %v9982_v55, %v4128_v56  ;;  %4290 = vst [vmem:[#allocation2 + $0x178] sm:$0xff] %v4226_v61  ;;  %v4073_v24 = vadd.f32 %v9587_v42, %v4005_v58  ;;  %v4133_v27 = vmax.f32 %v4069_v11, 0.0  ;;  %v4231_v43 = vadd.f32 %v9982_v55, %v4129_v53 }
 0x754   :  { %4291 = vst [vmem:[#allocation2 + $0x180] sm:$0xff] %v4227_v18  ;;  %v4074_v12 = vadd.f32 %v9587_v42, %v4006_v49  ;;  %v4134_v37 = vmax.f32 %v4070_v38, 0.0  ;;  %v4232_v8 = vadd.f32 %v9982_v55, %v4130_v63  ;;  %v4075_v51 = vadd.f32 %v9587_v42, %v4007_v9  ;;  %v10812_v42 = vld [vmem:[#allocation231_spill] sm:$0xff] }
 0x755   :  { %4292 = vst [vmem:[#allocation2 + $0x188] sm:$0xff] %v4228_v39  ;;  %v4135_v0 = vmax.f32 %v4071_v5, 0.0  ;;  %v4233_v57 = vadd.f32 %v9982_v55, %v4131_v4  ;;  %v4136_v20 = vmax.f32 %v4072_v17, 0.0  ;;  %v4234_v41 = vadd.f32 %v9982_v55, %v4132_v19 }
 0x756   :  { %4293 = vst [vmem:[#allocation2 + $0x190] sm:$0xff] %v4229_v54  ;;  %v4137_v28 = vmax.f32 %v4073_v24, 0.0  ;;  %v4235_v26 = vadd.f32 %v9982_v55, %v4133_v27  ;;  %v4138_v22 = vmax.f32 %v4074_v12, 0.0  ;;  %v4236_v14 = vadd.f32 %v9982_v55, %v4134_v37 }
 0x757   :  { %4294 = vst [vmem:[#allocation2 + $0x198] sm:$0xff] %v4230_v6  ;;  %v4139_v29 = vmax.f32 %v4075_v51, 0.0  ;;  %v4237_v23 = vadd.f32 %v9982_v55, %v4135_v0  ;;  %v4140_v44 = vmax.f32 %v10812_v42, 0.0  ;;  %v4238_v52 = vadd.f32 %v9982_v55, %v4136_v20 }
 0x758   :  { %4295 = vst [vmem:[#allocation2 + $0x1a0] sm:$0xff] %v4231_v43  ;;  %v4239_v1 = vadd.f32 %v9982_v55, %v4137_v28  ;;  %v4240_v7 = vadd.f32 %v9982_v55, %v4138_v22 }
 0x759   :  { %4296 = vst [vmem:[#allocation2 + $0x1a8] sm:$0xff] %v4232_v8  ;;  %v4241_v46 = vadd.f32 %v9982_v55, %v4139_v29  ;;  %v4242_v3 = vadd.f32 %v9982_v55, %v4140_v44 }
 0x75a   :  { %4297 = vst [vmem:[#allocation2 + $0x1b0] sm:$0xff] %v4233_v57 }
 0x75b   :  { %4298 = vst [vmem:[#allocation2 + $0x1b8] sm:$0xff] %v4234_v41 }
 0x75c   :  { %4299 = vst [vmem:[#allocation2 + $0x1c0] sm:$0xff] %v4235_v26 }
 0x75d   :  { %4300 = vst [vmem:[#allocation2 + $0x1c8] sm:$0xff] %v4236_v14 }
 0x75e   :  { %4301 = vst [vmem:[#allocation2 + $0x1d0] sm:$0xff] %v4237_v23 }
 0x75f   :  { %4302 = vst [vmem:[#allocation2 + $0x1d8] sm:$0xff] %v4238_v52 }
 0x760   :  { %4303 = vst [vmem:[#allocation2 + $0x1e0] sm:$0xff] %v4239_v1 }
 0x761   :  { %4304 = vst [vmem:[#allocation2 + $0x1e8] sm:$0xff] %v4240_v7 }
 0x762   :  { %4305 = vst [vmem:[#allocation2 + $0x1f0] sm:$0xff] %v4241_v46 }
 0x763   :  { %4306 = vst [vmem:[#allocation2 + $0x1f8] sm:$0xff] %v4242_v3 }
 0x764   :  { %4319 = dma.vmem_to_hbm [thread:$0]  %s4312_s21, 8192, %s4314_s24, [#allocation3], %s4905_s13, %s4905_s13, %s4896_s12  }
 0x765   :  { %4893 = dma.done.wait [#allocation3], 8192  }
 0x766   :  { %4894 = vsyncadd [#allocation3], 4294959104 }
 0x767   :  { %4324 = vsyncpa [#allocation3], 1 }

</bundles_post_ra>
